<compile_context>
chip_gen: v7x
topology: tpu7x:2x2x1
jax: 0.10.0
libtpu: 0.0.40
codegen_flags: <defaults>
</compile_context>

<pallas_src>
import jax
import jax.numpy as jnp
from jax.experimental import pallas as pl
from jax.experimental.pallas import tpu as pltpu


# ---------------------------------------------------------------------------
# Kernel
# ---------------------------------------------------------------------------
def discriminator_kernel(x_ref,
                         w1_ref, s1_ref, b1_ref,
                         w2_ref, s2_ref, b2_ref,
                         w3_ref, s3_ref, b3_ref,
                         w4_ref, s4_ref, b4_ref,
                         w5_ref, b5_ref,
                         o_ref):
    # Single cast of the input tile to bf16 (no-op if x is already bf16).
    h = x_ref[...].astype(jnp.bfloat16)                       # (TB, D_in)

    def qlinear_lrelu(h, w_ref, s_ref, b_ref):
        # int8 weights -> f32 -> bf16 (integers <=127 are exact in bf16);
        # bf16 x bf16 MXU matmul with f32 accumulation; per-output-channel
        # scale applied after accumulation; f32 bias add.
        w = w_ref[...].astype(jnp.float32).astype(jnp.bfloat16)
        z = jnp.dot(h, w, preferred_element_type=jnp.float32)
        z = z * s_ref[...] + b_ref[...]
        # LeakyReLU(0.2): mul + max (no compare/select mask vreg).
        z = jnp.maximum(z, 0.2 * z)
        # Dropout(0.3) -> identity (eval mode).
        # Keep inter-layer activations in bf16 for the next MXU matmul.
        return z.astype(jnp.bfloat16)

    h = qlinear_lrelu(h, w1_ref, s1_ref, b1_ref)               # (TB, 1024)
    h = qlinear_lrelu(h, w2_ref, s2_ref, b2_ref)               # (TB, 512)
    h = qlinear_lrelu(h, w3_ref, s3_ref, b3_ref)               # (TB, 256)
    h = qlinear_lrelu(h, w4_ref, s4_ref, b4_ref)               # (TB, 128)

    # Final 128 -> 1 projection as VPU multiply + XLU row reduction.
    z = jnp.sum(h.astype(jnp.float32) * w5_ref[...],
                axis=-1, keepdims=True) + b5_ref[...]          # (TB, 1)

    # sigmoid(z) = 0.5 * (1 + tanh(z/2)): stable, uses the EUP.
    o_ref[...] = (0.5 * (jnp.tanh(0.5 * z) + 1.0)).astype(o_ref.dtype)


# ---------------------------------------------------------------------------
# Parameters
# ---------------------------------------------------------------------------
def make_discriminator_params(key, input_size, dtype=jnp.float32):
    """PyTorch-style uniform(-1/sqrt(fan_in), +1/sqrt(fan_in)) init.

    Weights stored as (F_in, F_out) (transposed vs. nn.Linear) so the kernel
    computes plain `x @ W + b`. Biases stored as (1, F_out).
    """
    dims = [input_size, 1024, 512, 256, 128, 1]
    params = []
    for i in range(5):
        key, kw, kb = jax.random.split(key, 3)
        fan_in, fan_out = dims[i], dims[i + 1]
        bound = 1.0 / jnp.sqrt(jnp.array(fan_in, jnp.float32))
        w = jax.random.uniform(kw, (fan_in, fan_out), dtype, -bound, bound)
        b = jax.random.uniform(kb, (1, fan_out), dtype, -bound, bound)
        params.append((w, b))
    return params


def quantize_discriminator_params(params):
    """int8 per-output-channel symmetric quantization of the 4 hidden layers.

    Returns 5 tuples matching the kernel argument order:
      layers 0-3: (w_int8 (F_in,F_out), scale f32 (1,F_out), bias f32 (1,F_out))
      layer 4:    (w5 f32 (1,128), bias f32 (1,1))   # tiny; kept full precision
    """
    q = []
    for i, (w, b) in enumerate(params):
        if i < 4:
            amax = jnp.max(jnp.abs(w), axis=0, keepdims=True)          # (1, F_out)
            scale = jnp.where(amax > 0, amax / 127.0, 1.0).astype(jnp.float32)
            w_i8 = jnp.clip(jnp.round(w / scale), -127, 127).astype(jnp.int8)
            q.append((w_i8, scale, b.astype(jnp.float32)))
        else:
            # Last layer used as a (1,128) row for the in-kernel reduction.
            q.append((w.astype(jnp.float32).reshape(1, -1),
                      b.astype(jnp.float32)))
    return q


# ---------------------------------------------------------------------------
# Wrapper
# ---------------------------------------------------------------------------
def _round_up(n, m):
    return (n + m - 1) // m * m


def _base_batch_tile():
    # 512 rows amortize the ~0.35 us per-grid-step overhead on v6e/v7x;
    # 256 on v5e (4x128x128 MXU, smaller VMEM).
    try:
        kind = jax.devices()[0].device_kind.lower()
        if "v5" in kind:
            return 256
    except Exception:
        pass
    return 512


@jax.jit
def discriminator_forward(x, qparams):
    """x: any shape (B, ...) — flattened like x.view(x.size(0), -1)."""
    B = x.shape[0]
    x2d = x.reshape(B, -1)
    if x2d.dtype not in (jnp.bfloat16, jnp.float32):
        x2d = x2d.astype(jnp.float32)
    d_in = x2d.shape[1]

    base_tb = _base_batch_tile()
    if B <= base_tb:
        # Single full-array block: no padding, block dims equal the array dims
        # so the (8,128) divisibility constraint does not apply.
        tb, b_pad = B, B
    else:
        tb = base_tb                       # multiple of 8 -> valid block shape
        b_pad = _round_up(B, tb)
        if b_pad != B:
            # TODO(synk): replace this pad (full HBM copy of x) with in-kernel
            # remainder-row masking when B is just over a tile boundary.
            x2d = jnp.pad(x2d, ((0, b_pad - B), (0, 0)))
    n_tiles = b_pad // tb

    # Flatten params in kernel-argument order.
    flat = [x2d]
    for layer in qparams[:4]:
        flat.extend(layer)                 # (w_int8, scale, bias)
    flat.extend(qparams[4])                # (w5_row, bias5)

    # Input/output tiled over the batch; weights/scales/biases use constant
    # index_maps so they are DMA'd once and stay resident across batch tiles.
    in_specs = [pl.BlockSpec((tb, d_in), lambda i: (i, 0))]
    in_specs += [pl.BlockSpec(a.shape, lambda i: (0, 0)) for a in flat[1:]]

    out = pl.pallas_call(
        discriminator_kernel,
        out_shape=jax.ShapeDtypeStruct((b_pad, 1), jnp.float32),
        grid=(n_tiles,),
        in_specs=in_specs,
        out_specs=pl.BlockSpec((tb, 1), lambda i: (i, 0)),
        compiler_params=pltpu.CompilerParams(
            # NOTE(v7x): with n_tiles >= 2 each TensorCore re-fetches the
            # resident weights; keep "parallel" for compute-bound (large-B)
            # runs, the weight stream is already halved by int8.
            dimension_semantics=("parallel",),
            # ~1.5 MB int8 weights + scales/biases + activations: 32 MiB is
            # ample and leaves headroom on v7x's 64 MiB physical VMEM.
            vmem_limit_bytes=32 << 20,
        ),
    )(*flat)
    return out[:B] if b_pad != B else out


# ---------------------------------------------------------------------------
# Pure-JAX reference replicating the kernel's quantized / bf16 math.
# ---------------------------------------------------------------------------
def _reference_forward(x, qparams):
    B = x.shape[0]
    h = x.reshape(B, -1)
    if h.dtype not in (jnp.bfloat16, jnp.float32):
        h = h.astype(jnp.float32)
    h = h.astype(jnp.bfloat16)
    for (w_i8, scale, b) in qparams[:4]:
        w = w_i8.astype(jnp.float32).astype(jnp.bfloat16)
        z = jnp.dot(h, w, preferred_element_type=jnp.float32) * scale + b
        z = jnp.maximum(z, 0.2 * z)
        h = z.astype(jnp.bfloat16)
    w5, b5 = qparams[4]
    z = jnp.sum(h.astype(jnp.float32) * w5, axis=-1, keepdims=True) + b5
    return jax.nn.sigmoid(z)


if __name__ == "__main__":
    key = jax.random.PRNGKey(0)
    k_x, k_p = jax.random.split(key)

    # Small MNIST-like input: batch=4, NCHW (4,1,28,28) -> input_size=784.
    B, C, H, W = 4, 1, 28, 28
    input_size = C * H * W
    x = jax.random.normal(k_x, (B, C, H, W), dtype=jnp.float32)

    params = make_discriminator_params(k_p, input_size)
    qparams = quantize_discriminator_params(params)

    out = jax.block_until_ready(discriminator_forward(x, qparams))
    ref = _reference_forward(x, qparams)

    assert out.shape == (B, 1), out.shape
    max_diff = float(jnp.max(jnp.abs(out - ref)))
    assert jnp.allclose(out, ref, atol=2e-3, rtol=2e-3), (
        f"mismatch vs reference, max abs diff = {max_diff}")

    print("KERNEL_OK")
</pallas_src>

<mosaic_0001>
module attributes {stable_mosaic.version = 11 : i64} {
  func.func @discriminator_kernel(%arg0: i32, %arg1: memref<4x784xf32, #tpu.memory_space<vmem>>, %arg2: memref<784x1024xi8, #tpu.memory_space<vmem>>, %arg3: memref<1x1024xf32, #tpu.memory_space<vmem>>, %arg4: memref<1x1024xf32, #tpu.memory_space<vmem>>, %arg5: memref<1024x512xi8, #tpu.memory_space<vmem>>, %arg6: memref<1x512xf32, #tpu.memory_space<vmem>>, %arg7: memref<1x512xf32, #tpu.memory_space<vmem>>, %arg8: memref<512x256xi8, #tpu.memory_space<vmem>>, %arg9: memref<1x256xf32, #tpu.memory_space<vmem>>, %arg10: memref<1x256xf32, #tpu.memory_space<vmem>>, %arg11: memref<256x128xi8, #tpu.memory_space<vmem>>, %arg12: memref<1x128xf32, #tpu.memory_space<vmem>>, %arg13: memref<1x128xf32, #tpu.memory_space<vmem>>, %arg14: memref<1x128xf32, #tpu.memory_space<vmem>>, %arg15: memref<1x1xf32, #tpu.memory_space<vmem>>, %arg16: memref<4x1xf32, #tpu.memory_space<vmem>>) attributes {dimension_semantics = [#tpu.dimension_semantics<parallel>], iteration_bounds = array<i64: 1>, scalar_prefetch = 0 : i64, scratch_operands = 0 : i64, tpu.core_type = #tpu.core_type<tc>, window_params = [{transform_indices = @transform_0, window_bounds = array<i64: 4, 784>}, {pipeline_mode = #tpu.pipeline_mode<synchronous>, transform_indices = @transform_1, window_bounds = array<i64: 784, 1024>}, {pipeline_mode = #tpu.pipeline_mode<synchronous>, transform_indices = @transform_2, window_bounds = array<i64: 1, 1024>}, {pipeline_mode = #tpu.pipeline_mode<synchronous>, transform_indices = @transform_3, window_bounds = array<i64: 1, 1024>}, {pipeline_mode = #tpu.pipeline_mode<synchronous>, transform_indices = @transform_4, window_bounds = array<i64: 1024, 512>}, {pipeline_mode = #tpu.pipeline_mode<synchronous>, transform_indices = @transform_5, window_bounds = array<i64: 1, 512>}, {pipeline_mode = #tpu.pipeline_mode<synchronous>, transform_indices = @transform_6, window_bounds = array<i64: 1, 512>}, {pipeline_mode = #tpu.pipeline_mode<synchronous>, transform_indices = @transform_7, window_bounds = array<i64: 512, 256>}, {pipeline_mode = #tpu.pipeline_mode<synchronous>, transform_indices = @transform_8, window_bounds = array<i64: 1, 256>}, {pipeline_mode = #tpu.pipeline_mode<synchronous>, transform_indices = @transform_9, window_bounds = array<i64: 1, 256>}, {pipeline_mode = #tpu.pipeline_mode<synchronous>, transform_indices = @transform_10, window_bounds = array<i64: 256, 128>}, {pipeline_mode = #tpu.pipeline_mode<synchronous>, transform_indices = @transform_11, window_bounds = array<i64: 1, 128>}, {pipeline_mode = #tpu.pipeline_mode<synchronous>, transform_indices = @transform_12, window_bounds = array<i64: 1, 128>}, {pipeline_mode = #tpu.pipeline_mode<synchronous>, transform_indices = @transform_13, window_bounds = array<i64: 1, 128>}, {pipeline_mode = #tpu.pipeline_mode<synchronous>, transform_indices = @transform_14, window_bounds = array<i64: 1, 1>}, {transform_indices = @transform_15, window_bounds = array<i64: 4, 1>}]} {
    %c0 = arith.constant 0 : index
    %c0_0 = arith.constant 0 : index
    %0 = vector.load %arg1[%c0, %c0_0] : memref<4x784xf32, #tpu.memory_space<vmem>>, vector<4x784xf32>
    %1 = arith.truncf %0 : vector<4x784xf32> to vector<4x784xbf16>
    %c0_1 = arith.constant 0 : index
    %c0_2 = arith.constant 0 : index
    %2 = vector.load %arg2[%c0_1, %c0_2] : memref<784x1024xi8, #tpu.memory_space<vmem>>, vector<784x1024xi8>
    %3 = arith.sitofp %2 : vector<784x1024xi8> to vector<784x1024xf32>
    %4 = arith.truncf %3 : vector<784x1024xf32> to vector<784x1024xbf16>
    %cst = arith.constant dense<0.000000e+00> : vector<4x1024xf32>
    %5 = tpu.matmul %1, %4, %cst {dimension_numbers = #tpu.dot_dimension_numbers<[1], [0], [0], [1], [0, 0, 1, 1], [], []>} : vector<4x784xbf16>, vector<784x1024xbf16>, vector<4x1024xf32> -> vector<4x1024xf32>
    %c0_3 = arith.constant 0 : index
    %c0_4 = arith.constant 0 : index
    %6 = vector.load %arg3[%c0_3, %c0_4] : memref<1x1024xf32, #tpu.memory_space<vmem>>, vector<1x1024xf32>
    %7 = vector.broadcast %6 : vector<1x1024xf32> to vector<4x1024xf32>
    %8 = arith.mulf %5, %7 : vector<4x1024xf32>
    %c0_5 = arith.constant 0 : index
    %c0_6 = arith.constant 0 : index
    %9 = vector.load %arg4[%c0_5, %c0_6] : memref<1x1024xf32, #tpu.memory_space<vmem>>, vector<1x1024xf32>
    %10 = vector.broadcast %9 : vector<1x1024xf32> to vector<4x1024xf32>
    %11 = arith.addf %8, %10 : vector<4x1024xf32>
    %cst_7 = arith.constant 2.000000e-01 : f32
    %12 = vector.broadcast %cst_7 : f32 to vector<4x1024xf32>
    %13 = arith.mulf %12, %11 : vector<4x1024xf32>
    %14 = arith.maximumf %11, %13 : vector<4x1024xf32>
    %15 = arith.truncf %14 : vector<4x1024xf32> to vector<4x1024xbf16>
    %c0_8 = arith.constant 0 : index
    %c0_9 = arith.constant 0 : index
    %16 = vector.load %arg5[%c0_8, %c0_9] : memref<1024x512xi8, #tpu.memory_space<vmem>>, vector<1024x512xi8>
    %17 = arith.sitofp %16 : vector<1024x512xi8> to vector<1024x512xf32>
    %18 = arith.truncf %17 : vector<1024x512xf32> to vector<1024x512xbf16>
    %cst_10 = arith.constant dense<0.000000e+00> : vector<4x512xf32>
    %19 = tpu.matmul %15, %18, %cst_10 {dimension_numbers = #tpu.dot_dimension_numbers<[1], [0], [0], [1], [0, 0, 1, 1], [], []>} : vector<4x1024xbf16>, vector<1024x512xbf16>, vector<4x512xf32> -> vector<4x512xf32>
    %c0_11 = arith.constant 0 : index
    %c0_12 = arith.constant 0 : index
    %20 = vector.load %arg6[%c0_11, %c0_12] : memref<1x512xf32, #tpu.memory_space<vmem>>, vector<1x512xf32>
    %21 = vector.broadcast %20 : vector<1x512xf32> to vector<4x512xf32>
    %22 = arith.mulf %19, %21 : vector<4x512xf32>
    %c0_13 = arith.constant 0 : index
    %c0_14 = arith.constant 0 : index
    %23 = vector.load %arg7[%c0_13, %c0_14] : memref<1x512xf32, #tpu.memory_space<vmem>>, vector<1x512xf32>
    %24 = vector.broadcast %23 : vector<1x512xf32> to vector<4x512xf32>
    %25 = arith.addf %22, %24 : vector<4x512xf32>
    %cst_15 = arith.constant 2.000000e-01 : f32
    %26 = vector.broadcast %cst_15 : f32 to vector<4x512xf32>
    %27 = arith.mulf %26, %25 : vector<4x512xf32>
    %28 = arith.maximumf %25, %27 : vector<4x512xf32>
    %29 = arith.truncf %28 : vector<4x512xf32> to vector<4x512xbf16>
    %c0_16 = arith.constant 0 : index
    %c0_17 = arith.constant 0 : index
    %30 = vector.load %arg8[%c0_16, %c0_17] : memref<512x256xi8, #tpu.memory_space<vmem>>, vector<512x256xi8>
    %31 = arith.sitofp %30 : vector<512x256xi8> to vector<512x256xf32>
    %32 = arith.truncf %31 : vector<512x256xf32> to vector<512x256xbf16>
    %cst_18 = arith.constant dense<0.000000e+00> : vector<4x256xf32>
    %33 = tpu.matmul %29, %32, %cst_18 {dimension_numbers = #tpu.dot_dimension_numbers<[1], [0], [0], [1], [0, 0, 1, 1], [], []>} : vector<4x512xbf16>, vector<512x256xbf16>, vector<4x256xf32> -> vector<4x256xf32>
    %c0_19 = arith.constant 0 : index
    %c0_20 = arith.constant 0 : index
    %34 = vector.load %arg9[%c0_19, %c0_20] : memref<1x256xf32, #tpu.memory_space<vmem>>, vector<1x256xf32>
    %35 = vector.broadcast %34 : vector<1x256xf32> to vector<4x256xf32>
    %36 = arith.mulf %33, %35 : vector<4x256xf32>
    %c0_21 = arith.constant 0 : index
    %c0_22 = arith.constant 0 : index
    %37 = vector.load %arg10[%c0_21, %c0_22] : memref<1x256xf32, #tpu.memory_space<vmem>>, vector<1x256xf32>
    %38 = vector.broadcast %37 : vector<1x256xf32> to vector<4x256xf32>
    %39 = arith.addf %36, %38 : vector<4x256xf32>
    %cst_23 = arith.constant 2.000000e-01 : f32
    %40 = vector.broadcast %cst_23 : f32 to vector<4x256xf32>
    %41 = arith.mulf %40, %39 : vector<4x256xf32>
    %42 = arith.maximumf %39, %41 : vector<4x256xf32>
    %43 = arith.truncf %42 : vector<4x256xf32> to vector<4x256xbf16>
    %c0_24 = arith.constant 0 : index
    %c0_25 = arith.constant 0 : index
    %44 = vector.load %arg11[%c0_24, %c0_25] : memref<256x128xi8, #tpu.memory_space<vmem>>, vector<256x128xi8>
    %45 = arith.sitofp %44 : vector<256x128xi8> to vector<256x128xf32>
    %46 = arith.truncf %45 : vector<256x128xf32> to vector<256x128xbf16>
    %cst_26 = arith.constant dense<0.000000e+00> : vector<4x128xf32>
    %47 = tpu.matmul %43, %46, %cst_26 {dimension_numbers = #tpu.dot_dimension_numbers<[1], [0], [0], [1], [0, 0, 1, 1], [], []>} : vector<4x256xbf16>, vector<256x128xbf16>, vector<4x128xf32> -> vector<4x128xf32>
    %c0_27 = arith.constant 0 : index
    %c0_28 = arith.constant 0 : index
    %48 = vector.load %arg12[%c0_27, %c0_28] : memref<1x128xf32, #tpu.memory_space<vmem>>, vector<1x128xf32>
    %49 = vector.broadcast %48 : vector<1x128xf32> to vector<4x128xf32>
    %50 = arith.mulf %47, %49 : vector<4x128xf32>
    %c0_29 = arith.constant 0 : index
    %c0_30 = arith.constant 0 : index
    %51 = vector.load %arg13[%c0_29, %c0_30] : memref<1x128xf32, #tpu.memory_space<vmem>>, vector<1x128xf32>
    %52 = vector.broadcast %51 : vector<1x128xf32> to vector<4x128xf32>
    %53 = arith.addf %50, %52 : vector<4x128xf32>
    %cst_31 = arith.constant 2.000000e-01 : f32
    %54 = vector.broadcast %cst_31 : f32 to vector<4x128xf32>
    %55 = arith.mulf %54, %53 : vector<4x128xf32>
    %56 = arith.maximumf %53, %55 : vector<4x128xf32>
    %57 = arith.truncf %56 : vector<4x128xf32> to vector<4x128xbf16>
    %58 = arith.extf %57 : vector<4x128xbf16> to vector<4x128xf32>
    %c0_32 = arith.constant 0 : index
    %c0_33 = arith.constant 0 : index
    %59 = vector.load %arg14[%c0_32, %c0_33] : memref<1x128xf32, #tpu.memory_space<vmem>>, vector<1x128xf32>
    %60 = vector.broadcast %59 : vector<1x128xf32> to vector<4x128xf32>
    %61 = arith.mulf %58, %60 : vector<4x128xf32>
    %cst_34 = arith.constant dense<0.000000e+00> : vector<4xf32>
    %62 = vector.multi_reduction <add>, %61, %cst_34 [1] : vector<4x128xf32> to vector<4xf32>
    %63 = vector.shape_cast %62 : vector<4xf32> to vector<4x1xf32>
    %c0_35 = arith.constant 0 : index
    %c0_36 = arith.constant 0 : index
    %64 = vector.load %arg15[%c0_35, %c0_36] : memref<1x1xf32, #tpu.memory_space<vmem>>, vector<1x1xf32>
    %65 = vector.broadcast %64 : vector<1x1xf32> to vector<4x1xf32>
    %66 = arith.addf %63, %65 : vector<4x1xf32>
    %cst_37 = arith.constant 5.000000e-01 : f32
    %67 = vector.broadcast %cst_37 : f32 to vector<4x1xf32>
    %68 = arith.mulf %67, %66 : vector<4x1xf32>
    %69 = math.tanh %68 : vector<4x1xf32>
    %cst_38 = arith.constant 1.000000e+00 : f32
    %70 = vector.broadcast %cst_38 : f32 to vector<4x1xf32>
    %71 = arith.addf %69, %70 : vector<4x1xf32>
    %cst_39 = arith.constant 5.000000e-01 : f32
    %72 = vector.broadcast %cst_39 : f32 to vector<4x1xf32>
    %73 = arith.mulf %72, %71 : vector<4x1xf32>
    %c0_40 = arith.constant 0 : index
    %c0_41 = arith.constant 0 : index
    %74 = vector.load %arg16[%c0_40, %c0_41] : memref<4x1xf32, #tpu.memory_space<vmem>>, vector<4x1xf32>
    tpu.vector_store %arg16[%c0_40, %c0_41], %73 {strides = array<i32>} : memref<4x1xf32, #tpu.memory_space<vmem>>, vector<4x1xf32>,
    return
  }
  func.func @transform_0(%arg0: i32) -> (i32, i32) {
    %c0_i32 = arith.constant 0 : i32
    %c0_i32_0 = arith.constant 0 : i32
    return %arg0, %c0_i32 : i32, i32
  }
  func.func @transform_1(%arg0: i32) -> (i32, i32) {
    %c0_i32 = arith.constant 0 : i32
    %c0_i32_0 = arith.constant 0 : i32
    %c0_i32_1 = arith.constant 0 : i32
    return %c0_i32, %c0_i32_0 : i32, i32
  }
  func.func @transform_2(%arg0: i32) -> (i32, i32) {
    %c0_i32 = arith.constant 0 : i32
    %c0_i32_0 = arith.constant 0 : i32
    %c0_i32_1 = arith.constant 0 : i32
    return %c0_i32, %c0_i32_0 : i32, i32
  }
  func.func @transform_3(%arg0: i32) -> (i32, i32) {
    %c0_i32 = arith.constant 0 : i32
    %c0_i32_0 = arith.constant 0 : i32
    %c0_i32_1 = arith.constant 0 : i32
    return %c0_i32, %c0_i32_0 : i32, i32
  }
  func.func @transform_4(%arg0: i32) -> (i32, i32) {
    %c0_i32 = arith.constant 0 : i32
    %c0_i32_0 = arith.constant 0 : i32
    %c0_i32_1 = arith.constant 0 : i32
    return %c0_i32, %c0_i32_0 : i32, i32
  }
  func.func @transform_5(%arg0: i32) -> (i32, i32) {
    %c0_i32 = arith.constant 0 : i32
    %c0_i32_0 = arith.constant 0 : i32
    %c0_i32_1 = arith.constant 0 : i32
    return %c0_i32, %c0_i32_0 : i32, i32
  }
  func.func @transform_6(%arg0: i32) -> (i32, i32) {
    %c0_i32 = arith.constant 0 : i32
    %c0_i32_0 = arith.constant 0 : i32
    %c0_i32_1 = arith.constant 0 : i32
    return %c0_i32, %c0_i32_0 : i32, i32
  }
  func.func @transform_7(%arg0: i32) -> (i32, i32) {
    %c0_i32 = arith.constant 0 : i32
    %c0_i32_0 = arith.constant 0 : i32
    %c0_i32_1 = arith.constant 0 : i32
    return %c0_i32, %c0_i32_0 : i32, i32
  }
  func.func @transform_8(%arg0: i32) -> (i32, i32) {
    %c0_i32 = arith.constant 0 : i32
    %c0_i32_0 = arith.constant 0 : i32
    %c0_i32_1 = arith.constant 0 : i32
    return %c0_i32, %c0_i32_0 : i32, i32
  }
  func.func @transform_9(%arg0: i32) -> (i32, i32) {
    %c0_i32 = arith.constant 0 : i32
    %c0_i32_0 = arith.constant 0 : i32
    %c0_i32_1 = arith.constant 0 : i32
    return %c0_i32, %c0_i32_0 : i32, i32
  }
  func.func @transform_10(%arg0: i32) -> (i32, i32) {
    %c0_i32 = arith.constant 0 : i32
    %c0_i32_0 = arith.constant 0 : i32
    %c0_i32_1 = arith.constant 0 : i32
    return %c0_i32, %c0_i32_0 : i32, i32
  }
  func.func @transform_11(%arg0: i32) -> (i32, i32) {
    %c0_i32 = arith.constant 0 : i32
    %c0_i32_0 = arith.constant 0 : i32
    %c0_i32_1 = arith.constant 0 : i32
    return %c0_i32, %c0_i32_0 : i32, i32
  }
  func.func @transform_12(%arg0: i32) -> (i32, i32) {
    %c0_i32 = arith.constant 0 : i32
    %c0_i32_0 = arith.constant 0 : i32
    %c0_i32_1 = arith.constant 0 : i32
    return %c0_i32, %c0_i32_0 : i32, i32
  }
  func.func @transform_13(%arg0: i32) -> (i32, i32) {
    %c0_i32 = arith.constant 0 : i32
    %c0_i32_0 = arith.constant 0 : i32
    %c0_i32_1 = arith.constant 0 : i32
    return %c0_i32, %c0_i32_0 : i32, i32
  }
  func.func @transform_14(%arg0: i32) -> (i32, i32) {
    %c0_i32 = arith.constant 0 : i32
    %c0_i32_0 = arith.constant 0 : i32
    %c0_i32_1 = arith.constant 0 : i32
    return %c0_i32, %c0_i32_0 : i32, i32
  }
  func.func @transform_15(%arg0: i32) -> (i32, i32) {
    %c0_i32 = arith.constant 0 : i32
    %c0_i32_0 = arith.constant 0 : i32
    return %arg0, %c0_i32 : i32, i32
  }
}

</mosaic_0001>

<bundles_post_ra>
// kernel: discriminator_forward.1
= control target key start
LH: loop header
LB: loop body
LE: loop exit
PB: predicated region body
PF: predicated region fallthrough
CT: control target
= control target key end

     0   :  { %s6619_s0 = inlined_call_operand.vmem [shape: f32[4,784], index: 0, kind: input, shape index: {}]   ;;  %s6620_s1 = inlined_call_operand.hbm [shape: s8[784,1024], index: 1, kind: input, shape index: {}]   ;;  %s6621_s2 = inlined_call_operand.vmem [shape: f32[1,1024], index: 2, kind: input, shape index: {}]   ;;  %s6622_s3 = inlined_call_operand.vmem [shape: f32[1,1024], index: 3, kind: input, shape index: {}]   ;;  %s6623_s4 = inlined_call_operand.hbm [shape: s8[1024,512], index: 4, kind: input, shape index: {}]   ;;  %s6624_s5 = inlined_call_operand.vmem [shape: f32[1,512], index: 5, kind: input, shape index: {}]   ;;  %s6625_s6 = inlined_call_operand.vmem [shape: f32[1,512], index: 6, kind: input, shape index: {}]   ;;  %s6626_s7 = inlined_call_operand.vmem [shape: s8[512,256], index: 7, kind: input, shape index: {}]   ;;  %s6627_s8 = inlined_call_operand.vmem [shape: f32[1,256], index: 8, kind: input, shape index: {}]   ;;  %s6628_s9 = inlined_call_operand.vmem [shape: f32[1,256], index: 9, kind: input, shape index: {}]   ;;  %s6629_s10 = inlined_call_operand.vmem [shape: s8[256,128], index: 10, kind: input, shape index: {}]   ;;  %s6630_s11 = inlined_call_operand.vmem [shape: f32[1,128], index: 11, kind: input, shape index: {}]   ;;  %s6631_s12 = inlined_call_operand.vmem [shape: f32[1,128], index: 12, kind: input, shape index: {}]   ;;  %s6632_s13 = inlined_call_operand.vmem [shape: f32[1,128], index: 13, kind: input, shape index: {}]   ;;  %s6633_s14 = inlined_call_operand.<no memory space> [shape: f32[1,1], index: 14, kind: input, shape index: {}]   ;;  %s6634_s15 = inlined_call_operand.vmem [shape: f32[4,1], index: 15, kind: output, shape index: {}]  }
   0x1   :  { %v20_v0 = vstv %s6633_s14 }
   0x2   :  { %21 = vst [vmem:[#allocation2] sm:$0x1] %v20_v0 }
   0x3   :  { %22 = vsyncpa [#allocation4], 0 }
   0x4   :  { %23 = vsyncpa [#allocation6], 0  ;;  %s5091_s20 = smov [#allocation3]   ;;  %s5043_s24 = scalar_lea.hbm %s6620_s1, 25088 }
   0x5   :  { %s31_s21 = sshll.u32 %s5091_s20, 4  ;;  %p5044_p0 = scmp.ne.s32.totalorder %s6620_s1, %s5043_s24  ;;  %s32_s21 = int_to_ptr.vmem [resolvable:$true] %s31_s21 }
   0x6   :  { %p5047_p1 = scmp.lt.u32.totalorder %s5043_s24, %s6620_s1 }
   0x8   :  { %p5049_p2 = pnand %p5047_p1, %p5044_p0 }
   0xa   :  { %5052 = shalt.err (!%p5049_p2)
}
   0xb   :  { %s5053_s14 = scalar_lea.vmem %s32_s21, 25088  ;;  %p5058_p4 = scmp.lt.s32.totalorder %s32_s21, %s32_s21 }
   0xc   :  { %p5054_p3 = scmp.ne.s32.totalorder %s32_s21, %s5053_s14  ;;  %p5059_p5 = scmp.lt.s32.totalorder %s5053_s14, %s5053_s14 }
   0xe   :  { %p5060_p6 = por %p5059_p5, %p5058_p4 }
  0x10   :  { %p5061_p7 = pnand %p5060_p6, %p5054_p3 }
  0x12   :  { %5064 = shalt.err (!%p5061_p7)
}
  0x13   :  { %s5092_s29 = smov 256   ;;  %s5093_s30 = smov 16  }
  0x14   :  { %37 = dma.hbm_to_vmem [thread:$0]  %s6620_s1, 25088, %s32_s21, [#allocation4], %s5092_s29, %s5092_s29, %s5093_s30  }
  0x15   :  { %s5094_s18 = smov [#allocation5]   ;;  %s5065_s23 = scalar_lea.hbm %s6623_s4, 16384 }
  0x16   :  { %s47_s19 = sshll.u32 %s5094_s18, 4  ;;  %p5066_p8 = scmp.ne.s32.totalorder %s6623_s4, %s5065_s23  ;;  %s48_s19 = int_to_ptr.vmem [resolvable:$true] %s47_s19 }
  0x17   :  { %p5069_p9 = scmp.lt.u32.totalorder %s5065_s23, %s6623_s4 }
  0x19   :  { %p5071_p10 = pnand %p5069_p9, %p5066_p8 }
  0x1b   :  { %5074 = shalt.err (!%p5071_p10)
}
  0x1c   :  { %s5075_s28 = scalar_lea.vmem %s48_s19, 16384  ;;  %p5080_p12 = scmp.lt.s32.totalorder %s48_s19, %s48_s19 }
  0x1d   :  { %p5076_p11 = scmp.ne.s32.totalorder %s48_s19, %s5075_s28  ;;  %p5081_p13 = scmp.lt.s32.totalorder %s5075_s28, %s5075_s28 }
  0x1f   :  { %p5082_p0 = por %p5081_p13, %p5080_p12 }
  0x21   :  { %p5083_p1 = pnand %p5082_p0, %p5076_p11 }
  0x23   :  { %5086 = shalt.err (!%p5083_p1)
}
  0x24   :  { %s5095_s1 = smov 512   ;;  %s5096_s21 = smov 32  }
  0x25   :  { %53 = dma.hbm_to_vmem [thread:$0]  %s6623_s4, 16384, %s48_s19, [#allocation6], %s5095_s1, %s5095_s1, %s5096_s21  }
  0x26   :  { %5087 = dma.done.wait [#allocation4], 25088  }
  0x27   :  { %5088 = vsyncadd [#allocation4], 4294942208 }
  0x28   :  { %5089 = dma.done.wait [#allocation6], 16384  }
  0x29   :  { %5090 = vsyncadd [#allocation6], 4294950912  ;;  %v5205_v1 = vld [vmem:[#allocation3] sm:$0xff]  ;;  %v5207_v2 = vld [vmem:[#allocation3 + $0x10] sm:$0xff]  ;;  %vm2649_vm0 = vcmask 130048   ;;  %vm4513_vm1 = vcmask 1043456  }
  0x2a   :  { %v5209_v3 = vld [vmem:[#allocation3 + $0x200] sm:$0xff]  ;;  %v297_v4 = vunpack.c.l.s8.bf16 %v5205_v1  ;;  %v301_v5 = vunpack.c.l.s8.bf16 %v5207_v2  ;;  %v5213_v6 = vld [vmem:[#allocation3 + $0x210] sm:$0xff]  ;;  %vm4529_vm2 = vcmask 3072  }
  0x2b   :  { %v5215_v7 = vld [vmem:[#allocation3 + $0x20] sm:$0xff]  ;;  %v5217_v8 = vld [vmem:[#allocation3 + $0x30] sm:$0xff]  ;;  %v425_v9 = vunpack.c.l.s8.bf16 %v5209_v3  ;;  %v6635_v10 = vunpack.c.h.s8.bf16 %v5209_v3  ;;  %v429_v11 = vunpack.c.l.s8.bf16 %v5213_v6  ;;  %v6636_v12 = vunpack.c.h.s8.bf16 %v5213_v6 }
  0x2c   :  { %v5223_v13 = vld [vmem:[#allocation3 + $0x220] sm:$0xff]  ;;  %v5225_v14 = vld [vmem:[#allocation3 + $0x230] sm:$0xff]  ;;  %v4538_v16 = vcombine.high %v297_v4, %v301_v5  ;;  %v4537_v17 = vcombine.low %v297_v4, %v301_v5  ;;  %v305_v18 = vunpack.c.l.s8.bf16 %v5215_v7  ;;  %v309_v25 = vunpack.c.l.s8.bf16 %v5217_v8 }
  0x2d   :  { %v5227_v15 = vld [vmem:[#allocation3 + $0x40] sm:$0xff]  ;;  %v5230_v19 = vld [vmem:[#allocation3 + $0x50] sm:$0xff]  ;;  %v4666_v22 = vcombine.high %v425_v9, %v429_v11  ;;  %v5240_v23 = vcombine.low %v6635_v10, %v6636_v12  ;;  %v4665_v24 = vcombine.low %v425_v9, %v429_v11  ;;  %v433_v26 = vunpack.c.l.s8.bf16 %v5223_v13 }
  0x2e   :  { %v5232_v20 = vld [vmem:[#allocation3 + $0x240] sm:$0xff]  ;;  %v5234_v21 = vld [vmem:[#allocation3 + $0x250] sm:$0xff]  ;;  %2653 = vmatprep.subr.bf16.mxu1 %v4538_v16  ;;  %v437_v27 = vunpack.c.l.s8.bf16 %v5225_v14  ;;  %v313_v28 = vunpack.c.l.s8.bf16 %v5227_v15  ;;  %v317_v29 = vunpack.c.l.s8.bf16 %v5230_v19  ;;  %v4546_v32 = vcombine.high %v305_v18, %v309_v25 }
  0x2f   :  { %6695 = vst [vmem:[#allocation9_spill] sm:$0xff] %v5240_v23  ;;  %v5247_v30 = vld [vmem:[#allocation3 + $0x60] sm:$0xff]  ;;  %v5249_v31 = vld [vmem:[#allocation3 + $0x70] sm:$0xff]  ;;  %2694 = vmatprep.subr.bf16.mxu0 %v4666_v22  ;;  %2654 = vmatpush1.bf16.msra.mxu1 %v4537_v17  ;;  %v4545_v33 = vcombine.low %v305_v18, %v309_v25  ;;  %v441_v34 = vunpack.c.l.s8.bf16 %v5232_v20  ;;  %v445_v35 = vunpack.c.l.s8.bf16 %v5234_v21 }
  0x30   :  { %v5253_v36 = vld [vmem:[#allocation3 + $0x260] sm:$0xff]  ;;  %v5255_v37 = vld [vmem:[#allocation3 + $0x270] sm:$0xff]  ;;  %2695 = vmatpush1.bf16.msra.mxu0 %v4665_v24  ;;  %v4674_v38 = vcombine.high %v433_v26, %v437_v27  ;;  %v4673_v39 = vcombine.low %v433_v26, %v437_v27  ;;  %v4554_v40 = vcombine.high %v313_v28, %v317_v29  ;;  %2655 = vmatprep.subr.bf16.mxu1 %v4546_v32  ;;  %v321_v42 = vunpack.c.l.s8.bf16 %v5247_v30 }
  0x31   :  { %v4682_v41 = vcombine.high %v441_v34, %v445_v35  ;;  %v325_v43 = vunpack.c.l.s8.bf16 %v5249_v31  ;;  %v5259_v44 = vld [vmem:[#allocation3 + $0x80] sm:$0xff]  ;;  %v5261_v45 = vld [vmem:[#allocation3 + $0x90] sm:$0xff]  ;;  %v449_v46 = vunpack.c.l.s8.bf16 %v5253_v36  ;;  %v453_v47 = vunpack.c.l.s8.bf16 %v5255_v37 }
  0x32   :  { %2696 = vmatprep.subr.bf16.mxu0 %v4674_v38  ;;  %v5265_v48 = vld [vmem:[#allocation3 + $0x280] sm:$0xff]  ;;  %v5267_v49 = vld [vmem:[#allocation3 + $0x290] sm:$0xff]  ;;  %v4553_v50 = vcombine.low %v313_v28, %v317_v29  ;;  %v4681_v51 = vcombine.low %v441_v34, %v445_v35  ;;  %v329_v53 = vunpack.c.l.s8.bf16 %v5259_v44  ;;  %v333_v54 = vunpack.c.l.s8.bf16 %v5261_v45 }
  0x33   :  { %2656 = vmatpush1.bf16.msra.mxu1 %v4545_v33  ;;  %v4562_v52 = vcombine.high %v321_v42, %v325_v43  ;;  %v4690_v55 = vcombine.high %v449_v46, %v453_v47  ;;  %v457_v56 = vunpack.c.l.s8.bf16 %v5265_v48  ;;  %v461_v57 = vunpack.c.l.s8.bf16 %v5267_v49  ;;  %v5273_v58 = vld [vmem:[#allocation3 + $0xa0] sm:$0xff]  ;;  %v5275_v59 = vld [vmem:[#allocation3 + $0xb0] sm:$0xff] }
  0x34   :  { %2697 = vmatpush1.bf16.msra.mxu0 %v4673_v39  ;;  %2657 = vmatprep.subr.bf16.mxu1 %v4554_v40  ;;  %v5277_v60 = vld [vmem:[#allocation3 + $0x2a0] sm:$0xff]  ;;  %v5279_v61 = vld [vmem:[#allocation3 + $0x2b0] sm:$0xff]  ;;  %v4561_v62 = vcombine.low %v321_v42, %v325_v43  ;;  %v4689_v63 = vcombine.low %v449_v46, %v453_v47  ;;  %v4570_v0 = vcombine.high %v329_v53, %v333_v54  ;;  %v337_v4 = vunpack.c.l.s8.bf16 %v5273_v58 }
  0x35   :  { %2698 = vmatprep.subr.bf16.mxu0 %v4682_v41  ;;  %v341_v5 = vunpack.c.l.s8.bf16 %v5275_v59  ;;  %v4698_v9 = vcombine.high %v457_v56, %v461_v57  ;;  %v465_v11 = vunpack.c.l.s8.bf16 %v5277_v60  ;;  %v469_v16 = vunpack.c.l.s8.bf16 %v5279_v61  ;;  %v5285_v17 = vld [vmem:[#allocation3 + $0xc0] sm:$0xff]  ;;  %v5287_v18 = vld [vmem:[#allocation3 + $0xd0] sm:$0xff] }
  0x36   :  { %v5289_v22 = vld [vmem:[#allocation3 + $0x2c0] sm:$0xff]  ;;  %v5291_v24 = vld [vmem:[#allocation3 + $0x2d0] sm:$0xff]  ;;  %v4569_v25 = vcombine.low %v329_v53, %v333_v54  ;;  %v4697_v26 = vcombine.low %v457_v56, %v461_v57  ;;  %v345_v28 = vunpack.c.l.s8.bf16 %v5285_v17  ;;  %v349_v29 = vunpack.c.l.s8.bf16 %v5287_v18 }
  0x37   :  { %2658 = vmatpush1.bf16.msra.mxu1 %v4553_v50  ;;  %6696 = vst [vmem:[#allocation10_spill] sm:$0xff] %v5289_v22  ;;  %6697 = vst [vmem:[#allocation11_spill] sm:$0xff] %v5291_v24  ;;  %v4578_v27 = vcombine.high %v337_v4, %v341_v5  ;;  %v4706_v32 = vcombine.high %v465_v11, %v469_v16  ;;  %v473_v33 = vunpack.c.l.s8.bf16 %v5289_v22  ;;  %v477_v34 = vunpack.c.l.s8.bf16 %v5291_v24  ;;  %v5297_v35 = vld [vmem:[#allocation3 + $0xe0] sm:$0xff]  ;;  %v5299_v38 = vld [vmem:[#allocation3 + $0xf0] sm:$0xff] }
  0x38   :  { %2699 = vmatpush1.bf16.msra.mxu0 %v4681_v51  ;;  %2659 = vmatprep.subr.bf16.mxu1 %v4562_v52  ;;  %v5301_v39 = vld [vmem:[#allocation3 + $0x2e0] sm:$0xff]  ;;  %v5303_v40 = vld [vmem:[#allocation3 + $0x2f0] sm:$0xff]  ;;  %v4577_v41 = vcombine.low %v337_v4, %v341_v5  ;;  %v4705_v42 = vcombine.low %v465_v11, %v469_v16  ;;  %v4586_v43 = vcombine.high %v345_v28, %v349_v29  ;;  %v353_v46 = vunpack.c.l.s8.bf16 %v5297_v35 }
  0x39   :  { %2700 = vmatprep.subr.bf16.mxu0 %v4690_v55  ;;  %6698 = vst [vmem:[#allocation12_spill] sm:$0xff] %v5301_v39  ;;  %6699 = vst [vmem:[#allocation13_spill] sm:$0xff] %v5303_v40  ;;  %v357_v47 = vunpack.c.l.s8.bf16 %v5299_v38  ;;  %v4714_v50 = vcombine.high %v473_v33, %v477_v34  ;;  %v481_v51 = vunpack.c.l.s8.bf16 %v5301_v39  ;;  %v485_v52 = vunpack.c.l.s8.bf16 %v5303_v40  ;;  %v5309_v53 = vld [vmem:[#allocation3 + $0x100] sm:$0xff]  ;;  %v5311_v54 = vld [vmem:[#allocation3 + $0x110] sm:$0xff] }
  0x3a   :  { %v5313_v55 = vld [vmem:[#allocation3 + $0x300] sm:$0xff]  ;;  %v5315_v56 = vld [vmem:[#allocation3 + $0x310] sm:$0xff]  ;;  %v4585_v57 = vcombine.low %v345_v28, %v349_v29  ;;  %v365_v4 = vunpack.c.l.s8.bf16 %v5311_v54  ;;  %v322_v22 = vunpack.c.h.s8.bf16 %v5247_v30  ;;  %v334_v30 = vunpack.c.h.s8.bf16 %v5261_v45 }
  0x3b   :  { %2660 = vmatpush1.bf16.msra.mxu1 %v4561_v62  ;;  %6700 = vst [vmem:[#allocation14_spill] sm:$0xff] %v5313_v55  ;;  %6701 = vst [vmem:[#allocation15_spill] sm:$0xff] %v5315_v56  ;;  %v4713_v62 = vcombine.low %v473_v33, %v477_v34  ;;  %v4722_v5 = vcombine.high %v481_v51, %v485_v52  ;;  %v493_v11 = vunpack.c.l.s8.bf16 %v5315_v56  ;;  %v5321_v16 = vld [vmem:[#allocation3 + $0x120] sm:$0xff]  ;;  %v5380_v24 = vld [vmem:[#allocation3 + $0x190] sm:$0xff]  ;;  %v338_v45 = vunpack.c.h.s8.bf16 %v5273_v58 }
  0x3c   :  { %2701 = vmatpush1.bf16.msra.mxu0 %v4689_v63  ;;  %2661 = vmatprep.subr.bf16.mxu1 %v4570_v0  ;;  %v4594_v63 = vcombine.high %v353_v46, %v357_v47  ;;  %v361_v0 = vunpack.c.l.s8.bf16 %v5309_v53  ;;  %v4593_v28 = vcombine.low %v353_v46, %v357_v47  ;;  %v5332_v29 = vld [vmem:[%s6619_s0] sm:$0xff]  ;;  %v369_v34 = vunpack.c.l.s8.bf16 %v5321_v16 }
  0x3d   :  { %2702 = vmatprep.subr.bf16.mxu0 %v4698_v9  ;;  %v489_v9 = vunpack.c.l.s8.bf16 %v5313_v55  ;;  %v5378_v39 = vld [vmem:[#allocation3 + $0x180] sm:$0xff]  ;;  %v350_v58 = vunpack.c.h.s8.bf16 %v5287_v18  ;;  %v354_v18 = vunpack.c.h.s8.bf16 %v5297_v35  ;;  %v6723_v35 = vunpack.c.h.s8.bf16 %v5207_v2 }
  0x3e   :  { %v4602_v33 = vcombine.high %v361_v0, %v365_v4 }
  0x3f   :  { %2662 = vmatpush1.bf16.msra.mxu1 %v4569_v25  ;;  %v5323_v25 = vld [vmem:[#allocation3 + $0x130] sm:$0xff]  ;;  %v4729_v10 = vcombine.low %v489_v9, %v493_v11 }
  0x40   :  { %2703 = vmatpush1.bf16.msra.mxu0 %v4697_v26  ;;  %2663 = vmatprep.subr.bf16.mxu1 %v4578_v27  ;;  %v5325_v26 = vld [vmem:[#allocation3 + $0x320] sm:$0xff]  ;;  %v5327_v27 = vld [vmem:[#allocation3 + $0x330] sm:$0xff] }
  0x41   :  { %2704 = vmatprep.subr.bf16.mxu0 %v4706_v32  ;;  %6702 = vst [vmem:[#allocation16_spill] sm:$0xff] %v5325_v26  ;;  %6703 = vst [vmem:[#allocation17_spill] sm:$0xff] %v5327_v27  ;;  %v4721_v32 = vcombine.low %v481_v51, %v485_v52  ;;  %v497_v46 = vunpack.c.l.s8.bf16 %v5325_v26  ;;  %v501_v47 = vunpack.c.l.s8.bf16 %v5327_v27  ;;  %v5347_v51 = vld [vmem:[#allocation3 + $0x340] sm:$0xff]  ;;  %v5349_v52 = vld [vmem:[#allocation3 + $0x350] sm:$0xff] }
  0x42   :  { %6704 = vst [vmem:[#allocation18_spill] sm:$0xff] %v5347_v51  ;;  %6705 = vst [vmem:[#allocation19_spill] sm:$0xff] %v5349_v52  ;;  %v505_v55 = vunpack.c.l.s8.bf16 %v5347_v51 }
  0x43   :  { %2664 = vmatpush1.bf16.msra.mxu1 %v4577_v41  ;;  %v373_v41 = vunpack.c.l.s8.bf16 %v5323_v25  ;;  %v4738_v56 = vcombine.high %v497_v46, %v501_v47  ;;  %v4737_v51 = vcombine.low %v497_v46, %v501_v47 }
  0x44   :  { %2705 = vmatpush1.bf16.msra.mxu0 %v4705_v42  ;;  %2665 = vmatprep.subr.bf16.mxu1 %v4586_v43  ;;  %v5339_v42 = vld [vmem:[%s6619_s0 + $0x8] sm:$0xff]  ;;  %v4730_v43 = vcombine.high %v489_v9, %v493_v11 }
  0x45   :  { %2706 = vmatprep.subr.bf16.mxu0 %v4714_v50  ;;  %v5343_v50 = vld [vmem:[#allocation3 + $0x140] sm:$0xff]  ;;  %v4610_v12 = vcombine.high %v369_v34, %v373_v41 }
  0x46   :  { %v377_v23 = vunpack.c.l.s8.bf16 %v5343_v50 }
  0x47   :  { %2666 = vmatpush1.bf16.msra.mxu1 %v4585_v57  ;;  %v5345_v57 = vld [vmem:[#allocation3 + $0x150] sm:$0xff] }
  0x48   :  { %2707 = vmatpush1.bf16.msra.mxu0 %v4713_v62  ;;  %2667 = vmatprep.subr.bf16.mxu1 %v4594_v63  ;;  %v88_v62 = vcombine.high %v5332_v29, %v5332_v29  ;;  %v4601_v63 = vcombine.low %v361_v0, %v365_v4  ;;  %v381_v27 = vunpack.c.l.s8.bf16 %v5345_v57  ;;  %v5361_v0 = vld [vmem:[#allocation3 + $0x160] sm:$0xff]  ;;  %v5363_v4 = vld [vmem:[#allocation3 + $0x170] sm:$0xff] }
  0x49   :  { %2708 = vmatprep.subr.bf16.mxu0 %v4722_v5  ;;  %v89_v5 = vcombine.high %v5339_v42, %v5339_v42  ;;  %v385_v11 = vunpack.c.l.s8.bf16 %v5361_v0  ;;  %v389_v40 = vunpack.c.l.s8.bf16 %v5363_v4 }
  0x4a   :  { %v5357_v26 = vpack.c.bf16 %v88_v62, %v88_v62  ;;  %v4609_v62 = vcombine.low %v369_v34, %v373_v41  ;;  %v4617_v41 = vcombine.low %v377_v23, %v381_v27 }
  0x4b   :  { %2668 = vmatpush1.bf16.msra.mxu1 %v4593_v28  ;;  %v509_v28 = vunpack.c.l.s8.bf16 %v5349_v52  ;;  %v5365_v9 = vpack.c.bf16 %v89_v5, %v89_v5  ;;  %v314_v52 = vunpack.c.h.s8.bf16 %v5227_v15  ;;  %v4618_v5 = vcombine.high %v377_v23, %v381_v27 }
  0x4c   :  { %2709 = vmatpush1.bf16.msra.mxu0 %v4721_v32  ;;  %2669 = vmatprep.subr.bf16.mxu1 %v4602_v33  ;;  %6706 = vst [vmem:[#allocation20_spill] sm:$0xff] %v5357_v26  ;;  %v5368_v32 = vld [vmem:[#allocation3 + $0x360] sm:$0xff]  ;;  %v5370_v33 = vld [vmem:[#allocation3 + $0x370] sm:$0xff]  ;;  %v397_v23 = vunpack.c.l.s8.bf16 %v5380_v24  ;;  %v330_v27 = vunpack.c.h.s8.bf16 %v5259_v44 }
  0x4d   :  { %2710 = vmatprep.subr.bf16.mxu0 %v4730_v43  ;;  %6707 = vst [vmem:[#allocation21_spill] sm:$0xff] %v5365_v9  ;;  %6708 = vst [vmem:[#allocation22_spill] sm:$0xff] %v5368_v32  ;;  %2685 = vmatprep.mubr.bf16.mxu1 %v5357_v26  ;;  %v318_v43 = vunpack.c.h.s8.bf16 %v5230_v19  ;;  %v4746_v34 = vcombine.high %v505_v55, %v509_v28  ;;  %v513_v46 = vunpack.c.l.s8.bf16 %v5368_v32  ;;  %v517_v15 = vunpack.c.l.s8.bf16 %v5370_v33  ;;  %v5403_v32 = vld [vmem:[#allocation3 + $0x1b0] sm:$0xff] }
  0x4e   :  { %6709 = vst [vmem:[#allocation23_spill] sm:$0xff] %v5370_v33  ;;  %2726 = vmatprep.mubr.bf16.mxu0 %v5365_v9  ;;  %v4745_v47 = vcombine.low %v505_v55, %v509_v28  ;;  %v393_v19 = vunpack.c.l.s8.bf16 %v5378_v39  ;;  %v4626_v33 = vcombine.high %v385_v11, %v389_v40 }
  0x4f   :  { %2670 = vmatpush1.bf16.msra.mxu1 %v4601_v63  ;;  %v5389_v63 = vcombine.high %v314_v52, %v318_v43  ;;  %v5391_v9 = vcombine.low %v314_v52, %v318_v43  ;;  %v5400_v52 = vld [vmem:[#allocation3 + $0x1a0] sm:$0xff]  ;;  %v4754_v43 = vcombine.high %v513_v46, %v517_v15  ;;  %v4753_v44 = vcombine.low %v513_v46, %v517_v15 }
  0x50   :  { %2711 = vmatpush1.bf16.msra.mxu0 %v4729_v10  ;;  %2671 = vmatprep.subr.bf16.mxu1 %v4610_v12  ;;  %v5385_v10 = vld [vmem:[#allocation3 + $0x380] sm:$0xff]  ;;  %v5387_v12 = vld [vmem:[#allocation3 + $0x390] sm:$0xff]  ;;  %v4633_v15 = vcombine.low %v393_v19, %v397_v23 }
  0x51   :  { %2712 = vmatprep.subr.bf16.mxu0 %v4738_v56  ;;  %6710 = vst [vmem:[#allocation24_spill] sm:$0xff] %v5385_v10  ;;  %6711 = vst [vmem:[#allocation25_spill] sm:$0xff] %v5387_v12  ;;  %v326_v56 = vunpack.c.h.s8.bf16 %v5249_v31  ;;  %v521_v55 = vunpack.c.l.s8.bf16 %v5385_v10  ;;  %v525_v28 = vunpack.c.l.s8.bf16 %v5387_v12  ;;  %v5413_v10 = vcombine.high %v330_v27, %v334_v30 }
  0x52   :  { %6712 = vst [vmem:[#allocation26_spill] sm:$0xff] %v5391_v9  ;;  %v5415_v12 = vcombine.low %v330_v27, %v334_v30  ;;  %v5424_v27 = vld [vmem:[#allocation3 + $0x1d0] sm:$0xff] }
  0x53   :  { %2672 = vmatpush1.bf16.msra.mxu1 %v4609_v62  ;;  %v4625_v62 = vcombine.low %v385_v11, %v389_v40  ;;  %v5405_v9 = vcombine.high %v322_v22, %v326_v56  ;;  %v5407_v31 = vcombine.low %v322_v22, %v326_v56  ;;  %6716 = vst [vmem:[#allocation30_spill] sm:$0xff] %v5413_v10  ;;  %v401_v40 = vunpack.c.l.s8.bf16 %v5400_v52 }
  0x54   :  { %2713 = vmatpush1.bf16.msra.mxu0 %v4737_v51  ;;  %2673 = vmatprep.subr.bf16.mxu1 %v4618_v5  ;;  %v5409_v51 = vld [vmem:[#allocation3 + $0x3a0] sm:$0xff]  ;;  %v5411_v5 = vld [vmem:[#allocation3 + $0x3b0] sm:$0xff]  ;;  %6717 = vst [vmem:[#allocation31_spill] sm:$0xff] %v5415_v12  ;;  %v342_v11 = vunpack.c.h.s8.bf16 %v5275_v59  ;;  %v346_v22 = vunpack.c.h.s8.bf16 %v5285_v17  ;;  %v4762_v46 = vcombine.high %v521_v55, %v525_v28  ;;  %v405_v56 = vunpack.c.l.s8.bf16 %v5403_v32 }
  0x55   :  { %2714 = vmatprep.subr.bf16.mxu0 %v4746_v34  ;;  %6713 = vst [vmem:[#allocation27_spill] sm:$0xff] %v5407_v31  ;;  %6714 = vst [vmem:[#allocation28_spill] sm:$0xff] %v5409_v51  ;;  %v4634_v34 = vcombine.high %v393_v19, %v397_v23  ;;  %v5422_v31 = vld [vmem:[#allocation3 + $0x1c0] sm:$0xff]  ;;  %v533_v30 = vunpack.c.l.s8.bf16 %v5411_v5  ;;  %v5431_v17 = vld [vmem:[#allocation3 + $0x3d0] sm:$0xff]  ;;  %v4761_v19 = vcombine.low %v521_v55, %v525_v28  ;;  %v362_v10 = vunpack.c.h.s8.bf16 %v5309_v53 }
  0x56   :  { %6715 = vst [vmem:[#allocation29_spill] sm:$0xff] %v5411_v5  ;;  %v5429_v59 = vld [vmem:[#allocation3 + $0x3c0] sm:$0xff]  ;;  %6719 = vst [vmem:[#allocation33_spill] sm:$0xff] %v5431_v17  ;;  %v5437_v23 = vcombine.high %v346_v22, %v350_v58  ;;  %v5439_v12 = vcombine.low %v346_v22, %v350_v58  ;;  %v413_v5 = vunpack.c.l.s8.bf16 %v5424_v27  ;;  %v541_v28 = vunpack.c.l.s8.bf16 %v5431_v17  ;;  %v5457_v53 = vld [vmem:[#allocation3 + $0x1f0] sm:$0xff] }
  0x57   :  { %2674 = vmatpush1.bf16.msra.mxu1 %v4617_v41  ;;  %v529_v41 = vunpack.c.l.s8.bf16 %v5409_v51  ;;  %6718 = vst [vmem:[#allocation32_spill] sm:$0xff] %v5429_v59  ;;  %v358_v51 = vunpack.c.h.s8.bf16 %v5299_v38  ;;  %v537_v55 = vunpack.c.l.s8.bf16 %v5429_v59  ;;  %v5455_v38 = vld [vmem:[#allocation3 + $0x1e0] sm:$0xff] }
  0x58   :  { %2715 = vmatpush1.bf16.msra.mxu0 %v4745_v47  ;;  %2675 = vmatprep.subr.bf16.mxu1 %v4626_v33  ;;  %v5433_v33 = vcombine.high %v338_v45, %v342_v11  ;;  %v5435_v47 = vcombine.low %v338_v45, %v342_v11  ;;  %6721 = vst [vmem:[#allocation35_spill] sm:$0xff] %v5437_v23  ;;  %6722 = vst [vmem:[#allocation36_spill] sm:$0xff] %v5439_v12  ;;  %v366_v11 = vunpack.c.h.s8.bf16 %v5311_v54  ;;  %v5463_v17 = vld [vmem:[#allocation3 + $0x3e0] sm:$0xff]  ;;  %v5465_v54 = vld [vmem:[#allocation3 + $0x3f0] sm:$0xff] }
  0x59   :  { %2716 = vmatprep.subr.bf16.mxu0 %v4754_v43  ;;  %v409_v43 = vunpack.c.l.s8.bf16 %v5422_v31  ;;  %v4642_v45 = vcombine.high %v401_v40, %v405_v56  ;;  %v4770_v58 = vcombine.high %v529_v41, %v533_v30  ;;  %v4641_v12 = vcombine.low %v401_v40, %v405_v56 }
  0x5a   :  { %6720 = vst [vmem:[#allocation34_spill] sm:$0xff] %v5435_v47  ;;  %v5467_v59 = vcombine.high %v362_v10, %v366_v11  ;;  %v5469_v23 = vcombine.low %v362_v10, %v366_v11  ;;  %v374_v47 = vunpack.c.h.s8.bf16 %v5323_v25  ;;  %v417_v40 = vunpack.c.l.s8.bf16 %v5455_v38 }
  0x5b   :  { %2676 = vmatpush1.bf16.msra.mxu1 %v4625_v62  ;;  %v6724_v62 = vunpack.c.h.s8.bf16 %v5205_v1  ;;  %v421_v56 = vunpack.c.l.s8.bf16 %v5457_v53  ;;  %v545_v10 = vunpack.c.l.s8.bf16 %v5463_v17  ;;  %v4777_v11 = vcombine.low %v537_v55, %v541_v28 }
  0x5c   :  { %2717 = vmatpush1.bf16.msra.mxu0 %v4753_v44  ;;  %2677 = vmatprep.subr.bf16.mxu1 %v4634_v34  ;;  %v5459_v44 = vcombine.high %v354_v18, %v358_v51  ;;  %v5461_v34 = vcombine.low %v354_v18, %v358_v51  ;;  %6726 = vst [vmem:[#allocation38_spill] sm:$0xff] %v5469_v23  ;;  %v382_v18 = vunpack.c.h.s8.bf16 %v5345_v57  ;;  %v386_v57 = vunpack.c.h.s8.bf16 %v5361_v0 }
  0x5d   :  { %v5453_v22 = vcombine.low %v6724_v62, %v6723_v35  ;;  %2718 = vmatprep.subr.bf16.mxu0 %v4762_v46  ;;  %v370_v46 = vunpack.c.h.s8.bf16 %v5321_v16  ;;  %v4769_v35 = vcombine.low %v529_v41, %v533_v30  ;;  %v4650_v62 = vcombine.high %v409_v43, %v413_v5  ;;  %v5485_v30 = vld [vmem:[#allocation3 + $0x410] sm:$0xff] }
  0x5e   :  { %6725 = vst [vmem:[#allocation37_spill] sm:$0xff] %v5459_v44  ;;  %v378_v44 = vunpack.c.h.s8.bf16 %v5343_v50  ;;  %v4778_v51 = vcombine.high %v537_v55, %v541_v28  ;;  %v549_v16 = vunpack.c.l.s8.bf16 %v5465_v54  ;;  %v4649_v50 = vcombine.low %v409_v43, %v413_v5  ;;  %v5501_v55 = vld [vmem:[#allocation3 + $0x420] sm:$0xff] }
  0x5f   :  { %2678 = vmatpush1.bf16.msra.mxu1 %v4633_v15  ;;  %v5479_v15 = vld [vmem:[#allocation3 + $0x400] sm:$0xff]  ;;  %v5481_v41 = vcombine.high %v370_v46, %v374_v47  ;;  %v5483_v25 = vcombine.low %v370_v46, %v374_v47  ;;  %v390_v23 = vunpack.c.h.s8.bf16 %v5363_v4  ;;  %v394_v47 = vunpack.c.h.s8.bf16 %v5378_v39  ;;  %v5507_v39 = vld [vmem:[#allocation3 + $0x430] sm:$0xff] }
  0x60   :  { %2719 = vmatpush1.bf16.msra.mxu0 %v4761_v19  ;;  %2679 = vmatprep.subr.bf16.mxu1 %v4642_v45  ;;  %v5487_v19 = vcombine.high %v378_v44, %v382_v18  ;;  %v5489_v45 = vcombine.low %v378_v44, %v382_v18  ;;  %v4658_v5 = vcombine.high %v417_v40, %v421_v56  ;;  %v553_v46 = vunpack.c.l.s8.bf16 %v5479_v15 }
  0x61   :  { %2720 = vmatprep.subr.bf16.mxu0 %v4770_v58  ;;  %v5494_v58 = vpack.c.bf16 %v5332_v29, %v5332_v29  ;;  %v4657_v43 = vcombine.low %v417_v40, %v421_v56  ;;  %v398_v44 = vunpack.c.h.s8.bf16 %v5380_v24  ;;  %v4786_v0 = vcombine.high %v545_v10, %v549_v16 }
  0x62   :  { %v5503_v29 = vcombine.high %v386_v57, %v390_v23  ;;  %v5505_v28 = vcombine.low %v386_v57, %v390_v23  ;;  %v4785_v4 = vcombine.low %v545_v10, %v549_v16  ;;  %v402_v40 = vunpack.c.h.s8.bf16 %v5400_v52  ;;  %v5536_v57 = vld [vmem:[#allocation3 + $0x450] sm:$0xff] }
  0x63   :  { %2680 = vmatpush1.bf16.msra.mxu1 %v4641_v12  ;;  %v557_v12 = vunpack.c.l.s8.bf16 %v5485_v30  ;;  %v6727_v24 = vunpack.c.h.s8.bf16 %v5207_v2  ;;  %v5520_v18 = vpack.c.bf16 %v5339_v42, %v5339_v42  ;;  %v406_v23 = vunpack.c.h.s8.bf16 %v5403_v32  ;;  %v5527_v2 = vld [vmem:[#allocation3 + $0x440] sm:$0xff]  ;;  %v5533_v42 = vld [vmem:[%s6619_s0 + $0x10] sm:$0xff] }
  0x64   :  { %2721 = vmatpush1.bf16.msra.mxu0 %v4769_v35  ;;  %2681 = vmatprep.subr.bf16.mxu1 %v4650_v62  ;;  %v5509_v35 = vcombine.high %v394_v47, %v398_v44  ;;  %v5511_v62 = vcombine.low %v394_v47, %v398_v44  ;;  %v410_v10 = vunpack.c.h.s8.bf16 %v5422_v31  ;;  %v561_v16 = vunpack.c.l.s8.bf16 %v5501_v55 }
  0x65   :  { %2722 = vmatprep.subr.bf16.mxu0 %v4778_v51  ;;  %v6728_v51 = vunpack.c.h.s8.bf16 %v5205_v1  ;;  %6729 = vst [vmem:[#allocation39_spill] sm:$0xff] %v5520_v18  ;;  %v306_v52 = vunpack.c.h.s8.bf16 %v5215_v7  ;;  %v414_v1 = vunpack.c.h.s8.bf16 %v5424_v27  ;;  %v4794_v32 = vcombine.high %v553_v46, %v557_v12 }
  0x66   :  { %v565_v31 = vunpack.c.l.s8.bf16 %v5507_v39  ;;  %v5540_v7 = vcombine.low %v402_v40, %v406_v23  ;;  %v418_v27 = vunpack.c.h.s8.bf16 %v5455_v38  ;;  %v569_v44 = vunpack.c.l.s8.bf16 %v5527_v2 }
  0x67   :  { %2682 = vmatpush1.bf16.msra.mxu1 %v4649_v50  ;;  %v4540_v56 = vcombine.high %v6728_v51, %v6727_v24  ;;  %v310_v50 = vunpack.c.h.s8.bf16 %v5217_v8  ;;  %v4793_v8 = vcombine.low %v553_v46, %v557_v12  ;;  %v5542_v47 = vcombine.high %v410_v10, %v414_v1 }
  0x68   :  { %2723 = vmatpush1.bf16.msra.mxu0 %v4777_v11  ;;  %2683 = vmatprep.subr.bf16.mxu1 %v4658_v5  ;;  %v5538_v11 = vcombine.high %v402_v40, %v406_v23  ;;  %v5544_v5 = vcombine.low %v410_v10, %v414_v1  ;;  %v90_v24 = vcombine.high %v5533_v42, %v5533_v42  ;;  %v6730_v51 = vunpack.c.h.s8.bf16 %v5213_v6  ;;  %v5560_v10 = vld [vmem:[#allocation3 + $0x460] sm:$0xff] }
  0x69   :  { %2724 = vmatprep.subr.bf16.mxu0 %v4786_v0  ;;  %v422_v0 = vunpack.c.h.s8.bf16 %v5457_v53  ;;  %v6731_v40 = vunpack.c.h.s8.bf16 %v5209_v3  ;;  %v4548_v46 = vcombine.high %v306_v52, %v310_v50  ;;  %v573_v12 = vunpack.c.l.s8.bf16 %v5536_v57 }
  0x6a   :  { %v434_v38 = vunpack.c.h.s8.bf16 %v5223_v13  ;;  %v4802_v53 = vcombine.high %v561_v16, %v565_v31  ;;  %v5566_v3 = vpack.c.bf16 %v90_v24, %v90_v24  ;;  %v442_v13 = vunpack.c.h.s8.bf16 %v5232_v20 }
  0x6b   :  { %2684 = vmatpush1.bf16.msra.mxu1 %v4657_v43  ;;  %v5555_v23 = vcombine.high %v6731_v40, %v6730_v51  ;;  %v438_v43 = vunpack.c.h.s8.bf16 %v5225_v14  ;;  %v5562_v1 = vcombine.high %v418_v27, %v422_v0  ;;  %v5564_v6 = vcombine.low %v418_v27, %v422_v0 }
  0x6c   :  { %2725 = vmatpush1.bf16.msra.mxu0 %v4785_v4  ;;  %2817 = vmatprep.subr.bf16.mxu1 %v4540_v56  ;;  %6732 = vst [vmem:[#allocation40_spill] sm:$0xff] %v5566_v3  ;;  %v5569_v4 = vld [vmem:[#allocation3 + $0x470] sm:$0xff]  ;;  %v4547_v14 = vcombine.low %v306_v52, %v310_v50  ;;  %v4801_v27 = vcombine.low %v561_v16, %v565_v31  ;;  %v577_v0 = vunpack.c.l.s8.bf16 %v5560_v10  ;;  %v450_v24 = vunpack.c.h.s8.bf16 %v5253_v36 }
  0x6d   :  { %2735 = vmatprep.subr.bf16.mxu0 %v4794_v32  ;;  %v5571_v56 = vcombine.high %v434_v38, %v438_v43  ;;  %v5573_v51 = vcombine.low %v434_v38, %v438_v43  ;;  %v446_v32 = vunpack.c.h.s8.bf16 %v5234_v21  ;;  %v454_v40 = vunpack.c.h.s8.bf16 %v5255_v37  ;;  %v5588_v21 = vld [vmem:[#allocation3 + $0x480] sm:$0xff]  ;;  %v5590_v52 = vld [vmem:[#allocation3 + $0x490] sm:$0xff] }
  0x6e   :  { %2686 = vmatmul.mubr.bf16.vlgmr.msra.gmra.mrb[0].mxu1 %v5494_v58  ;;  %v4810_v38 = vcombine.high %v569_v44, %v573_v12  ;;  %v581_v20 = vunpack.c.l.s8.bf16 %v5569_v4  ;;  %v458_v37 = vunpack.c.h.s8.bf16 %v5265_v48  ;;  %v462_v50 = vunpack.c.h.s8.bf16 %v5267_v49  ;;  %v5608_v49 = vld [vmem:[#allocation3 + $0x4a0] sm:$0xff] }
  0x6f   :  { %2727 = vmatmul.mubr.bf16.vlgmr.msra.gmra.mrb[0].mxu0 %v5520_v18  ;;  %2818 = vmatpush1.bf16.msra.mxu1 %v5453_v22  ;;  %v5584_v43 = vcombine.high %v442_v13, %v446_v32  ;;  %v5586_v22 = vcombine.low %v442_v13, %v446_v32  ;;  %v5593_v16 = vcombine.high %v450_v24, %v454_v40  ;;  %v470_v13 = vunpack.c.h.s8.bf16 %v5279_v61 }
  0x70   :  { %2736 = vmatpush1.bf16.msra.mxu0 %v4793_v8  ;;  %2819 = vmatprep.subr.bf16.mxu1 %v4548_v46  ;;  %v5595_v36 = vcombine.low %v450_v24, %v454_v40  ;;  %v4809_v31 = vcombine.low %v569_v44, %v573_v12  ;;  %v5600_v8 = vcombine.high %v458_v37, %v462_v50  ;;  %v585_v24 = vunpack.c.l.s8.bf16 %v5588_v21  ;;  %v5610_v44 = vld [vmem:[#allocation3 + $0x4b0] sm:$0xff] }
  0x71   :  { %2737 = vmatprep.subr.bf16.mxu0 %v4802_v53  ;;  %2767 = vmatprep.mubr.bf16.mxu0 %v5566_v3  ;;  %6733 = vst [vmem:[#allocation41_spill] sm:$0xff] %v5586_v22  ;;  %6734 = vst [vmem:[#allocation42_spill] sm:$0xff] %v5593_v16  ;;  %v5602_v46 = vcombine.low %v458_v37, %v462_v50  ;;  %v466_v53 = vunpack.c.h.s8.bf16 %v5277_v60  ;;  %v4818_v32 = vcombine.high %v577_v0, %v581_v20  ;;  %v6741_v40 = vld [vmem:[#allocation11_spill] sm:$0xff]  ;;  %v6742_v37 = vld [vmem:[#allocation26_spill] sm:$0xff] }
  0x72   :  { %2849 = vmatprep.mubr.bf16.mxu1 %v5357_v26  ;;  %6735 = vst [vmem:[#allocation43_spill] sm:$0xff] %v5595_v36  ;;  %6736 = vst [vmem:[#allocation44_spill] sm:$0xff] %v5600_v8  ;;  %v589_v48 = vunpack.c.l.s8.bf16 %v5590_v52  ;;  %v478_v60 = vunpack.c.h.s8.bf16 %v6741_v40  ;;  %v4817_v61 = vcombine.low %v577_v0, %v581_v20  ;;  %v6745_v3 = vld [vmem:[#allocation12_spill] sm:$0xff]  ;;  %v6746_v26 = vld [vmem:[#allocation13_spill] sm:$0xff] }
  0x73   :  { %2820 = vmatpush1.bf16.msra.mxu1 %v4547_v14  ;;  %6737 = vst [vmem:[#allocation45_spill] sm:$0xff] %v5602_v46  ;;  %v5612_v12 = vcombine.high %v466_v53, %v470_v13  ;;  %v6740_v14 = vld [vmem:[#allocation10_spill] sm:$0xff]  ;;  %v482_v18 = vunpack.c.h.s8.bf16 %v6745_v3  ;;  %v5628_v40 = vld [vmem:[#allocation3 + $0x4c0] sm:$0xff]  ;;  %v5630_v0 = vld [vmem:[#allocation3 + $0x4d0] sm:$0xff] }
  0x74   :  { %2738 = vmatpush1.bf16.msra.mxu0 %v4801_v27  ;;  %2821 = vmatprep.subr.bf16.mxu1 %v5389_v63  ;;  %v5614_v63 = vcombine.low %v466_v53, %v470_v13  ;;  %v474_v27 = vunpack.c.h.s8.bf16 %v6740_v14  ;;  %v4826_v53 = vcombine.high %v585_v24, %v589_v48  ;;  %v593_v13 = vunpack.c.l.s8.bf16 %v5608_v49  ;;  %v6756_v8 = vld [vmem:[#allocation17_spill] sm:$0xff]  ;;  %v6765_v36 = vld [vmem:[#allocation23_spill] sm:$0xff] }
  0x75   :  { %2739 = vmatprep.subr.bf16.mxu0 %v4810_v38  ;;  %6738 = vst [vmem:[#allocation46_spill] sm:$0xff] %v5612_v12  ;;  %v486_v12 = vunpack.c.h.s8.bf16 %v6746_v26  ;;  %v597_v14 = vunpack.c.l.s8.bf16 %v5610_v44  ;;  %v4825_v26 = vcombine.low %v585_v24, %v589_v48  ;;  %v5650_v24 = vld [vmem:[#allocation3 + $0x4f0] sm:$0xff]  ;;  %v6775_v22 = vld [vmem:[#allocation29_spill] sm:$0xff] }
  0x76   :  { %6739 = vst [vmem:[#allocation47_spill] sm:$0xff] %v5614_v63  ;;  %v5620_v38 = vcombine.high %v474_v27, %v478_v60  ;;  %v5622_v50 = vcombine.low %v474_v27, %v478_v60  ;;  %v6750_v60 = vld [vmem:[#allocation15_spill] sm:$0xff]  ;;  %v6755_v63 = vld [vmem:[#allocation16_spill] sm:$0xff] }
  0x77   :  { %2822 = vmatpush1.bf16.msra.mxu1 %v6742_v37  ;;  %v5632_v20 = vcombine.high %v482_v18, %v486_v12  ;;  %v494_v3 = vunpack.c.h.s8.bf16 %v6750_v60  ;;  %v6751_v37 = vld [vmem:[#allocation27_spill] sm:$0xff]  ;;  %v498_v46 = vunpack.c.h.s8.bf16 %v6755_v63  ;;  %v5648_v60 = vld [vmem:[#allocation3 + $0x4e0] sm:$0xff] }
  0x78   :  { %2740 = vmatpush1.bf16.msra.mxu0 %v4809_v31  ;;  %2823 = vmatprep.subr.bf16.mxu1 %v5405_v9  ;;  %6743 = vst [vmem:[#allocation10_spill] sm:$0xff] %v5620_v38  ;;  %6744 = vst [vmem:[#allocation11_spill] sm:$0xff] %v5622_v50  ;;  %v5634_v9 = vcombine.low %v482_v18, %v486_v12  ;;  %v6749_v31 = vld [vmem:[#allocation14_spill] sm:$0xff]  ;;  %v4834_v18 = vcombine.high %v593_v13, %v597_v14  ;;  %v601_v12 = vunpack.c.l.s8.bf16 %v5628_v40 }
  0x79   :  { %2741 = vmatprep.subr.bf16.mxu0 %v4818_v32  ;;  %6747 = vst [vmem:[#allocation26_spill] sm:$0xff] %v5632_v20  ;;  %v490_v27 = vunpack.c.h.s8.bf16 %v6749_v31  ;;  %v6752_v32 = vld [vmem:[#allocation30_spill] sm:$0xff]  ;;  %v502_v20 = vunpack.c.h.s8.bf16 %v6756_v8  ;;  %v605_v31 = vunpack.c.l.s8.bf16 %v5630_v0  ;;  %v4833_v8 = vcombine.low %v593_v13, %v597_v14  ;;  %v5670_v13 = vld [vmem:[#allocation3 + $0x510] sm:$0xff] }
  0x7a   :  { %6748 = vst [vmem:[#allocation12_spill] sm:$0xff] %v5634_v9 }
  0x7b   :  { %2824 = vmatpush1.bf16.msra.mxu1 %v6751_v37  ;;  %v5640_v50 = vcombine.high %v490_v27, %v494_v3  ;;  %v5642_v38 = vcombine.low %v490_v27, %v494_v3  ;;  %v5652_v48 = vcombine.high %v498_v46, %v502_v20  ;;  %v6759_v27 = vld [vmem:[#allocation18_spill] sm:$0xff]  ;;  %v6760_v37 = vld [vmem:[#allocation19_spill] sm:$0xff] }
  0x7c   :  { %2742 = vmatpush1.bf16.msra.mxu0 %v4817_v61  ;;  %2825 = vmatprep.subr.bf16.mxu1 %v6752_v32  ;;  %v5654_v61 = vcombine.low %v498_v46, %v502_v20  ;;  %v506_v3 = vunpack.c.h.s8.bf16 %v6759_v27  ;;  %v510_v63 = vunpack.c.h.s8.bf16 %v6760_v37  ;;  %v6761_v32 = vld [vmem:[#allocation31_spill] sm:$0xff]  ;;  %v4842_v46 = vcombine.high %v601_v12, %v605_v31  ;;  %v5668_v37 = vld [vmem:[#allocation3 + $0x500] sm:$0xff] }
  0x7d   :  { %6753 = vst [vmem:[#allocation13_spill] sm:$0xff] %v5640_v50  ;;  %6754 = vst [vmem:[#allocation14_spill] sm:$0xff] %v5642_v38  ;;  %2743 = vmatprep.subr.bf16.mxu0 %v4826_v53  ;;  %v6764_v50 = vld [vmem:[#allocation22_spill] sm:$0xff]  ;;  %v609_v20 = vunpack.c.l.s8.bf16 %v5648_v60  ;;  %v613_v27 = vunpack.c.l.s8.bf16 %v5650_v24 }
  0x7e   :  { %6757 = vst [vmem:[#allocation15_spill] sm:$0xff] %v5652_v48  ;;  %6758 = vst [vmem:[#allocation27_spill] sm:$0xff] %v5654_v61  ;;  %v5660_v53 = vcombine.high %v506_v3, %v510_v63  ;;  %v5662_v38 = vcombine.low %v506_v3, %v510_v63  ;;  %v514_v9 = vunpack.c.h.s8.bf16 %v6764_v50  ;;  %v518_v48 = vunpack.c.h.s8.bf16 %v6765_v36  ;;  %v6769_v63 = vld [vmem:[#allocation25_spill] sm:$0xff]  ;;  %v6774_v61 = vld [vmem:[#allocation28_spill] sm:$0xff] }
  0x7f   :  { %2826 = vmatpush1.bf16.msra.mxu1 %v6761_v32  ;;  %v526_v50 = vunpack.c.h.s8.bf16 %v6769_v63  ;;  %v6770_v32 = vld [vmem:[#allocation34_spill] sm:$0xff]  ;;  %v4841_v36 = vcombine.low %v601_v12, %v605_v31  ;;  %v530_v16 = vunpack.c.h.s8.bf16 %v6774_v61  ;;  %v5688_v63 = vld [vmem:[#allocation3 + $0x520] sm:$0xff]  ;;  %v5690_v12 = vld [vmem:[#allocation3 + $0x530] sm:$0xff] }
  0x80   :  { %2744 = vmatpush1.bf16.msra.mxu0 %v4825_v26  ;;  %2827 = vmatprep.subr.bf16.mxu1 %v5433_v33  ;;  %6762 = vst [vmem:[#allocation30_spill] sm:$0xff] %v5660_v53  ;;  %6763 = vst [vmem:[#allocation16_spill] sm:$0xff] %v5662_v38  ;;  %v5672_v14 = vcombine.high %v514_v9, %v518_v48  ;;  %v5674_v33 = vcombine.low %v514_v9, %v518_v48  ;;  %v6768_v26 = vld [vmem:[#allocation24_spill] sm:$0xff]  ;;  %v617_v48 = vunpack.c.l.s8.bf16 %v5668_v37 }
  0x81   :  { %2745 = vmatprep.subr.bf16.mxu0 %v4834_v18  ;;  %v522_v3 = vunpack.c.h.s8.bf16 %v6768_v26  ;;  %v6771_v18 = vld [vmem:[#allocation35_spill] sm:$0xff]  ;;  %v4850_v9 = vcombine.high %v609_v20, %v613_v27  ;;  %v621_v26 = vunpack.c.l.s8.bf16 %v5670_v13 }
  0x82   :  { %6766 = vst [vmem:[#allocation17_spill] sm:$0xff] %v5672_v14  ;;  %6767 = vst [vmem:[#allocation18_spill] sm:$0xff] %v5674_v33  ;;  %v534_v14 = vunpack.c.h.s8.bf16 %v6775_v22  ;;  %v4849_v22 = vcombine.low %v609_v20, %v613_v27  ;;  %v546_v33 = vunpack.c.h.s8.bf16 %v5463_v17  ;;  %v5710_v20 = vld [vmem:[#allocation3 + $0x550] sm:$0xff]  ;;  %v558_v17 = vunpack.c.h.s8.bf16 %v5485_v30 }
  0x83   :  { %2828 = vmatpush1.bf16.msra.mxu1 %v6770_v32  ;;  %v5680_v38 = vcombine.high %v522_v3, %v526_v50  ;;  %v5682_v53 = vcombine.low %v522_v3, %v526_v50  ;;  %v6777_v3 = vld [vmem:[#allocation32_spill] sm:$0xff]  ;;  %v6778_v32 = vld [vmem:[#allocation33_spill] sm:$0xff]  ;;  %v637_v30 = vunpack.c.l.s8.bf16 %v5710_v20 }
  0x84   :  { %2746 = vmatpush1.bf16.msra.mxu0 %v4833_v8  ;;  %2829 = vmatprep.subr.bf16.mxu1 %v6771_v18  ;;  %v5692_v31 = vcombine.high %v530_v16, %v534_v14  ;;  %v5694_v8 = vcombine.low %v530_v16, %v534_v14  ;;  %v538_v50 = vunpack.c.h.s8.bf16 %v6777_v3  ;;  %v542_v61 = vunpack.c.h.s8.bf16 %v6778_v32  ;;  %v6779_v18 = vld [vmem:[#allocation36_spill] sm:$0xff]  ;;  %v5708_v32 = vld [vmem:[#allocation3 + $0x540] sm:$0xff] }
  0x85   :  { %6772 = vst [vmem:[#allocation19_spill] sm:$0xff] %v5680_v38  ;;  %6773 = vst [vmem:[#allocation31_spill] sm:$0xff] %v5682_v53  ;;  %2747 = vmatprep.subr.bf16.mxu0 %v4842_v46  ;;  %v6780_v46 = vld [vmem:[#allocation37_spill] sm:$0xff]  ;;  %v4858_v16 = vcombine.high %v617_v48, %v621_v26  ;;  %v625_v14 = vunpack.c.l.s8.bf16 %v5688_v63  ;;  %v629_v3 = vunpack.c.l.s8.bf16 %v5690_v12 }
  0x86   :  { %6776 = vst [vmem:[#allocation22_spill] sm:$0xff] %v5692_v31  ;;  %v5700_v53 = vcombine.high %v538_v50, %v542_v61  ;;  %v5702_v38 = vcombine.low %v538_v50, %v542_v61  ;;  %v550_v31 = vunpack.c.h.s8.bf16 %v5465_v54  ;;  %v554_v50 = vunpack.c.h.s8.bf16 %v5479_v15 }
  0x87   :  { %2830 = vmatpush1.bf16.msra.mxu1 %v6779_v18  ;;  %v4857_v54 = vcombine.low %v617_v48, %v621_v26  ;;  %v562_v18 = vunpack.c.h.s8.bf16 %v5501_v55  ;;  %v633_v15 = vunpack.c.l.s8.bf16 %v5708_v32  ;;  %v570_v26 = vunpack.c.h.s8.bf16 %v5527_v2 }
  0x88   :  { %2748 = vmatpush1.bf16.msra.mxu0 %v4841_v36  ;;  %2831 = vmatprep.subr.bf16.mxu1 %v6780_v46  ;;  %v5712_v27 = vcombine.high %v546_v33, %v550_v31  ;;  %v5714_v36 = vcombine.low %v546_v33, %v550_v31  ;;  %v5722_v61 = vcombine.low %v554_v50, %v558_v17  ;;  %v566_v46 = vunpack.c.h.s8.bf16 %v5507_v39  ;;  %v5728_v31 = vld [vmem:[#allocation3 + $0x560] sm:$0xff] }
  0x89   :  { %2749 = vmatprep.subr.bf16.mxu0 %v4850_v9  ;;  %v5720_v9 = vcombine.high %v554_v50, %v558_v17  ;;  %v4866_v33 = vcombine.high %v625_v14, %v629_v3  ;;  %v574_v55 = vunpack.c.h.s8.bf16 %v5536_v57  ;;  %v4865_v39 = vcombine.low %v625_v14, %v629_v3  ;;  %v5750_v14 = vld [vmem:[#allocation3 + $0x590] sm:$0xff] }
  0x8a   :  { %v5732_v48 = vcombine.high %v562_v18, %v566_v46  ;;  %v578_v17 = vunpack.c.h.s8.bf16 %v5560_v10  ;;  %v641_v2 = vunpack.c.l.s8.bf16 %v5728_v31  ;;  %v590_v10 = vunpack.c.h.s8.bf16 %v5590_v52 }
  0x8b   :  { %2832 = vmatpush1.bf16.msra.mxu1 %v5461_v34  ;;  %v5730_v34 = vld [vmem:[#allocation3 + $0x570] sm:$0xff]  ;;  %v5742_v50 = vcombine.low %v570_v26, %v574_v55  ;;  %v653_v52 = vunpack.c.l.s8.bf16 %v5750_v14 }
  0x8c   :  { %2750 = vmatpush1.bf16.msra.mxu0 %v4849_v22  ;;  %2833 = vmatprep.subr.bf16.mxu1 %v5467_v59  ;;  %6781 = vst [vmem:[#allocation23_spill] sm:$0xff] %v5732_v48  ;;  %v5734_v59 = vcombine.low %v562_v18, %v566_v46  ;;  %v6782_v22 = vld [vmem:[#allocation38_spill] sm:$0xff]  ;;  %v582_v48 = vunpack.c.h.s8.bf16 %v5569_v4  ;;  %v4874_v18 = vcombine.high %v633_v15, %v637_v30  ;;  %v645_v57 = vunpack.c.l.s8.bf16 %v5730_v34  ;;  %v5748_v46 = vld [vmem:[#allocation3 + $0x580] sm:$0xff] }
  0x8d   :  { %2751 = vmatprep.subr.bf16.mxu0 %v4858_v16  ;;  %v5740_v16 = vcombine.high %v570_v26, %v574_v55  ;;  %v4873_v4 = vcombine.low %v633_v15, %v637_v30  ;;  %v594_v55 = vunpack.c.h.s8.bf16 %v5608_v49  ;;  %v602_v30 = vunpack.c.h.s8.bf16 %v5628_v40 }
  0x8e   :  { %v5752_v3 = vcombine.high %v578_v17, %v582_v48  ;;  %v606_v49 = vunpack.c.h.s8.bf16 %v5630_v0 }
  0x8f   :  { %2834 = vmatpush1.bf16.msra.mxu1 %v6782_v22  ;;  %v598_v22 = vunpack.c.h.s8.bf16 %v5610_v44  ;;  %v4881_v44 = vcombine.low %v641_v2, %v645_v57 }
  0x90   :  { %2752 = vmatpush1.bf16.msra.mxu0 %v4857_v54  ;;  %2835 = vmatprep.subr.bf16.mxu1 %v5481_v41  ;;  %v5754_v41 = vcombine.low %v578_v17, %v582_v48  ;;  %v586_v54 = vunpack.c.h.s8.bf16 %v5588_v21  ;;  %v4882_v48 = vcombine.high %v641_v2, %v645_v57  ;;  %v649_v21 = vunpack.c.l.s8.bf16 %v5748_v46  ;;  %v5768_v17 = vld [vmem:[#allocation3 + $0x5a0] sm:$0xff] }
  0x91   :  { %2753 = vmatprep.subr.bf16.mxu0 %v4866_v33  ;;  %v5772_v15 = vcombine.high %v594_v55, %v598_v22  ;;  %v657_v40 = vunpack.c.l.s8.bf16 %v5768_v17  ;;  %v618_v57 = vunpack.c.h.s8.bf16 %v5668_v37 }
  0x92   :  { %v5760_v33 = vcombine.high %v586_v54, %v590_v10  ;;  %v5762_v26 = vcombine.low %v586_v54, %v590_v10  ;;  %v610_v54 = vunpack.c.h.s8.bf16 %v5648_v60  ;;  %v614_v10 = vunpack.c.h.s8.bf16 %v5650_v24 }
  0x93   :  { %2836 = vmatpush1.bf16.msra.mxu1 %v5483_v25  ;;  %v5770_v25 = vld [vmem:[#allocation3 + $0x5b0] sm:$0xff]  ;;  %v622_v60 = vunpack.c.h.s8.bf16 %v5670_v13  ;;  %v4889_v24 = vcombine.low %v649_v21, %v653_v52 }
  0x94   :  { %2754 = vmatpush1.bf16.msra.mxu0 %v4865_v39  ;;  %2837 = vmatprep.subr.bf16.mxu1 %v5487_v19  ;;  %v5774_v19 = vcombine.low %v594_v55, %v598_v22  ;;  %v5780_v39 = vcombine.high %v602_v30, %v606_v49  ;;  %v4890_v55 = vcombine.high %v649_v21, %v653_v52  ;;  %v661_v0 = vunpack.c.l.s8.bf16 %v5770_v25  ;;  %v5788_v22 = vld [vmem:[#allocation3 + $0x5c0] sm:$0xff] }
  0x95   :  { %2755 = vmatprep.subr.bf16.mxu0 %v4874_v18  ;;  %v5782_v18 = vcombine.low %v602_v30, %v606_v49  ;;  %v5792_v2 = vcombine.high %v610_v54, %v614_v10  ;;  %v626_v30 = vunpack.c.h.s8.bf16 %v5688_v63  ;;  %v630_v49 = vunpack.c.h.s8.bf16 %v5690_v12 }
  0x96   :  { %v665_v37 = vunpack.c.l.s8.bf16 %v5788_v22  ;;  %v4897_v63 = vcombine.low %v657_v40, %v661_v0 }
  0x97   :  { %2838 = vmatpush1.bf16.msra.mxu1 %v5489_v45  ;;  %v5790_v45 = vld [vmem:[#allocation3 + $0x5d0] sm:$0xff]  ;;  %v5808_v21 = vcombine.high %v626_v30, %v630_v49  ;;  %v5810_v52 = vcombine.low %v626_v30, %v630_v49 }
  0x98   :  { %2756 = vmatpush1.bf16.msra.mxu0 %v4873_v4  ;;  %2839 = vmatprep.subr.bf16.mxu1 %v5503_v29  ;;  %v5794_v29 = vcombine.low %v610_v54, %v614_v10  ;;  %v5800_v4 = vcombine.high %v618_v57, %v622_v60  ;;  %v4898_v54 = vcombine.high %v657_v40, %v661_v0  ;;  %v669_v13 = vunpack.c.l.s8.bf16 %v5790_v45  ;;  %v289_v10 = vld [vmem:[#allocation3 + $0x5e0] sm:$0xff] }
  0x99   :  { %2757 = vmatprep.subr.bf16.mxu0 %v4882_v48  ;;  %v5802_v48 = vcombine.low %v618_v57, %v622_v60  ;;  %6783 = vst [vmem:[#allocation24_spill] sm:$0xff] %v5810_v52  ;;  %v642_v57 = vunpack.c.h.s8.bf16 %v5728_v31  ;;  %v646_v60 = vunpack.c.h.s8.bf16 %v5730_v34  ;;  %v673_v49 = vunpack.c.l.s8.bf16 %v289_v10  ;;  %v5822_v52 = vld [vmem:[#allocation3 + $0x600] sm:$0xff] }
  0x9a   :  { %v4906_v30 = vcombine.high %v665_v37, %v669_v13  ;;  %v654_v0 = vunpack.c.h.s8.bf16 %v5750_v14  ;;  %v4905_v31 = vcombine.low %v665_v37, %v669_v13  ;;  %v670_v37 = vunpack.c.h.s8.bf16 %v5790_v45  ;;  %v104_v45 = vld [vmem:[#allocation3 + $0x18] sm:$0xff] }
  0x9b   :  { %2840 = vmatpush1.bf16.msra.mxu1 %v5505_v28  ;;  %v291_v28 = vld [vmem:[#allocation3 + $0x5f0] sm:$0xff]  ;;  %v5828_v40 = vcombine.low %v642_v57, %v646_v60 }
  0x9c   :  { %2758 = vmatpush1.bf16.msra.mxu0 %v4881_v44  ;;  %2841 = vmatprep.subr.bf16.mxu1 %v5509_v35  ;;  %v634_v35 = vunpack.c.h.s8.bf16 %v5708_v32  ;;  %v638_v44 = vunpack.c.h.s8.bf16 %v5710_v20  ;;  %v677_v32 = vunpack.c.l.s8.bf16 %v291_v28  ;;  %v5824_v20 = vld [vmem:[#allocation3 + $0x610] sm:$0xff] }
  0x9d   :  { %2759 = vmatprep.subr.bf16.mxu0 %v4890_v55  ;;  %v685_v14 = vunpack.c.l.s8.bf16 %v5824_v20 }
  0x9e   :  { %v5816_v12 = vcombine.high %v634_v35, %v638_v44  ;;  %v5818_v55 = vcombine.low %v634_v35, %v638_v44  ;;  %v662_v35 = vunpack.c.h.s8.bf16 %v5770_v25  ;;  %v4914_v44 = vcombine.high %v673_v49, %v677_v32 }
  0x9f   :  { %2842 = vmatpush1.bf16.msra.mxu1 %v5511_v62  ;;  %v5826_v62 = vcombine.high %v642_v57, %v646_v60  ;;  %v4913_v13 = vcombine.low %v673_v49, %v677_v32  ;;  %v678_v60 = vunpack.c.h.s8.bf16 %v291_v28 }
  0xa0   :  { %2760 = vmatpush1.bf16.msra.mxu0 %v4889_v24  ;;  %2843 = vmatprep.subr.bf16.mxu1 %v5538_v11  ;;  %v650_v11 = vunpack.c.h.s8.bf16 %v5748_v46  ;;  %v681_v46 = vunpack.c.l.s8.bf16 %v5822_v52 }
  0xa1   :  { %2761 = vmatprep.subr.bf16.mxu0 %v4898_v54  ;;  %v658_v54 = vunpack.c.h.s8.bf16 %v5768_v17 }
  0xa2   :  { %v5834_v34 = vcombine.high %v650_v11, %v654_v0  ;;  %v5836_v24 = vcombine.low %v650_v11, %v654_v0  ;;  %v682_v11 = vunpack.c.h.s8.bf16 %v5822_v52  ;;  %v304_v52 = vunpack.c.h.s8.bf16 %v104_v45 }
  0xa3   :  { %2844 = vmatpush1.bf16.msra.mxu1 %v5540_v7  ;;  %v5842_v57 = vcombine.high %v658_v54, %v662_v35  ;;  %v5844_v7 = vcombine.low %v658_v54, %v662_v35 }
  0xa4   :  { %2762 = vmatpush1.bf16.msra.mxu0 %v4897_v63  ;;  %2845 = vmatprep.subr.bf16.mxu1 %v5542_v47  ;;  %v666_v47 = vunpack.c.h.s8.bf16 %v5788_v22  ;;  %v674_v63 = vunpack.c.h.s8.bf16 %v289_v10  ;;  %v686_v22 = vunpack.c.h.s8.bf16 %v5824_v20  ;;  %v4921_v10 = vcombine.low %v681_v46, %v685_v14 }
  0xa5   :  { %2763 = vmatprep.subr.bf16.mxu0 %v4906_v30  ;;  %v4922_v30 = vcombine.high %v681_v46, %v685_v14  ;;  %v6786_v46 = vld [vmem:[#allocation21_spill] sm:$0xff] }
  0xa6   :  { %v5850_v17 = vcombine.high %v666_v47, %v670_v37  ;;  %v5852_v25 = vcombine.low %v666_v47, %v670_v37  ;;  %v5856_v0 = vcombine.high %v674_v63, %v678_v60  ;;  %v5863_v49 = vcombine.low %v674_v63, %v678_v60  ;;  %v110_v47 = vld [vmem:[#allocation3 + $0x48] sm:$0xff]  ;;  %v112_v37 = vld [vmem:[#allocation3 + $0x58] sm:$0xff] }
  0xa7   :  { %2846 = vmatpush1.bf16.msra.mxu1 %v5544_v5  ;;  %v5861_v5 = vpack.c.bf16 %v5533_v42, %v5533_v42  ;;  %v4924_v32 = vcombine.high %v682_v11, %v686_v22  ;;  %v6784_v42 = vld [vmem:[#allocation9_spill] sm:$0xff]  ;;  %v316_v63 = vunpack.c.h.s8.bf16 %v110_v47  ;;  %v320_v60 = vunpack.c.h.s8.bf16 %v112_v37 }
  0xa8   :  { %2764 = vmatpush1.bf16.msra.mxu0 %v4905_v31  ;;  %2847 = vmatprep.subr.bf16.mxu1 %v5562_v1  ;;  %v102_v1 = vld [vmem:[#allocation3 + $0x8] sm:$0xff]  ;;  %v108_v31 = vld [vmem:[#allocation3 + $0x38] sm:$0xff] }
  0xa9   :  { %2765 = vmatprep.subr.bf16.mxu0 %v4914_v44  ;;  %v300_v28 = vunpack.c.h.s8.bf16 %v102_v1  ;;  %v312_v35 = vunpack.c.h.s8.bf16 %v108_v31  ;;  %v6663_v44 = vmov 0  }
  0xab   :  { %2848 = vmatpush1.bf16.msra.mxu1 %v5564_v6  ;;  %v5867_v20 = vcombine.high %v300_v28, %v304_v52  ;;  %v106_v6 = vld [vmem:[#allocation3 + $0x28] sm:$0xff]  ;;  %v5871_v54 = vcombine.low %v300_v28, %v304_v52  ;;  %v5885_v28 = vcombine.high %v316_v63, %v320_v60  ;;  %v6790_v52 = vld [vmem:[#allocation41_spill] sm:$0xff] }
  0xac   :  { %2766 = vmatpush1.bf16.msra.mxu0 %v4913_v13  ;;  %2858 = vmatprep.subr.bf16.mxu1 %v5555_v23  ;;  %v308_v23 = vunpack.c.h.s8.bf16 %v106_v6 }
  0xad   :  { %2776 = vmatprep.subr.bf16.mxu0 %v4922_v30  ;;  %6785 = vst [vmem:[#allocation25_spill] sm:$0xff] %v5871_v54  ;;  %v299_v30 = vunpack.c.l.s8.bf16 %v102_v1  ;;  %6789 = vst [vmem:[#allocation28_spill] sm:$0xff] %v5885_v28  ;;  %v6795_v1 = vld [vmem:[#allocation43_spill] sm:$0xff]  ;;  %v319_v28 = vunpack.c.l.s8.bf16 %v112_v37  ;;  %v6804_v37 = vld [vmem:[#allocation26_spill] sm:$0xff] }
  0xae   :  { %2850 = vmatmul.mubr.bf16.vlgmr.msra.gmra.mrb[4].mxu1 %v5494_v58  ;;  %v5876_v14 = vcombine.high %v308_v23, %v312_v35  ;;  %v5879_v13 = vcombine.low %v308_v23, %v312_v35  ;;  %v5890_v23 = vcombine.low %v316_v63, %v320_v60  ;;  %v4923_v35 = vcombine.low %v682_v11, %v686_v22  ;;  %v6798_v22 = vld [vmem:[#allocation45_spill] sm:$0xff] }
  0xaf   :  { %2768 = vmatmul.mubr.bf16.vlgmr.msra.gmra.mrb[0].mxu0 %v5861_v5  ;;  %2859 = vmatpush1.bf16.msra.mxu1 %v6784_v42  ;;  %v116_v42 = vld [vmem:[#allocation3 + $0x78] sm:$0xff]  ;;  %v6797_v63 = vmov 0   ;;  %v307_v60 = vunpack.c.l.s8.bf16 %v106_v6  ;;  %v311_v11 = vunpack.c.l.s8.bf16 %v108_v31 }
  0xb0   :  { %2860 = vmatprep.subr.bf16.mxu1 %v5571_v56  ;;  %2777 = vmatpush1.bf16.msra.mxu0 %v4921_v10  ;;  %6787 = vst [vmem:[#allocation34_spill] sm:$0xff] %v5876_v14  ;;  %6788 = vst [vmem:[#allocation35_spill] sm:$0xff] %v5879_v13  ;;  %v84_v56 = vld [vmem:[%s6619_s0 + $0x18] sm:$0xf]  ;;  %v303_v10 = vunpack.c.l.s8.bf16 %v104_v45  ;;  %v328_v13 = vunpack.c.h.s8.bf16 %v116_v42 }
  0xb1   :  { %2808 = vmatprep.mubr.bf16.mxu0 %v6663_v44  ;;  %2940 = vmatprep.subr.bf16.mxu0 %v4924_v32  ;;  %v5888_v32 = vpack.c.bf16 %v84_v56, %v84_v56  ;;  %6792 = vst [vmem:[#allocation32_spill] sm:$0xff] %v5890_v23  ;;  %v6796_v56 = vld [vmem:[#allocation44_spill] sm:$0xff]  ;;  %v315_v23 = vunpack.c.l.s8.bf16 %v110_v47  ;;  %v6803_v47 = vld [vmem:[#allocation11_spill] sm:$0xff] }
  0xb2   :  { %2890 = vmatprep.mubr.bf16.mxu1 %v6786_v46  ;;  %v4542_v14 = vcombine.high %v299_v30, %v303_v10 }
  0xb3   :  { %2861 = vmatpush1.bf16.msra.mxu1 %v5573_v51  ;;  %6791 = vst [vmem:[#allocation29_spill] sm:$0xff] %v5888_v32  ;;  %v114_v51 = vld [vmem:[#allocation3 + $0x68] sm:$0xff]  ;;  %v4558_v6 = vcombine.high %v315_v23, %v319_v28 }
  0xb4   :  { %2862 = vmatprep.subr.bf16.mxu1 %v5584_v43  ;;  %v6793_v43 = vld [vmem:[#allocation42_spill] sm:$0xff]  ;;  %v324_v44 = vunpack.c.h.s8.bf16 %v114_v51  ;;  %v323_v31 = vunpack.c.l.s8.bf16 %v114_v51 }
  0xb5   :  { %v5917_v51 = vld [vmem:[#allocation3 + $0xa8] sm:$0xff] }
  0xb6   :  { %v5893_v54 = vcombine.high %v324_v44, %v328_v13  ;;  %v5898_v45 = vcombine.low %v324_v44, %v328_v13  ;;  %v6800_v44 = vld [vmem:[#allocation47_spill] sm:$0xff]  ;;  %v6801_v13 = vld [vmem:[#allocation10_spill] sm:$0xff] }
  0xb7   :  { %2863 = vmatpush1.bf16.msra.mxu1 %v6790_v52  ;;  %v6799_v52 = vld [vmem:[#allocation46_spill] sm:$0xff] }
  0xb8   :  { %2864 = vmatprep.subr.bf16.mxu1 %v6793_v43  ;;  %6794 = vst [vmem:[#allocation33_spill] sm:$0xff] %v5893_v54  ;;  %v4541_v43 = vcombine.low %v299_v30, %v303_v10  ;;  %v4550_v54 = vcombine.high %v307_v60, %v311_v11  ;;  %v5911_v30 = vld [vmem:[#allocation3 + $0x98] sm:$0xff]  ;;  %v4557_v10 = vcombine.low %v315_v23, %v319_v28  ;;  %v339_v28 = vunpack.c.l.s8.bf16 %v5917_v51 }
  0xbb   :  { %4929 = vmatmul.mubr.msk.bf16.vlgmr.msra.gmra.mrb[0].mxu0 %vm2649_vm0, %v5888_v32  ;;  %2865 = vmatpush1.bf16.msra.mxu1 %v6795_v1  ;;  %v6802_v1 = vld [vmem:[#allocation20_spill] sm:$0xff] }
  0xbc   :  { %2866 = vmatprep.subr.bf16.mxu1 %v6796_v56  ;;  %2941 = vmatpush1.bf16.msra.mxu0 %v4923_v35  ;;  %v4549_v35 = vcombine.low %v307_v60, %v311_v11  ;;  %v5909_v56 = vld [vmem:[#allocation3 + $0x88] sm:$0xff]  ;;  %v6805_v11 = vld [vmem:[#allocation12_spill] sm:$0xff] }
  0xbd   :  { %2972 = vmatprep.mubr.bf16.mxu0 %v6797_v63  ;;  %2981 = vmatprep.subr.bf16.mxu0 %v4542_v14  ;;  %v327_v14 = vunpack.c.l.s8.bf16 %v116_v42  ;;  %v331_v60 = vunpack.c.l.s8.bf16 %v5909_v56  ;;  %v5919_v42 = vld [vmem:[#allocation3 + $0xb8] sm:$0xff] }
  0xbe   :  { %v343_v23 = vunpack.c.l.s8.bf16 %v5919_v42  ;;  %v6816_v63 = vld [vmem:[#allocation16_spill] sm:$0xff] }
  0xbf   :  { %2867 = vmatpush1.bf16.msra.mxu1 %v6798_v22  ;;  %v4566_v22 = vcombine.high %v323_v31, %v327_v14 }
  0xc0   :  { %2868 = vmatprep.subr.bf16.mxu1 %v6799_v52  ;;  %v6806_v52 = vld [vmem:[#allocation13_spill] sm:$0xff] }
  0xc3   :  { %4930 = vmatmul.mubr.msk.bf16.vlgmr.msra.gmra.mrb[4].mxu0 %vm2649_vm0, %v5888_v32  ;;  %2869 = vmatpush1.bf16.msra.mxu1 %v6800_v44  ;;  %v6813_v32 = vld [vmem:[#allocation30_spill] sm:$0xff] }
  0xc4   :  { %2982 = vmatpush1.bf16.msra.mxu0 %v4541_v43  ;;  %2870 = vmatprep.subr.bf16.mxu1 %v6801_v13  ;;  %v4565_v43 = vcombine.low %v323_v31, %v327_v14  ;;  %v5925_v13 = vld [vmem:[#allocation3 + $0xc8] sm:$0xff] }
  0xc5   :  { %2983 = vmatprep.subr.bf16.mxu0 %v4550_v54  ;;  %3013 = vmatprep.mubr.bf16.mxu0 %v6802_v1  ;;  %v335_v54 = vunpack.c.l.s8.bf16 %v5911_v30  ;;  %v347_v31 = vunpack.c.l.s8.bf16 %v5925_v13 }
  0xc7   :  { %2871 = vmatpush1.bf16.msra.mxu1 %v6803_v47  ;;  %v4574_v44 = vcombine.high %v331_v60, %v335_v54  ;;  %v6809_v47 = vld [vmem:[#allocation15_spill] sm:$0xff] }
  0xc8   :  { %2984 = vmatpush1.bf16.msra.mxu0 %v4549_v35  ;;  %2872 = vmatprep.subr.bf16.mxu1 %v6804_v37  ;;  %v5927_v35 = vld [vmem:[#allocation3 + $0xd8] sm:$0xff]  ;;  %v4573_v37 = vcombine.low %v331_v60, %v335_v54 }
  0xc9   :  { %2985 = vmatprep.subr.bf16.mxu0 %v4558_v6  ;;  %6807 = vst [vmem:[#allocation36_spill] sm:$0xff] %v5927_v35  ;;  %v6808_v6 = vld [vmem:[#allocation14_spill] sm:$0xff]  ;;  %v351_v14 = vunpack.c.l.s8.bf16 %v5927_v35  ;;  %v6817_v35 = vld [vmem:[#allocation17_spill] sm:$0xff] }
  0xcb   :  { %2873 = vmatpush1.bf16.msra.mxu1 %v6805_v11  ;;  %v5935_v11 = vld [vmem:[#allocation3 + $0xf8] sm:$0xff] }
  0xcc   :  { %2986 = vmatpush1.bf16.msra.mxu0 %v4557_v10  ;;  %2874 = vmatprep.subr.bf16.mxu1 %v6806_v52  ;;  %v4582_v10 = vcombine.high %v339_v28, %v343_v23  ;;  %6811 = vst [vmem:[#allocation38_spill] sm:$0xff] %v5935_v11  ;;  %v6812_v52 = vld [vmem:[#allocation27_spill] sm:$0xff]  ;;  %v359_v54 = vunpack.c.l.s8.bf16 %v5935_v11  ;;  %v6818_v11 = vld [vmem:[#allocation18_spill] sm:$0xff] }
  0xcd   :  { %2987 = vmatprep.subr.bf16.mxu0 %v4566_v22  ;;  %v5933_v22 = vld [vmem:[#allocation3 + $0xe8] sm:$0xff] }
  0xce   :  { %6810 = vst [vmem:[#allocation37_spill] sm:$0xff] %v5933_v22  ;;  %v355_v60 = vunpack.c.l.s8.bf16 %v5933_v22  ;;  %v6819_v22 = vld [vmem:[#allocation19_spill] sm:$0xff] }
  0xcf   :  { %2875 = vmatpush1.bf16.msra.mxu1 %v6808_v6  ;;  %v4581_v6 = vcombine.low %v339_v28, %v343_v23  ;;  %v5949_v23 = vld [vmem:[#allocation3 + $0x128] sm:$0xff] }
  0xd0   :  { %2988 = vmatpush1.bf16.msra.mxu0 %v4565_v43  ;;  %2876 = vmatprep.subr.bf16.mxu1 %v6809_v47  ;;  %v4590_v43 = vcombine.high %v347_v31, %v351_v14  ;;  %v5943_v47 = vld [vmem:[#allocation3 + $0x118] sm:$0xff] }
  0xd1   :  { %2989 = vmatprep.subr.bf16.mxu0 %v4574_v44  ;;  %v5941_v44 = vld [vmem:[#allocation3 + $0x108] sm:$0xff]  ;;  %6815 = vst [vmem:[#allocation21_spill] sm:$0xff] %v5943_v47  ;;  %v367_v28 = vunpack.c.l.s8.bf16 %v5943_v47  ;;  %v6820_v47 = vld [vmem:[#allocation31_spill] sm:$0xff] }
  0xd2   :  { %6814 = vst [vmem:[#allocation9_spill] sm:$0xff] %v5941_v44 }
  0xd3   :  { %2877 = vmatpush1.bf16.msra.mxu1 %v6812_v52  ;;  %v4589_v52 = vcombine.low %v347_v31, %v351_v14  ;;  %v5957_v14 = vld [vmem:[#allocation3 + $0x148] sm:$0xff] }
  0xd4   :  { %2990 = vmatpush1.bf16.msra.mxu0 %v4573_v37  ;;  %2878 = vmatprep.subr.bf16.mxu1 %v6813_v32  ;;  %v4598_v37 = vcombine.high %v355_v60, %v359_v54  ;;  %v363_v32 = vunpack.c.l.s8.bf16 %v5941_v44  ;;  %v6821_v44 = vld [vmem:[#allocation22_spill] sm:$0xff] }
  0xd5   :  { %2991 = vmatprep.subr.bf16.mxu0 %v4582_v10  ;;  %v5951_v10 = vld [vmem:[#allocation3 + $0x138] sm:$0xff] }
  0xd6   :  { %v375_v31 = vunpack.c.l.s8.bf16 %v5951_v10 }
  0xd7   :  { %2879 = vmatpush1.bf16.msra.mxu1 %v6816_v63  ;;  %v4597_v63 = vcombine.low %v355_v60, %v359_v54  ;;  %v5965_v54 = vld [vmem:[#allocation3 + $0x168] sm:$0xff] }
  0xd8   :  { %2992 = vmatpush1.bf16.msra.mxu0 %v4581_v6  ;;  %2880 = vmatprep.subr.bf16.mxu1 %v6817_v35  ;;  %v4606_v6 = vcombine.high %v363_v32, %v367_v28  ;;  %v371_v35 = vunpack.c.l.s8.bf16 %v5949_v23 }
  0xd9   :  { %2993 = vmatprep.subr.bf16.mxu0 %v4590_v43  ;;  %v5959_v43 = vld [vmem:[#allocation3 + $0x158] sm:$0xff] }
  0xda   :  { %v383_v60 = vunpack.c.l.s8.bf16 %v5959_v43 }
  0xdb   :  { %2881 = vmatpush1.bf16.msra.mxu1 %v6818_v11  ;;  %v4605_v11 = vcombine.low %v363_v32, %v367_v28  ;;  %v5973_v28 = vld [vmem:[#allocation3 + $0x188] sm:$0xff] }
  0xdc   :  { %2994 = vmatpush1.bf16.msra.mxu0 %v4589_v52  ;;  %2882 = vmatprep.subr.bf16.mxu1 %v6819_v22  ;;  %v4614_v52 = vcombine.high %v371_v35, %v375_v31  ;;  %v379_v22 = vunpack.c.l.s8.bf16 %v5957_v14  ;;  %6822 = vst [vmem:[#allocation41_spill] sm:$0xff] %v5973_v28 }
  0xdd   :  { %2995 = vmatprep.subr.bf16.mxu0 %v4598_v37  ;;  %v5967_v37 = vld [vmem:[#allocation3 + $0x178] sm:$0xff] }
  0xde   :  { %v391_v32 = vunpack.c.l.s8.bf16 %v5967_v37 }
  0xdf   :  { %2883 = vmatpush1.bf16.msra.mxu1 %v6820_v47  ;;  %v4613_v47 = vcombine.low %v371_v35, %v375_v31  ;;  %v5981_v31 = vld [vmem:[#allocation3 + $0x1a8] sm:$0xff] }
  0xe0   :  { %2996 = vmatpush1.bf16.msra.mxu0 %v4597_v63  ;;  %2884 = vmatprep.subr.bf16.mxu1 %v6821_v44  ;;  %v4622_v63 = vcombine.high %v379_v22, %v383_v60  ;;  %v387_v44 = vunpack.c.l.s8.bf16 %v5965_v54 }
  0xe1   :  { %2997 = vmatprep.subr.bf16.mxu0 %v4606_v6  ;;  %v5975_v6 = vld [vmem:[#allocation3 + $0x198] sm:$0xff] }
  0xe2   :  { %6823 = vst [vmem:[#allocation42_spill] sm:$0xff] %v5975_v6  ;;  %v399_v35 = vunpack.c.l.s8.bf16 %v5975_v6  ;;  %v5992_v6 = vld [vmem:[#allocation3 + $0x1d8] sm:$0xff] }
  0xe3   :  { %2885 = vmatpush1.bf16.msra.mxu1 %v5694_v8  ;;  %v4621_v8 = vcombine.low %v379_v22, %v383_v60  ;;  %v6825_v60 = vld [vmem:[#allocation39_spill] sm:$0xff] }
  0xe4   :  { %2998 = vmatpush1.bf16.msra.mxu0 %v4605_v11  ;;  %2886 = vmatprep.subr.bf16.mxu1 %v5700_v53  ;;  %v4630_v11 = vcombine.high %v387_v44, %v391_v32  ;;  %v395_v53 = vunpack.c.l.s8.bf16 %v5973_v28  ;;  %v6826_v28 = vld [vmem:[#allocation40_spill] sm:$0xff] }
  0xe5   :  { %2999 = vmatprep.subr.bf16.mxu0 %v4614_v52  ;;  %v5983_v52 = vld [vmem:[#allocation3 + $0x1b8] sm:$0xff] }
  0xe6   :  { %6824 = vst [vmem:[#allocation43_spill] sm:$0xff] %v5983_v52  ;;  %v407_v22 = vunpack.c.l.s8.bf16 %v5983_v52  ;;  %v6001_v52 = vld [vmem:[#allocation3 + $0x1f8] sm:$0xff] }
  0xe7   :  { %2887 = vmatpush1.bf16.msra.mxu1 %v5702_v38  ;;  %v4629_v38 = vcombine.low %v387_v44, %v391_v32 }
  0xe8   :  { %3000 = vmatpush1.bf16.msra.mxu0 %v4613_v47  ;;  %2888 = vmatprep.subr.bf16.mxu1 %v5712_v27  ;;  %v4638_v47 = vcombine.high %v395_v53, %v399_v35  ;;  %v403_v27 = vunpack.c.l.s8.bf16 %v5981_v31 }
  0xe9   :  { %3001 = vmatprep.subr.bf16.mxu0 %v4622_v63  ;;  %v5990_v63 = vld [vmem:[#allocation3 + $0x1c8] sm:$0xff] }
  0xea   :  { %v4646_v44 = vcombine.high %v403_v27, %v407_v22  ;;  %v411_v32 = vunpack.c.l.s8.bf16 %v5990_v63 }
  0xeb   :  { %2889 = vmatpush1.bf16.msra.mxu1 %v5714_v36  ;;  %v6827_v36 = vld [vmem:[#allocation23_spill] sm:$0xff] }
  0xec   :  { %3002 = vmatpush1.bf16.msra.mxu0 %v4621_v8  ;;  %2899 = vmatprep.subr.bf16.mxu1 %v5720_v9  ;;  %v4637_v9 = vcombine.low %v395_v53, %v399_v35  ;;  %v415_v8 = vunpack.c.l.s8.bf16 %v5992_v6  ;;  %v423_v35 = vunpack.c.l.s8.bf16 %v6001_v52 }
  0xed   :  { %3003 = vmatprep.subr.bf16.mxu0 %v4630_v11  ;;  %v5999_v11 = vld [vmem:[#allocation3 + $0x1e8] sm:$0xff] }
  0xee   :  { %2891 = vmatmul.mubr.bf16.vlgmr.msra.gmra.mrb[4].mxu1 %v6825_v60  ;;  %v419_v53 = vunpack.c.l.s8.bf16 %v5999_v11 }
  0xef   :  { %2900 = vmatpush1.bf16.msra.mxu1 %v5722_v61  ;;  %2931 = vmatprep.mubr.bf16.mxu1 %v6826_v28  ;;  %v4645_v61 = vcombine.low %v403_v27, %v407_v22  ;;  %v6015_v22 = vld [vmem:[#allocation3 + $0x228] sm:$0xff] }
  0xf0   :  { %3004 = vmatpush1.bf16.msra.mxu0 %v4629_v38  ;;  %2901 = vmatprep.subr.bf16.mxu1 %v6827_v36  ;;  %v4654_v38 = vcombine.high %v411_v32, %v415_v8  ;;  %v6009_v36 = vld [vmem:[#allocation3 + $0x218] sm:$0xff] }
  0xf1   :  { %3005 = vmatprep.subr.bf16.mxu0 %v4638_v47  ;;  %v6007_v47 = vld [vmem:[#allocation3 + $0x208] sm:$0xff]  ;;  %v431_v27 = vunpack.c.l.s8.bf16 %v6009_v36 }
  0xf3   :  { %2902 = vmatpush1.bf16.msra.mxu1 %v5734_v59  ;;  %v4653_v59 = vcombine.low %v411_v32, %v415_v8  ;;  %v6023_v8 = vld [vmem:[#allocation3 + $0x248] sm:$0xff] }
  0xf4   :  { %3006 = vmatpush1.bf16.msra.mxu0 %v4637_v9  ;;  %2903 = vmatprep.subr.bf16.mxu1 %v5740_v16  ;;  %v4662_v9 = vcombine.high %v419_v53, %v423_v35  ;;  %v427_v16 = vunpack.c.l.s8.bf16 %v6007_v47 }
  0xf5   :  { %3007 = vmatprep.subr.bf16.mxu0 %v4646_v44  ;;  %v6017_v44 = vld [vmem:[#allocation3 + $0x238] sm:$0xff] }
  0xf6   :  { %v439_v32 = vunpack.c.l.s8.bf16 %v6017_v44 }
  0xf7   :  { %2904 = vmatpush1.bf16.msra.mxu1 %v5742_v50  ;;  %v4661_v50 = vcombine.low %v419_v53, %v423_v35  ;;  %v6031_v35 = vld [vmem:[#allocation3 + $0x268] sm:$0xff] }
  0xf8   :  { %3008 = vmatpush1.bf16.msra.mxu0 %v4645_v61  ;;  %2905 = vmatprep.subr.bf16.mxu1 %v5752_v3  ;;  %v4670_v61 = vcombine.high %v427_v16, %v431_v27  ;;  %v435_v3 = vunpack.c.l.s8.bf16 %v6015_v22 }
  0xf9   :  { %3009 = vmatprep.subr.bf16.mxu0 %v4654_v38  ;;  %v6025_v38 = vld [vmem:[#allocation3 + $0x258] sm:$0xff] }
  0xfa   :  { %v447_v53 = vunpack.c.l.s8.bf16 %v6025_v38 }
  0xfb   :  { %2906 = vmatpush1.bf16.msra.mxu1 %v5754_v41  ;;  %v4669_v41 = vcombine.low %v427_v16, %v431_v27  ;;  %v451_v16 = vunpack.c.l.s8.bf16 %v6031_v35 }
  0xfc   :  { %3010 = vmatpush1.bf16.msra.mxu0 %v4653_v59  ;;  %2907 = vmatprep.subr.bf16.mxu1 %v5760_v33  ;;  %v4678_v59 = vcombine.high %v435_v3, %v439_v32  ;;  %v443_v33 = vunpack.c.l.s8.bf16 %v6023_v8 }
  0xfd   :  { %3011 = vmatprep.subr.bf16.mxu0 %v4662_v9  ;;  %v6033_v9 = vld [vmem:[#allocation3 + $0x278] sm:$0xff] }
  0xfe   :  { %v455_v27 = vunpack.c.l.s8.bf16 %v6033_v9 }
  0xff   :  { %2908 = vmatpush1.bf16.msra.mxu1 %v5762_v26  ;;  %v4677_v26 = vcombine.low %v435_v3, %v439_v32 }
 0x100   :  { %3012 = vmatpush1.bf16.msra.mxu0 %v4661_v50  ;;  %2909 = vmatprep.subr.bf16.mxu1 %v5772_v15  ;;  %v4686_v15 = vcombine.high %v443_v33, %v447_v53  ;;  %v6041_v50 = vld [vmem:[#allocation3 + $0x288] sm:$0xff] }
 0x101   :  { %3022 = vmatprep.subr.bf16.mxu0 %v4670_v61  ;;  %v6043_v61 = vld [vmem:[#allocation3 + $0x298] sm:$0xff]  ;;  %v459_v3 = vunpack.c.l.s8.bf16 %v6041_v50 }
 0x102   :  { %v463_v32 = vunpack.c.l.s8.bf16 %v6043_v61 }
 0x103   :  { %3014 = vmatmul.mubr.bf16.vlgmr.msra.gmra.mrb[8].mxu0 %v5494_v58  ;;  %2910 = vmatpush1.bf16.msra.mxu1 %v5774_v19  ;;  %v4685_v19 = vcombine.low %v443_v33, %v447_v53  ;;  %v6057_v53 = vld [vmem:[#allocation3 + $0x2c8] sm:$0xff] }
 0x104   :  { %3023 = vmatpush1.bf16.msra.mxu0 %v4669_v41  ;;  %2911 = vmatprep.subr.bf16.mxu1 %v5780_v39  ;;  %v4694_v39 = vcombine.high %v451_v16, %v455_v27  ;;  %v6049_v41 = vld [vmem:[#allocation3 + $0x2a8] sm:$0xff] }
 0x105   :  { %3024 = vmatprep.subr.bf16.mxu0 %v4678_v59  ;;  %3054 = vmatprep.mubr.bf16.mxu0 %v6786_v46  ;;  %v6051_v59 = vld [vmem:[#allocation3 + $0x2b8] sm:$0xff] }
 0x106   :  { %6828 = vst [vmem:[#allocation44_spill] sm:$0xff] %v6051_v59  ;;  %v471_v33 = vunpack.c.l.s8.bf16 %v6051_v59  ;;  %v6829_v59 = vld [vmem:[#allocation24_spill] sm:$0xff] }
 0x107   :  { %2912 = vmatpush1.bf16.msra.mxu1 %v5782_v18  ;;  %v4693_v18 = vcombine.low %v451_v16, %v455_v27  ;;  %v6065_v27 = vld [vmem:[#allocation3 + $0x2e8] sm:$0xff] }
 0x108   :  { %3025 = vmatpush1.bf16.msra.mxu0 %v4677_v26  ;;  %2913 = vmatprep.subr.bf16.mxu1 %v5792_v2  ;;  %v4702_v26 = vcombine.high %v459_v3, %v463_v32  ;;  %v467_v2 = vunpack.c.l.s8.bf16 %v6049_v41 }
 0x109   :  { %3026 = vmatprep.subr.bf16.mxu0 %v4686_v15  ;;  %v6059_v15 = vld [vmem:[#allocation3 + $0x2d8] sm:$0xff] }
 0x10a   :  { %v479_v16 = vunpack.c.l.s8.bf16 %v6059_v15 }
 0x10b   :  { %2914 = vmatpush1.bf16.msra.mxu1 %v5794_v29  ;;  %v4701_v29 = vcombine.low %v459_v3, %v463_v32  ;;  %v6073_v32 = vld [vmem:[#allocation3 + $0x308] sm:$0xff] }
 0x10c   :  { %3027 = vmatpush1.bf16.msra.mxu0 %v4685_v19  ;;  %2915 = vmatprep.subr.bf16.mxu1 %v5800_v4  ;;  %v4710_v19 = vcombine.high %v467_v2, %v471_v33  ;;  %v475_v4 = vunpack.c.l.s8.bf16 %v6057_v53 }
 0x10d   :  { %3028 = vmatprep.subr.bf16.mxu0 %v4694_v39  ;;  %v6067_v39 = vld [vmem:[#allocation3 + $0x2f8] sm:$0xff] }
 0x10e   :  { %v487_v3 = vunpack.c.l.s8.bf16 %v6067_v39 }
 0x10f   :  { %2916 = vmatpush1.bf16.msra.mxu1 %v5802_v48  ;;  %v4709_v48 = vcombine.low %v467_v2, %v471_v33  ;;  %v6081_v33 = vld [vmem:[#allocation3 + $0x328] sm:$0xff] }
 0x110   :  { %3029 = vmatpush1.bf16.msra.mxu0 %v4693_v18  ;;  %2917 = vmatprep.subr.bf16.mxu1 %v5808_v21  ;;  %v4718_v18 = vcombine.high %v475_v4, %v479_v16  ;;  %v483_v21 = vunpack.c.l.s8.bf16 %v6065_v27 }
 0x111   :  { %3030 = vmatprep.subr.bf16.mxu0 %v4702_v26  ;;  %v6075_v26 = vld [vmem:[#allocation3 + $0x318] sm:$0xff] }
 0x112   :  { %v495_v2 = vunpack.c.l.s8.bf16 %v6075_v26 }
 0x113   :  { %2918 = vmatpush1.bf16.msra.mxu1 %v6829_v59  ;;  %v4717_v59 = vcombine.low %v475_v4, %v479_v16  ;;  %v6089_v16 = vld [vmem:[#allocation3 + $0x348] sm:$0xff] }
 0x114   :  { %3031 = vmatpush1.bf16.msra.mxu0 %v4701_v29  ;;  %2919 = vmatprep.subr.bf16.mxu1 %v5816_v12  ;;  %v4726_v29 = vcombine.high %v483_v21, %v487_v3  ;;  %v491_v12 = vunpack.c.l.s8.bf16 %v6073_v32 }
 0x115   :  { %3032 = vmatprep.subr.bf16.mxu0 %v4710_v19  ;;  %v6083_v19 = vld [vmem:[#allocation3 + $0x338] sm:$0xff] }
 0x116   :  { %v503_v4 = vunpack.c.l.s8.bf16 %v6083_v19 }
 0x117   :  { %2920 = vmatpush1.bf16.msra.mxu1 %v5818_v55  ;;  %v4725_v55 = vcombine.low %v483_v21, %v487_v3  ;;  %v6097_v3 = vld [vmem:[#allocation3 + $0x368] sm:$0xff] }
 0x118   :  { %3033 = vmatpush1.bf16.msra.mxu0 %v4709_v48  ;;  %2921 = vmatprep.subr.bf16.mxu1 %v5826_v62  ;;  %v4734_v48 = vcombine.high %v491_v12, %v495_v2  ;;  %v499_v62 = vunpack.c.l.s8.bf16 %v6081_v33  ;;  %6830 = vst [vmem:[#allocation45_spill] sm:$0xff] %v6097_v3 }
 0x119   :  { %3034 = vmatprep.subr.bf16.mxu0 %v4718_v18  ;;  %v6091_v18 = vld [vmem:[#allocation3 + $0x358] sm:$0xff] }
 0x11a   :  { %v511_v21 = vunpack.c.l.s8.bf16 %v6091_v18 }
 0x11b   :  { %2922 = vmatpush1.bf16.msra.mxu1 %v5828_v40  ;;  %v4733_v40 = vcombine.low %v491_v12, %v495_v2  ;;  %v6105_v2 = vld [vmem:[#allocation3 + $0x388] sm:$0xff] }
 0x11c   :  { %3035 = vmatpush1.bf16.msra.mxu0 %v4717_v59  ;;  %2923 = vmatprep.subr.bf16.mxu1 %v5834_v34  ;;  %v4742_v59 = vcombine.high %v499_v62, %v503_v4  ;;  %v507_v34 = vunpack.c.l.s8.bf16 %v6089_v16  ;;  %6832 = vst [vmem:[#allocation47_spill] sm:$0xff] %v6105_v2 }
 0x11d   :  { %3036 = vmatprep.subr.bf16.mxu0 %v4726_v29  ;;  %v6099_v29 = vld [vmem:[#allocation3 + $0x378] sm:$0xff] }
 0x11e   :  { %6831 = vst [vmem:[#allocation46_spill] sm:$0xff] %v6099_v29  ;;  %v519_v12 = vunpack.c.l.s8.bf16 %v6099_v29 }
 0x11f   :  { %2924 = vmatpush1.bf16.msra.mxu1 %v5836_v24  ;;  %v4741_v24 = vcombine.low %v499_v62, %v503_v4  ;;  %v6113_v4 = vld [vmem:[#allocation3 + $0x3a8] sm:$0xff] }
 0x120   :  { %3037 = vmatpush1.bf16.msra.mxu0 %v4725_v55  ;;  %2925 = vmatprep.subr.bf16.mxu1 %v5842_v57  ;;  %v4750_v55 = vcombine.high %v507_v34, %v511_v21  ;;  %v515_v57 = vunpack.c.l.s8.bf16 %v6097_v3  ;;  %6834 = vst [vmem:[#allocation20_spill] sm:$0xff] %v6113_v4 }
 0x121   :  { %3038 = vmatprep.subr.bf16.mxu0 %v4734_v48  ;;  %v6107_v48 = vld [vmem:[#allocation3 + $0x398] sm:$0xff] }
 0x122   :  { %6833 = vst [vmem:[#allocation10_spill] sm:$0xff] %v6107_v48  ;;  %v527_v62 = vunpack.c.l.s8.bf16 %v6107_v48  ;;  %v4757_v29 = vcombine.low %v515_v57, %v519_v12  ;;  %v6843_v48 = vld [vmem:[#allocation28_spill] sm:$0xff] }
 0x123   :  { %2926 = vmatpush1.bf16.msra.mxu1 %v5844_v7  ;;  %v4749_v7 = vcombine.low %v507_v34, %v511_v21  ;;  %v6122_v21 = vld [vmem:[#allocation3 + $0x3c8] sm:$0xff] }
 0x124   :  { %3039 = vmatpush1.bf16.msra.mxu0 %v4733_v40  ;;  %2927 = vmatprep.subr.bf16.mxu1 %v5850_v17  ;;  %v4758_v40 = vcombine.high %v515_v57, %v519_v12  ;;  %v523_v17 = vunpack.c.l.s8.bf16 %v6105_v2  ;;  %6836 = vst [vmem:[#allocation26_spill] sm:$0xff] %v6122_v21  ;;  %v6839_v57 = vld [vmem:[#allocation34_spill] sm:$0xff]  ;;  %v539_v12 = vunpack.c.l.s8.bf16 %v6122_v21  ;;  %v6846_v21 = vld [vmem:[#allocation32_spill] sm:$0xff] }
 0x125   :  { %3040 = vmatprep.subr.bf16.mxu0 %v4742_v59  ;;  %v6115_v59 = vld [vmem:[#allocation3 + $0x3b8] sm:$0xff] }
 0x126   :  { %6835 = vst [vmem:[#allocation11_spill] sm:$0xff] %v6115_v59  ;;  %v535_v34 = vunpack.c.l.s8.bf16 %v6115_v59  ;;  %v6133_v59 = vld [vmem:[#allocation3 + $0x3f8] sm:$0xff] }
 0x127   :  { %2928 = vmatpush1.bf16.msra.mxu1 %v5852_v25  ;;  %v4766_v25 = vcombine.high %v523_v17, %v527_v62  ;;  %6841 = vst [vmem:[#allocation14_spill] sm:$0xff] %v6133_v59  ;;  %v6162_v2 = vld [vmem:[#allocation3 + $0x458] sm:$0xff] }
 0x128   :  { %3041 = vmatpush1.bf16.msra.mxu0 %v4741_v24  ;;  %2929 = vmatprep.subr.bf16.mxu1 %v5856_v0  ;;  %v531_v0 = vunpack.c.l.s8.bf16 %v6113_v4  ;;  %v6124_v24 = vld [vmem:[#allocation3 + $0x3d8] sm:$0xff]  ;;  %v6842_v4 = vld [vmem:[#allocation35_spill] sm:$0xff]  ;;  %6852 = vst [vmem:[#allocation18_spill] sm:$0xff] %v6162_v2 }
 0x129   :  { %3042 = vmatprep.subr.bf16.mxu0 %v4750_v55  ;;  %6837 = vst [vmem:[#allocation12_spill] sm:$0xff] %v6124_v24  ;;  %v6838_v55 = vld [vmem:[#allocation25_spill] sm:$0xff] }
 0x12b   :  { %2930 = vmatpush1.bf16.msra.mxu1 %v5863_v49  ;;  %v4765_v49 = vcombine.low %v523_v17, %v527_v62 }
 0x12c   :  { %3043 = vmatpush1.bf16.msra.mxu0 %v4749_v7  ;;  %3145 = vmatprep.subr.bf16.mxu1 %v5867_v20  ;;  %v4774_v20 = vcombine.high %v531_v0, %v535_v34  ;;  %v543_v7 = vunpack.c.l.s8.bf16 %v6124_v24  ;;  %v6143_v24 = vld [vmem:[#allocation3 + $0x418] sm:$0xff] }
 0x12d   :  { %3044 = vmatprep.subr.bf16.mxu0 %v4758_v40  ;;  %v6131_v40 = vld [vmem:[#allocation3 + $0x3e8] sm:$0xff]  ;;  %6845 = vst [vmem:[#allocation27_spill] sm:$0xff] %v6143_v24 }
 0x12e   :  { %2932 = vmatmul.mubr.bf16.vlgmr.msra.gmra.mrb[4].mxu1 %v5861_v5  ;;  %6840 = vst [vmem:[#allocation13_spill] sm:$0xff] %v6131_v40  ;;  %v4782_v17 = vcombine.high %v539_v12, %v543_v7  ;;  %v547_v62 = vunpack.c.l.s8.bf16 %v6131_v40  ;;  %v6153_v40 = vld [vmem:[#allocation3 + $0x438] sm:$0xff] }
 0x12f   :  { %3146 = vmatpush1.bf16.msra.mxu1 %v6838_v55  ;;  %3177 = vmatprep.mubr.bf16.mxu1 %v6802_v1  ;;  %v4773_v55 = vcombine.low %v531_v0, %v535_v34  ;;  %v332_v1 = vunpack.c.h.s8.bf16 %v5909_v56  ;;  %v6847_v0 = vld [vmem:[#allocation33_spill] sm:$0xff]  ;;  %v340_v56 = vunpack.c.h.s8.bf16 %v5917_v51  ;;  %6849 = vst [vmem:[#allocation16_spill] sm:$0xff] %v6153_v40  ;;  %v348_v51 = vunpack.c.h.s8.bf16 %v5925_v13 }
 0x130   :  { %3045 = vmatpush1.bf16.msra.mxu0 %v4757_v29  ;;  %3147 = vmatprep.subr.bf16.mxu1 %v6839_v57  ;;  %v336_v29 = vunpack.c.h.s8.bf16 %v5911_v30  ;;  %v6141_v57 = vld [vmem:[#allocation3 + $0x408] sm:$0xff]  ;;  %v344_v30 = vunpack.c.h.s8.bf16 %v5919_v42  ;;  %v6850_v42 = vld [vmem:[#allocation36_spill] sm:$0xff] }
 0x131   :  { %3046 = vmatprep.subr.bf16.mxu0 %v4766_v25  ;;  %v551_v25 = vunpack.c.l.s8.bf16 %v6133_v59  ;;  %6844 = vst [vmem:[#allocation15_spill] sm:$0xff] %v6141_v57  ;;  %v6151_v59 = vld [vmem:[#allocation3 + $0x428] sm:$0xff] }
 0x132   :  { %6848 = vst [vmem:[#allocation30_spill] sm:$0xff] %v6151_v59 }
 0x133   :  { %3148 = vmatpush1.bf16.msra.mxu1 %v6842_v4  ;;  %v4781_v4 = vcombine.low %v539_v12, %v543_v7  ;;  %v4790_v34 = vcombine.high %v547_v62, %v551_v25  ;;  %v4789_v12 = vcombine.low %v547_v62, %v551_v25  ;;  %v4584_v7 = vcombine.high %v340_v56, %v344_v30  ;;  %v6853_v62 = vld [vmem:[#allocation37_spill] sm:$0xff]  ;;  %v6854_v25 = vld [vmem:[#allocation38_spill] sm:$0xff] }
 0x134   :  { %3047 = vmatpush1.bf16.msra.mxu0 %v4765_v49  ;;  %3149 = vmatprep.subr.bf16.mxu1 %v6843_v48  ;;  %v4576_v48 = vcombine.high %v332_v1, %v336_v29  ;;  %v555_v49 = vunpack.c.l.s8.bf16 %v6141_v57  ;;  %v6160_v57 = vld [vmem:[#allocation3 + $0x448] sm:$0xff]  ;;  %v356_v13 = vunpack.c.h.s8.bf16 %v6853_v62 }
 0x135   :  { %3048 = vmatprep.subr.bf16.mxu0 %v4774_v20  ;;  %v559_v20 = vunpack.c.l.s8.bf16 %v6143_v24  ;;  %v567_v24 = vunpack.c.l.s8.bf16 %v6153_v40  ;;  %6851 = vst [vmem:[#allocation17_spill] sm:$0xff] %v6160_v57  ;;  %v575_v40 = vunpack.c.l.s8.bf16 %v6162_v2 }
 0x137   :  { %3150 = vmatpush1.bf16.msra.mxu1 %v6846_v21  ;;  %v4575_v21 = vcombine.low %v332_v1, %v336_v29  ;;  %v4797_v1 = vcombine.low %v555_v49, %v559_v20 }
 0x138   :  { %3049 = vmatpush1.bf16.msra.mxu0 %v4773_v55  ;;  %3151 = vmatprep.subr.bf16.mxu1 %v6847_v0  ;;  %v352_v55 = vunpack.c.h.s8.bf16 %v6850_v42  ;;  %v563_v0 = vunpack.c.l.s8.bf16 %v6151_v59  ;;  %v571_v42 = vunpack.c.l.s8.bf16 %v6160_v57 }
 0x139   :  { %3050 = vmatprep.subr.bf16.mxu0 %v4782_v17  ;;  %v4798_v17 = vcombine.high %v555_v49, %v559_v20 }
 0x13a   :  { %v4592_v29 = vcombine.high %v348_v51, %v352_v55  ;;  %v4591_v49 = vcombine.low %v348_v51, %v352_v55  ;;  %v4814_v57 = vcombine.high %v571_v42, %v575_v40  ;;  %v6184_v51 = vld [vmem:[#allocation3 + $0x498] sm:$0xff]  ;;  %v4813_v55 = vcombine.low %v571_v42, %v575_v40 }
 0x13b   :  { %3152 = vmatpush1.bf16.msra.mxu1 %v5898_v45  ;;  %v4583_v45 = vcombine.low %v340_v56, %v344_v30  ;;  %v6174_v56 = vld [vmem:[#allocation3 + $0x478] sm:$0xff] }
 0x13c   :  { %3051 = vmatpush1.bf16.msra.mxu0 %v4781_v4  ;;  %3153 = vmatprep.subr.bf16.mxu1 %v4576_v48  ;;  %v360_v4 = vunpack.c.h.s8.bf16 %v6854_v25  ;;  %v6857_v25 = vld [vmem:[#allocation21_spill] sm:$0xff] }
 0x13d   :  { %3052 = vmatprep.subr.bf16.mxu0 %v4790_v34  ;;  %v4806_v34 = vcombine.high %v563_v0, %v567_v24  ;;  %v368_v2 = vunpack.c.h.s8.bf16 %v6857_v25  ;;  %v6192_v25 = vld [vmem:[#allocation3 + $0x4b8] sm:$0xff] }
 0x13f   :  { %3154 = vmatpush1.bf16.msra.mxu1 %v4575_v21  ;;  %v6172_v21 = vld [vmem:[#allocation3 + $0x468] sm:$0xff] }
 0x140   :  { %3053 = vmatpush1.bf16.msra.mxu0 %v4789_v12  ;;  %3155 = vmatprep.subr.bf16.mxu1 %v4584_v7  ;;  %v4805_v12 = vcombine.low %v563_v0, %v567_v24  ;;  %v4600_v7 = vcombine.high %v356_v13, %v360_v4  ;;  %v579_v3 = vunpack.c.l.s8.bf16 %v6172_v21  ;;  %v4599_v24 = vcombine.low %v356_v13, %v360_v4 }
 0x141   :  { %v6166_v48 = vpop.f32.mrb[0].mxu1  ;;  %3063 = vmatprep.subr.bf16.mxu0 %v4798_v17  ;;  %v6856_v17 = vld [vmem:[#allocation9_spill] sm:$0xff] }
 0x142   :  { %v6170_v59 = vpop.f32.mrb[1].mxu1  ;;  %v364_v62 = vunpack.c.h.s8.bf16 %v6856_v17  ;;  %v6190_v17 = vld [vmem:[#allocation3 + $0x4a8] sm:$0xff] }
 0x143   :  { %6855 = vst [vmem:[#allocation19_spill] sm:$0xff] %v6170_v59  ;;  %3055 = vmatmul.mubr.bf16.vlgmr.msra.gmra.mrb[8].mxu0 %v6825_v60  ;;  %v2691_v30 = vpop.f32.mrb[2].mxu1  ;;  %3156 = vmatpush1.bf16.msra.mxu1 %v4583_v45  ;;  %v583_v59 = vunpack.c.l.s8.bf16 %v6174_v56  ;;  %v372_v45 = vunpack.c.h.s8.bf16 %v5949_v23  ;;  %v380_v23 = vunpack.c.h.s8.bf16 %v5957_v14  ;;  %v595_v42 = vunpack.c.l.s8.bf16 %v6190_v17 }
 0x144   :  { %3064 = vmatpush1.bf16.msra.mxu0 %v4797_v1  ;;  %v2692_v20 = vpop.f32.mrb[3].mxu1  ;;  %3157 = vmatprep.subr.bf16.mxu1 %v4592_v29  ;;  %v6182_v30 = vld [vmem:[#allocation3 + $0x488] sm:$0xff]  ;;  %v4608_v0 = vcombine.high %v364_v62, %v368_v2  ;;  %v376_v1 = vunpack.c.h.s8.bf16 %v5951_v10  ;;  %v4607_v13 = vcombine.low %v364_v62, %v368_v2  ;;  %v384_v10 = vunpack.c.h.s8.bf16 %v5959_v43 }
 0x145   :  { %3065 = vmatprep.subr.bf16.mxu0 %v4806_v34  ;;  %3095 = vmatprep.mubr.bf16.mxu0 %v6826_v28  ;;  %v4822_v29 = vcombine.high %v579_v3, %v583_v59  ;;  %v587_v34 = vunpack.c.l.s8.bf16 %v6182_v30  ;;  %v591_v20 = vunpack.c.l.s8.bf16 %v6184_v51  ;;  %v4821_v40 = vcombine.low %v579_v3, %v583_v59 }
 0x146   :  { %v4616_v4 = vcombine.high %v372_v45, %v376_v1  ;;  %v4615_v2 = vcombine.low %v372_v45, %v376_v1  ;;  %v4624_v59 = vcombine.high %v380_v23, %v384_v10  ;;  %v388_v14 = vunpack.c.h.s8.bf16 %v5965_v54 }
 0x147   :  { %3158 = vmatpush1.bf16.msra.mxu1 %v4591_v49  ;;  %v599_v49 = vunpack.c.l.s8.bf16 %v6192_v25  ;;  %v4829_v3 = vcombine.low %v587_v34, %v591_v20  ;;  %v392_v43 = vunpack.c.h.s8.bf16 %v5967_v37  ;;  %v4623_v45 = vcombine.low %v380_v23, %v384_v10 }
 0x148   :  { %3066 = vmatpush1.bf16.msra.mxu0 %v4805_v12  ;;  %3159 = vmatprep.subr.bf16.mxu1 %v4600_v7  ;;  %v6198_v12 = vld [vmem:[#allocation3 + $0x4c8] sm:$0xff]  ;;  %v6200_v7 = vld [vmem:[#allocation3 + $0x4d8] sm:$0xff] }
 0x149   :  { %3067 = vmatprep.subr.bf16.mxu0 %v4814_v57  ;;  %v4830_v57 = vcombine.high %v587_v34, %v591_v20  ;;  %6858 = vst [vmem:[#allocation31_spill] sm:$0xff] %v6198_v12  ;;  %6859 = vst [vmem:[#allocation22_spill] sm:$0xff] %v6200_v7  ;;  %v4838_v62 = vcombine.high %v595_v42, %v599_v49  ;;  %v4837_v1 = vcombine.low %v595_v42, %v599_v49  ;;  %v6861_v20 = vld [vmem:[#allocation41_spill] sm:$0xff] }
 0x14a   :  { %v4632_v34 = vcombine.high %v388_v14, %v392_v43  ;;  %v396_v54 = vunpack.c.h.s8.bf16 %v6861_v20  ;;  %v4631_v23 = vcombine.low %v388_v14, %v392_v43  ;;  %v404_v49 = vunpack.c.h.s8.bf16 %v5981_v31 }
 0x14b   :  { %3160 = vmatpush1.bf16.msra.mxu1 %v4599_v24  ;;  %v603_v24 = vunpack.c.l.s8.bf16 %v6198_v12  ;;  %v6216_v12 = vld [vmem:[#allocation3 + $0x518] sm:$0xff]  ;;  %v412_v31 = vunpack.c.h.s8.bf16 %v5990_v63  ;;  %v420_v63 = vunpack.c.h.s8.bf16 %v5999_v11  ;;  %v428_v11 = vunpack.c.h.s8.bf16 %v6007_v47 }
 0x14c   :  { %3068 = vmatpush1.bf16.msra.mxu0 %v4813_v55  ;;  %3161 = vmatprep.subr.bf16.mxu1 %v4608_v0  ;;  %v607_v55 = vunpack.c.l.s8.bf16 %v6200_v7  ;;  %v6206_v0 = vld [vmem:[#allocation3 + $0x4e8] sm:$0xff]  ;;  %v623_v20 = vunpack.c.l.s8.bf16 %v6216_v12  ;;  %v436_v47 = vunpack.c.h.s8.bf16 %v6015_v22  ;;  %v444_v22 = vunpack.c.h.s8.bf16 %v6023_v8 }
 0x14d   :  { %3069 = vmatprep.subr.bf16.mxu0 %v4822_v29  ;;  %v6208_v29 = vld [vmem:[#allocation3 + $0x4f8] sm:$0xff]  ;;  %v6214_v7 = vld [vmem:[#allocation3 + $0x508] sm:$0xff] }
 0x14e   :  { %6860 = vst [vmem:[#allocation39_spill] sm:$0xff] %v6208_v29  ;;  %v4845_v10 = vcombine.low %v603_v24, %v607_v55 }
 0x14f   :  { %3162 = vmatpush1.bf16.msra.mxu1 %v4607_v13  ;;  %v6862_v13 = vld [vmem:[#allocation42_spill] sm:$0xff] }
 0x150   :  { %3070 = vmatpush1.bf16.msra.mxu0 %v4821_v40  ;;  %3163 = vmatprep.subr.bf16.mxu1 %v4616_v4  ;;  %v400_v37 = vunpack.c.h.s8.bf16 %v6862_v13  ;;  %v4846_v40 = vcombine.high %v603_v24, %v607_v55  ;;  %v611_v4 = vunpack.c.l.s8.bf16 %v6206_v0  ;;  %v6222_v13 = vld [vmem:[#allocation3 + $0x528] sm:$0xff]  ;;  %v416_v55 = vunpack.c.h.s8.bf16 %v5992_v6 }
 0x151   :  { %3071 = vmatprep.subr.bf16.mxu0 %v4830_v57  ;;  %v615_v57 = vunpack.c.l.s8.bf16 %v6208_v29  ;;  %v6224_v29 = vld [vmem:[#allocation3 + $0x538] sm:$0xff]  ;;  %v424_v6 = vunpack.c.h.s8.bf16 %v6001_v52  ;;  %v432_v52 = vunpack.c.h.s8.bf16 %v6009_v36  ;;  %v440_v36 = vunpack.c.h.s8.bf16 %v6017_v44 }
 0x152   :  { %v4640_v42 = vcombine.high %v396_v54, %v400_v37  ;;  %v4639_v14 = vcombine.low %v396_v54, %v400_v37  ;;  %v448_v44 = vunpack.c.h.s8.bf16 %v6025_v38 }
 0x153   :  { %3164 = vmatpush1.bf16.msra.mxu1 %v4615_v2  ;;  %v6863_v2 = vld [vmem:[#allocation43_spill] sm:$0xff]  ;;  %v4853_v43 = vcombine.low %v611_v4, %v615_v57 }
 0x154   :  { %3072 = vmatpush1.bf16.msra.mxu0 %v4829_v3  ;;  %3165 = vmatprep.subr.bf16.mxu1 %v4624_v59  ;;  %v408_v3 = vunpack.c.h.s8.bf16 %v6863_v2  ;;  %v4854_v59 = vcombine.high %v611_v4, %v615_v57  ;;  %v6232_v2 = vld [vmem:[#allocation3 + $0x558] sm:$0xff]  ;;  %v4656_v4 = vcombine.high %v412_v31, %v416_v55  ;;  %v4688_v38 = vcombine.high %v444_v22, %v448_v44 }
 0x155   :  { %3073 = vmatprep.subr.bf16.mxu0 %v4838_v62  ;;  %v619_v62 = vunpack.c.l.s8.bf16 %v6214_v7 }
 0x156   :  { %v4648_v24 = vcombine.high %v404_v49, %v408_v3  ;;  %v4647_v54 = vcombine.low %v404_v49, %v408_v3  ;;  %v4655_v49 = vcombine.low %v412_v31, %v416_v55  ;;  %v4663_v31 = vcombine.low %v420_v63, %v424_v6 }
 0x157   :  { %3166 = vmatpush1.bf16.msra.mxu1 %v4623_v45  ;;  %v4862_v45 = vcombine.high %v619_v62, %v623_v20  ;;  %v4861_v37 = vcombine.low %v619_v62, %v623_v20  ;;  %v4664_v62 = vcombine.high %v420_v63, %v424_v6  ;;  %v4671_v63 = vcombine.low %v428_v11, %v432_v52 }
 0x158   :  { %3074 = vmatpush1.bf16.msra.mxu0 %v4837_v1  ;;  %3167 = vmatprep.subr.bf16.mxu1 %v4632_v34  ;;  %v627_v1 = vunpack.c.l.s8.bf16 %v6222_v13  ;;  %v631_v34 = vunpack.c.l.s8.bf16 %v6224_v29 }
 0x159   :  { %3075 = vmatprep.subr.bf16.mxu0 %v4846_v40  ;;  %v6230_v40 = vld [vmem:[#allocation3 + $0x548] sm:$0xff] }
 0x15a   :  { %v4870_v57 = vcombine.high %v627_v1, %v631_v34  ;;  %v4869_v3 = vcombine.low %v627_v1, %v631_v34  ;;  %v4672_v1 = vcombine.high %v428_v11, %v432_v52  ;;  %v4679_v11 = vcombine.low %v436_v47, %v440_v36 }
 0x15b   :  { %3168 = vmatpush1.bf16.msra.mxu1 %v4631_v23  ;;  %v635_v23 = vunpack.c.l.s8.bf16 %v6230_v40  ;;  %v452_v52 = vunpack.c.h.s8.bf16 %v6031_v35  ;;  %v460_v35 = vunpack.c.h.s8.bf16 %v6041_v50 }
 0x15c   :  { %3076 = vmatpush1.bf16.msra.mxu0 %v4845_v10  ;;  %3169 = vmatprep.subr.bf16.mxu1 %v4640_v42  ;;  %v639_v10 = vunpack.c.l.s8.bf16 %v6232_v2  ;;  %v6238_v42 = vld [vmem:[#allocation3 + $0x568] sm:$0xff] }
 0x15d   :  { %3077 = vmatprep.subr.bf16.mxu0 %v4854_v59  ;;  %v6240_v59 = vld [vmem:[#allocation3 + $0x578] sm:$0xff] }
 0x15e   :  { %v4878_v20 = vcombine.high %v635_v23, %v639_v10  ;;  %v4877_v55 = vcombine.low %v635_v23, %v639_v10  ;;  %v4680_v23 = vcombine.high %v436_v47, %v440_v36 }
 0x15f   :  { %3170 = vmatpush1.bf16.msra.mxu1 %v4639_v14  ;;  %v643_v14 = vunpack.c.l.s8.bf16 %v6238_v42 }
 0x160   :  { %3078 = vmatpush1.bf16.msra.mxu0 %v4853_v43  ;;  %3171 = vmatprep.subr.bf16.mxu1 %v4648_v24  ;;  %v647_v43 = vunpack.c.l.s8.bf16 %v6240_v59  ;;  %v6246_v24 = vld [vmem:[#allocation3 + $0x588] sm:$0xff] }
 0x161   :  { %3079 = vmatprep.subr.bf16.mxu0 %v4862_v45  ;;  %v6248_v45 = vld [vmem:[#allocation3 + $0x598] sm:$0xff] }
 0x162   :  { %v4886_v34 = vcombine.high %v643_v14, %v647_v43  ;;  %v4885_v6 = vcombine.low %v643_v14, %v647_v43  ;;  %v456_v14 = vunpack.c.h.s8.bf16 %v6033_v9  ;;  %v464_v9 = vunpack.c.h.s8.bf16 %v6043_v61 }
 0x163   :  { %3172 = vmatpush1.bf16.msra.mxu1 %v4647_v54  ;;  %v651_v54 = vunpack.c.l.s8.bf16 %v6246_v24 }
 0x164   :  { %3080 = vmatpush1.bf16.msra.mxu0 %v4861_v37  ;;  %3173 = vmatprep.subr.bf16.mxu1 %v4656_v4  ;;  %v655_v37 = vunpack.c.l.s8.bf16 %v6248_v45  ;;  %v6254_v4 = vld [vmem:[#allocation3 + $0x5a8] sm:$0xff]  ;;  %v4696_v36 = vcombine.high %v452_v52, %v456_v14 }
 0x165   :  { %3081 = vmatprep.subr.bf16.mxu0 %v4870_v57  ;;  %v6256_v57 = vld [vmem:[#allocation3 + $0x5b8] sm:$0xff] }
 0x166   :  { %v4894_v10 = vcombine.high %v651_v54, %v655_v37  ;;  %v4893_v8 = vcombine.low %v651_v54, %v655_v37 }
 0x167   :  { %3174 = vmatpush1.bf16.msra.mxu1 %v4655_v49  ;;  %v659_v49 = vunpack.c.l.s8.bf16 %v6254_v4 }
 0x168   :  { %3082 = vmatpush1.bf16.msra.mxu0 %v4869_v3  ;;  %3175 = vmatprep.subr.bf16.mxu1 %v4664_v62  ;;  %v663_v3 = vunpack.c.l.s8.bf16 %v6256_v57  ;;  %v6263_v62 = vld [vmem:[#allocation3 + $0x5c8] sm:$0xff] }
 0x169   :  { %3083 = vmatprep.subr.bf16.mxu0 %v4878_v20  ;;  %v6265_v20 = vld [vmem:[#allocation3 + $0x5d8] sm:$0xff] }
 0x16a   :  { %v4902_v43 = vcombine.high %v659_v49, %v663_v3  ;;  %v4901_v47 = vcombine.low %v659_v49, %v663_v3  ;;  %v6864_v49 = vld [vmem:[#allocation44_spill] sm:$0xff] }
 0x16b   :  { %3176 = vmatpush1.bf16.msra.mxu1 %v4663_v31  ;;  %v671_v31 = vunpack.c.l.s8.bf16 %v6265_v20  ;;  %v472_v50 = vunpack.c.h.s8.bf16 %v6864_v49  ;;  %v3434_v49 = vld [vmem:[#allocation5 + $0x8] sm:$0xff] }
 0x16c   :  { %3084 = vmatpush1.bf16.msra.mxu0 %v4877_v55  ;;  %3186 = vmatprep.subr.bf16.mxu1 %v4672_v1  ;;  %v6272_v55 = vld [vmem:[#allocation3 + $0x5e8] sm:$0xff]  ;;  %v6274_v1 = vld [vmem:[#allocation3 + $0x5f8] sm:$0xff] }
 0x16d   :  { %3085 = vmatprep.subr.bf16.mxu0 %v4886_v34  ;;  %v675_v54 = vunpack.c.l.s8.bf16 %v6272_v55  ;;  %v679_v37 = vunpack.c.l.s8.bf16 %v6274_v1 }
 0x16e   :  { %3178 = vmatmul.mubr.bf16.vlgmr.msra.gmra.mrb[8].mxu1 %v5494_v58  ;;  %v667_v58 = vunpack.c.l.s8.bf16 %v6263_v62 }
 0x16f   :  { %3187 = vmatpush1.bf16.msra.mxu1 %v4671_v63  ;;  %3218 = vmatprep.mubr.bf16.mxu1 %v6786_v46  ;;  %v4687_v46 = vcombine.low %v444_v22, %v448_v44  ;;  %v294_v63 = vld [vmem:[#allocation3 + $0x608] sm:$0xff]  ;;  %v4704_v44 = vcombine.high %v460_v35, %v464_v9  ;;  %v4918_v61 = vcombine.high %v675_v54, %v679_v37 }
 0x170   :  { %3086 = vmatpush1.bf16.msra.mxu0 %v4885_v6  ;;  %3188 = vmatprep.subr.bf16.mxu1 %v4680_v23  ;;  %v4910_v34 = vcombine.high %v667_v58, %v671_v31  ;;  %v296_v6 = vld [vmem:[#allocation3 + $0x618] sm:$0xff]  ;;  %v4695_v23 = vcombine.low %v452_v52, %v456_v14  ;;  %v4909_v22 = vcombine.low %v667_v58, %v671_v31  ;;  %v683_v3 = vunpack.c.l.s8.bf16 %v294_v63 }
 0x171   :  { %3087 = vmatprep.subr.bf16.mxu0 %v4894_v10  ;;  %v468_v10 = vunpack.c.h.s8.bf16 %v6049_v41  ;;  %v476_v52 = vunpack.c.h.s8.bf16 %v6057_v53  ;;  %v480_v14 = vunpack.c.h.s8.bf16 %v6059_v15  ;;  %v684_v31 = vunpack.c.h.s8.bf16 %v294_v63 }
 0x172   :  { %v688_v41 = vunpack.c.h.s8.bf16 %v296_v6  ;;  %v496_v63 = vunpack.c.h.s8.bf16 %v6075_v26 }
 0x173   :  { %3189 = vmatpush1.bf16.msra.mxu1 %v4679_v11  ;;  %v687_v11 = vunpack.c.l.s8.bf16 %v296_v6  ;;  %v4719_v53 = vcombine.low %v476_v52, %v480_v14  ;;  %v6865_v6 = vmov 0  }
 0x174   :  { %3088 = vmatpush1.bf16.msra.mxu0 %v4893_v8  ;;  %3190 = vmatprep.subr.bf16.mxu1 %v4688_v38  ;;  %v4703_v8 = vcombine.low %v460_v35, %v464_v9  ;;  %v4917_v38 = vcombine.low %v675_v54, %v679_v37  ;;  %v484_v35 = vunpack.c.h.s8.bf16 %v6065_v27  ;;  %v488_v9 = vunpack.c.h.s8.bf16 %v6067_v39 }
 0x175   :  { %3089 = vmatprep.subr.bf16.mxu0 %v4902_v43  ;;  %v4712_v43 = vcombine.high %v468_v10, %v472_v50  ;;  %v4926_v58 = vcombine.high %v683_v3, %v687_v11  ;;  %v3311_v54 = vlaneseq  ;;  %v492_v37 = vunpack.c.h.s8.bf16 %v6073_v32  ;;  %v6300_v32 = vld [vmem:[%s6621_s2] sm:$0xff] }
 0x176   :  { %v4728_v15 = vcombine.high %v484_v35, %v488_v9  ;;  %v4727_v39 = vcombine.low %v484_v35, %v488_v9  ;;  %v6869_v35 = vld [vmem:[#allocation46_spill] sm:$0xff] }
 0x177   :  { %3191 = vmatpush1.bf16.msra.mxu1 %v4687_v46  ;;  %v4711_v46 = vcombine.low %v468_v10, %v472_v50  ;;  %v6290_v27 = vshrl.u32 %v3311_v54, 7  ;;  %v4735_v26 = vcombine.low %v492_v37, %v496_v63  ;;  %v6305_v50 = vld [vmem:[%s6622_s3] sm:$0xff] }
 0x178   :  { %3090 = vmatpush1.bf16.msra.mxu0 %v4901_v47  ;;  %3192 = vmatprep.subr.bf16.mxu1 %v4696_v36  ;;  %v4720_v47 = vcombine.high %v476_v52, %v480_v14  ;;  %v4925_v36 = vcombine.low %v683_v3, %v687_v11  ;;  %v512_v3 = vunpack.c.h.s8.bf16 %v6091_v18  ;;  %v3562_v11 = vunpack.c.l.s8.bf16 %v3434_v49  ;;  %v6866_v52 = vld [vmem:[#allocation29_spill] sm:$0xff] }
 0x179   :  { %3091 = vmatprep.subr.bf16.mxu0 %v4910_v34  ;;  %v4928_v34 = vcombine.high %v684_v31, %v688_v41  ;;  %v6295_v10 = vsub.s32 1, %v6290_v27 }
 0x17b   :  { %3193 = vmatpush1.bf16.msra.mxu1 %v4695_v23  ;;  %v4736_v23 = vcombine.high %v492_v37, %v496_v63 }
 0x17c   :  { %3092 = vmatpush1.bf16.msra.mxu0 %v4909_v22  ;;  %3194 = vmatprep.subr.bf16.mxu1 %v4704_v44  ;;  %v500_v22 = vunpack.c.h.s8.bf16 %v6081_v33  ;;  %v504_v44 = vunpack.c.h.s8.bf16 %v6083_v19  ;;  %v4927_v33 = vcombine.low %v684_v31, %v688_v41  ;;  %v508_v19 = vunpack.c.h.s8.bf16 %v6089_v16  ;;  %v6867_v16 = vld [vmem:[#allocation19_spill] sm:$0xff] }
 0x17d   :  { %3093 = vmatprep.subr.bf16.mxu0 %v4918_v61 }
 0x17e   :  { %v4744_v61 = vcombine.high %v500_v22, %v504_v44  ;;  %v4743_v31 = vcombine.low %v500_v22, %v504_v44  ;;  %v6871_v44 = vld [vmem:[#allocation10_spill] sm:$0xff] }
 0x17f   :  { %3195 = vmatpush1.bf16.msra.mxu1 %v4703_v8 }
 0x180   :  { %3094 = vmatpush1.bf16.msra.mxu0 %v4917_v38  ;;  %3196 = vmatprep.subr.bf16.mxu1 %v4712_v43  ;;  %v3318_v38 = vrot.slane %v6300_v32, %v6295_v10 }
 0x181   :  { %3104 = vmatprep.subr.bf16.mxu0 %v4926_v58  ;;  %v3368_v58 = vrot.slane %v6305_v50, %v6295_v10 }
 0x183   :  { %3096 = vmatmul.mubr.bf16.vlgmr.msra.gmra.mrb[8].mxu0 %v5861_v5  ;;  %3197 = vmatpush1.bf16.msra.mxu1 %v4711_v46  ;;  %v4752_v46 = vcombine.high %v508_v19, %v512_v3 }
 0x184   :  { %3198 = vmatprep.subr.bf16.mxu1 %v4720_v47  ;;  %3105 = vmatpush1.bf16.msra.mxu0 %v4925_v36  ;;  %v6868_v47 = vld [vmem:[#allocation45_spill] sm:$0xff] }
 0x185   :  { %3136 = vmatprep.mubr.bf16.mxu0 %v6865_v6  ;;  %3268 = vmatprep.subr.bf16.mxu0 %v4928_v34  ;;  %v516_v36 = vunpack.c.h.s8.bf16 %v6868_v47  ;;  %v3433_v34 = vld [vmem:[#allocation5] sm:$0xff] }
 0x186   :  { %v3561_v37 = vunpack.c.l.s8.bf16 %v3433_v34 }
 0x187   :  { %3199 = vmatpush1.bf16.msra.mxu1 %v4719_v53  ;;  %v4751_v53 = vcombine.low %v508_v19, %v512_v3  ;;  %v3565_v19 = vunpack.c.h.s8.bf16 %v3433_v34  ;;  %v6875_v34 = vld [vmem:[#allocation12_spill] sm:$0xff] }
 0x188   :  { %3200 = vmatprep.subr.bf16.mxu1 %v4728_v15 }
 0x18b   :  { %3201 = vmatpush1.bf16.msra.mxu1 %v4727_v39  ;;  %v3566_v39 = vunpack.c.h.s8.bf16 %v3434_v49  ;;  %v6872_v49 = vld [vmem:[#allocation20_spill] sm:$0xff] }
 0x18c   :  { %3202 = vmatprep.subr.bf16.mxu1 %v4736_v23  ;;  %v6870_v23 = vld [vmem:[#allocation47_spill] sm:$0xff] }
 0x18d   :  { %v524_v22 = vunpack.c.h.s8.bf16 %v6870_v23  ;;  %v6876_v23 = vld [vmem:[#allocation13_spill] sm:$0xff] }
 0x18e   :  { %v2810_v8 = vpop.f32.mrb[0].mxu0 }
 0x18f   :  { %v6312_v43 = vadd.f32 %v2810_v8, %v6166_v48  ;;  %4931 = vmatmul.mubr.msk.bf16.vlgmr.msra.gmra.mrb[8].mxu0 %vm2649_vm0, %v6866_v52  ;;  %v2812_v14 = vpop.f32.mrb[1].mxu0  ;;  %3203 = vmatpush1.bf16.msra.mxu1 %v4735_v26  ;;  %v520_v48 = vunpack.c.h.s8.bf16 %v6869_v35  ;;  %v528_v26 = vunpack.c.h.s8.bf16 %v6871_v44  ;;  %v6877_v44 = vld [vmem:[#allocation14_spill] sm:$0xff] }
 0x190   :  { %v4960_v41 = vadd.f32 %v2812_v14, %v6867_v16  ;;  %v2814_v18 = vpop.f32.mrb[2].mxu0  ;;  %3269 = vmatpush1.bf16.msra.mxu0 %v4927_v33  ;;  %3204 = vmatprep.subr.bf16.mxu1 %v4744_v61  ;;  %v3438_v61 = vld [vmem:[#allocation5 + $0x28] sm:$0xff]  ;;  %v6873_v14 = vld [vmem:[#allocation11_spill] sm:$0xff] }
 0x191   :  { %v2815_v9 = vpop.f32.mrb[3].mxu0  ;;  %3300 = vmatprep.mubr.bf16.mxu0 %v6865_v6  ;;  %3817 = vmatprep.subr.bf16.mxu0 %v3562_v11  ;;  %v4760_v63 = vcombine.high %v516_v36, %v520_v48  ;;  %v4759_v6 = vcombine.low %v516_v36, %v520_v48  ;;  %v3570_v16 = vunpack.c.l.s8.bf16 %v3438_v61  ;;  %v4768_v18 = vcombine.high %v524_v22, %v528_v26  ;;  %v6874_v48 = vld [vmem:[#allocation26_spill] sm:$0xff] }
 0x192   :  { %v3352_v54 = vmul.f32 %v4960_v41, %v3318_v38  ;;  %v532_v38 = vunpack.c.h.s8.bf16 %v6872_v49  ;;  %v3437_v41 = vld [vmem:[#allocation5 + $0x20] sm:$0xff]  ;;  %v540_v9 = vunpack.c.h.s8.bf16 %v6874_v48  ;;  %v6878_v49 = vld [vmem:[#allocation15_spill] sm:$0xff] }
 0x193   :  { %3205 = vmatpush1.bf16.msra.mxu1 %v4743_v31  ;;  %v3569_v36 = vunpack.c.l.s8.bf16 %v3437_v41 }
 0x194   :  { %v3402_v15 = vadd.f32 %v3368_v58, %v3352_v54  ;;  %3206 = vmatprep.subr.bf16.mxu1 %v4752_v46  ;;  %v536_v58 = vunpack.c.h.s8.bf16 %v6873_v14  ;;  %v544_v54 = vunpack.c.h.s8.bf16 %v6875_v34  ;;  %v556_v14 = vunpack.c.h.s8.bf16 %v6878_v49  ;;  %v3445_v34 = vld [vmem:[#allocation5 + $0x60] sm:$0xff] }
 0x195   :  { %v3449_v49 = vld [vmem:[#allocation5 + $0x80] sm:$0xff] }
 0x196   :  { %v3410_v33 = vmul.f32 0.2, %v3402_v15  ;;  %v6324_v8 = vpop.f32.mrb[4].mxu0  ;;  %v4776_v35 = vcombine.high %v532_v38, %v536_v58 }
 0x197   :  { %4932 = vmatmul.mubr.msk.bf16.vlgmr.msra.gmra.mrb[12].mxu0 %vm2649_vm0, %v6866_v52  ;;  %3207 = vmatpush1.bf16.msra.mxu1 %v4751_v53  ;;  %v6328_v11 = vpop.f32.mrb[5].mxu0  ;;  %v4767_v52 = vcombine.low %v524_v22, %v528_v26  ;;  %v3574_v53 = vunpack.c.h.s8.bf16 %v3438_v61  ;;  %v548_v22 = vunpack.c.h.s8.bf16 %v6876_v23  ;;  %v552_v26 = vunpack.c.h.s8.bf16 %v6877_v44  ;;  %v3450_v44 = vld [vmem:[#allocation5 + $0x88] sm:$0xff] }
 0x198   :  { %3818 = vmatpush1.bf16.msra.mxu0 %v3561_v37  ;;  %3208 = vmatprep.subr.bf16.mxu1 %v4760_v63  ;;  %v3418_v3 = vmax.f32 %v3402_v15, %v3410_v33  ;;  %v2978_v31 = vpop.f32.mrb[6].mxu0  ;;  %v3442_v15 = vld [vmem:[#allocation5 + $0x48] sm:$0xff]  ;;  %v4775_v37 = vcombine.low %v532_v38, %v536_v58  ;;  %v3573_v63 = vunpack.c.h.s8.bf16 %v3437_v41  ;;  %v6879_v38 = vld [vmem:[#allocation27_spill] sm:$0xff] }
 0x199   :  { %3819 = vmatprep.subr.bf16.mxu0 %v3566_v39  ;;  %v2979_v46 = vpop.f32.mrb[7].mxu0  ;;  %v4784_v39 = vcombine.high %v540_v9, %v544_v54  ;;  %v3578_v33 = vunpack.c.l.s8.bf16 %v3442_v15  ;;  %v4792_v61 = vcombine.high %v548_v22, %v552_v26  ;;  %v560_v58 = vunpack.c.h.s8.bf16 %v6879_v38 }
 0x19a   :  { %v6332_v47 = vpack.c.bf16 %v3418_v3, %v3418_v3  ;;  %v3582_v31 = vunpack.c.h.s8.bf16 %v3442_v15  ;;  %v4791_v41 = vcombine.low %v548_v22, %v552_v26 }
 0x19b   :  { %3209 = vmatpush1.bf16.msra.mxu1 %v4759_v6  ;;  %v3441_v6 = vld [vmem:[#allocation5 + $0x40] sm:$0xff]  ;;  %v4800_v46 = vcombine.high %v556_v14, %v560_v58 }
 0x19c   :  { %3820 = vmatpush1.bf16.msra.mxu0 %v3565_v19  ;;  %3849 = vmatprep.mubr.bf16.mxu0 %v6332_v47  ;;  %v4783_v19 = vcombine.low %v540_v9, %v544_v54  ;;  %v3577_v3 = vunpack.c.l.s8.bf16 %v3441_v6  ;;  %v4799_v54 = vcombine.low %v556_v14, %v560_v58  ;;  %v588_v58 = vunpack.c.h.s8.bf16 %v6182_v30 }
 0x19d   :  { %3821 = vmatprep.subr.bf16.mxu0 %v3570_v16  ;;  %3210 = vmatprep.subr.bf16.mxu1 %v4768_v18  ;;  %v3446_v16 = vld [vmem:[#allocation5 + $0x68] sm:$0xff]  ;;  %v3581_v18 = vunpack.c.h.s8.bf16 %v3441_v6 }
 0x19e   :  { %v3586_v9 = vunpack.c.l.s8.bf16 %v3446_v16  ;;  %v3590_v22 = vunpack.c.h.s8.bf16 %v3446_v16  ;;  %v3454_v16 = vld [vmem:[#allocation5 + $0xa8] sm:$0xff] }
 0x19f   :  { %3211 = vmatpush1.bf16.msra.mxu1 %v4767_v52  ;;  %v6880_v52 = vld [vmem:[#allocation30_spill] sm:$0xff] }
 0x1a0   :  { %3822 = vmatpush1.bf16.msra.mxu0 %v3569_v36  ;;  %3212 = vmatprep.subr.bf16.mxu1 %v4776_v35  ;;  %v564_v36 = vunpack.c.h.s8.bf16 %v6880_v52  ;;  %v6881_v35 = vld [vmem:[#allocation16_spill] sm:$0xff]  ;;  %v3602_v52 = vunpack.c.l.s8.bf16 %v3454_v16 }
 0x1a1   :  { %3823 = vmatprep.subr.bf16.mxu0 %v3574_v53  ;;  %v568_v48 = vunpack.c.h.s8.bf16 %v6881_v35  ;;  %v3585_v53 = vunpack.c.l.s8.bf16 %v3445_v34 }
 0x1a3   :  { %3213 = vmatpush1.bf16.msra.mxu1 %v4775_v37  ;;  %v4808_v15 = vcombine.high %v564_v36, %v568_v48  ;;  %v6882_v37 = vld [vmem:[#allocation17_spill] sm:$0xff]  ;;  %v4807_v26 = vcombine.low %v564_v36, %v568_v48  ;;  %v6884_v48 = vld [vmem:[#allocation31_spill] sm:$0xff] }
 0x1a4   :  { %3824 = vmatpush1.bf16.msra.mxu0 %v3573_v63  ;;  %3214 = vmatprep.subr.bf16.mxu1 %v4784_v39  ;;  %v572_v63 = vunpack.c.h.s8.bf16 %v6882_v37  ;;  %v6883_v39 = vld [vmem:[#allocation18_spill] sm:$0xff]  ;;  %v3453_v36 = vld [vmem:[#allocation5 + $0xa0] sm:$0xff] }
 0x1a5   :  { %3825 = vmatprep.subr.bf16.mxu0 %v3578_v33  ;;  %v576_v23 = vunpack.c.h.s8.bf16 %v6883_v39  ;;  %v3589_v33 = vunpack.c.h.s8.bf16 %v3445_v34  ;;  %v6885_v34 = vld [vmem:[#allocation22_spill] sm:$0xff]  ;;  %v3605_v37 = vunpack.c.h.s8.bf16 %v3453_v36  ;;  %v612_v39 = vunpack.c.h.s8.bf16 %v6206_v0 }
 0x1a7   :  { %3215 = vmatpush1.bf16.msra.mxu1 %v4783_v19  ;;  %v4816_v6 = vcombine.high %v572_v63, %v576_v23  ;;  %v580_v19 = vunpack.c.h.s8.bf16 %v6172_v21  ;;  %v4815_v14 = vcombine.low %v572_v63, %v576_v23  ;;  %v6886_v23 = vld [vmem:[#allocation39_spill] sm:$0xff] }
 0x1a8   :  { %3826 = vmatpush1.bf16.msra.mxu0 %v3577_v3  ;;  %3216 = vmatprep.subr.bf16.mxu1 %v4792_v61  ;;  %v584_v3 = vunpack.c.h.s8.bf16 %v6174_v56  ;;  %v3594_v61 = vunpack.c.l.s8.bf16 %v3450_v44  ;;  %v3597_v56 = vunpack.c.h.s8.bf16 %v3449_v49 }
 0x1a9   :  { %3827 = vmatprep.subr.bf16.mxu0 %v3582_v31  ;;  %v3598_v31 = vunpack.c.h.s8.bf16 %v3450_v44 }
 0x1aa   :  { %v4824_v38 = vcombine.high %v580_v19, %v584_v3  ;;  %v4823_v21 = vcombine.low %v580_v19, %v584_v3 }
 0x1ab   :  { %3217 = vmatpush1.bf16.msra.mxu1 %v4791_v41 }
 0x1ac   :  { %3828 = vmatpush1.bf16.msra.mxu0 %v3581_v18  ;;  %3227 = vmatprep.subr.bf16.mxu1 %v4800_v46  ;;  %v596_v18 = vunpack.c.h.s8.bf16 %v6190_v17  ;;  %v600_v46 = vunpack.c.h.s8.bf16 %v6192_v25  ;;  %v3606_v17 = vunpack.c.h.s8.bf16 %v3454_v16  ;;  %v628_v16 = vunpack.c.h.s8.bf16 %v6222_v13  ;;  %v3466_v13 = vld [vmem:[#allocation5 + $0x108] sm:$0xff] }
 0x1ad   :  { %3829 = vmatprep.subr.bf16.mxu0 %v3586_v9  ;;  %v604_v9 = vunpack.c.h.s8.bf16 %v6884_v48  ;;  %v644_v48 = vunpack.c.h.s8.bf16 %v6238_v42  ;;  %v3630_v42 = vunpack.c.h.s8.bf16 %v3466_v13 }
 0x1ae   :  { %3219 = vmatmul.mubr.bf16.vlgmr.msra.gmra.mrb[8].mxu1 %v6825_v60  ;;  %v3593_v60 = vunpack.c.l.s8.bf16 %v3449_v49  ;;  %v4840_v35 = vcombine.high %v596_v18, %v600_v46  ;;  %v4839_v25 = vcombine.low %v596_v18, %v600_v46  ;;  %v624_v49 = vunpack.c.h.s8.bf16 %v6216_v12 }
 0x1af   :  { %3228 = vmatpush1.bf16.msra.mxu1 %v4799_v54  ;;  %3259 = vmatprep.mubr.bf16.mxu1 %v6826_v28  ;;  %v592_v28 = vunpack.c.h.s8.bf16 %v6184_v51  ;;  %v3601_v51 = vunpack.c.l.s8.bf16 %v3453_v36  ;;  %v608_v54 = vunpack.c.h.s8.bf16 %v6885_v34  ;;  %v636_v46 = vunpack.c.h.s8.bf16 %v6230_v40  ;;  %v3465_v40 = vld [vmem:[#allocation5 + $0x100] sm:$0xff] }
 0x1b0   :  { %3830 = vmatpush1.bf16.msra.mxu0 %v3585_v53  ;;  %3229 = vmatprep.subr.bf16.mxu1 %v4808_v15  ;;  %v6356_v53 = vsub.s32 0, %v6290_v27  ;;  %v3458_v15 = vld [vmem:[#allocation5 + $0xc8] sm:$0xff] }
 0x1b1   :  { %3831 = vmatprep.subr.bf16.mxu0 %v3590_v22  ;;  %v4832_v41 = vcombine.high %v588_v58, %v592_v28  ;;  %v4831_v30 = vcombine.low %v588_v58, %v592_v28  ;;  %v4848_v63 = vcombine.high %v604_v9, %v608_v54  ;;  %v616_v22 = vunpack.c.h.s8.bf16 %v6886_v23 }
 0x1b2   :  { %v3314_v44 = vrot.slane %v6300_v32, %v6356_v53  ;;  %v3629_v23 = vunpack.c.h.s8.bf16 %v3465_v40 }
 0x1b3   :  { %3230 = vmatpush1.bf16.msra.mxu1 %v4807_v26  ;;  %v3610_v26 = vunpack.c.l.s8.bf16 %v3458_v15  ;;  %v4856_v3 = vcombine.high %v612_v39, %v616_v22  ;;  %v4855_v58 = vcombine.low %v612_v39, %v616_v22  ;;  %v3470_v39 = vld [vmem:[#allocation5 + $0x128] sm:$0xff] }
 0x1b4   :  { %3832 = vmatpush1.bf16.msra.mxu0 %v3589_v33  ;;  %3231 = vmatprep.subr.bf16.mxu1 %v4816_v6  ;;  %v3457_v33 = vld [vmem:[#allocation5 + $0xc0] sm:$0xff]  ;;  %v4847_v6 = vcombine.low %v604_v9, %v608_v54  ;;  %v3351_v0 = vmul.f32 %v6312_v43, %v3314_v44  ;;  %v648_v9 = vunpack.c.h.s8.bf16 %v6240_v59  ;;  %v3626_v54 = vunpack.c.l.s8.bf16 %v3466_v13  ;;  %v3482_v13 = vld [vmem:[#allocation5 + $0x188] sm:$0xff] }
 0x1b5   :  { %3833 = vmatprep.subr.bf16.mxu0 %v3594_v61  ;;  %v3609_v19 = vunpack.c.l.s8.bf16 %v3457_v33  ;;  %v620_v61 = vunpack.c.h.s8.bf16 %v6214_v7  ;;  %v3613_v28 = vunpack.c.h.s8.bf16 %v3457_v33  ;;  %v632_v7 = vunpack.c.h.s8.bf16 %v6224_v29  ;;  %v3461_v43 = vld [vmem:[#allocation5 + $0xe0] sm:$0xff] }
 0x1b6   :  { %v4887_v59 = vcombine.low %v644_v48, %v648_v9  ;;  %v660_v44 = vunpack.c.h.s8.bf16 %v6254_v4 }
 0x1b7   :  { %3232 = vmatpush1.bf16.msra.mxu1 %v4815_v14  ;;  %v3364_v14 = vrot.slane %v6305_v50, %v6356_v53  ;;  %v4872_v18 = vcombine.high %v628_v16, %v632_v7  ;;  %v4871_v29 = vcombine.low %v628_v16, %v632_v7  ;;  %v3436_v7 = vld [vmem:[#allocation5 + $0x18] sm:$0xff] }
 0x1b8   :  { %3834 = vmatpush1.bf16.msra.mxu0 %v3593_v60  ;;  %3233 = vmatprep.subr.bf16.mxu1 %v4824_v38  ;;  %v3614_v60 = vunpack.c.h.s8.bf16 %v3458_v15  ;;  %v3462_v38 = vld [vmem:[#allocation5 + $0xe8] sm:$0xff]  ;;  %v4888_v15 = vcombine.high %v644_v48, %v648_v9  ;;  %v3439_v48 = vld [vmem:[#allocation5 + $0x30] sm:$0xff]  ;;  %v3658_v9 = vunpack.c.l.s8.bf16 %v3482_v13 }
 0x1b9   :  { %3835 = vmatprep.subr.bf16.mxu0 %v3598_v31  ;;  %v4864_v31 = vcombine.high %v620_v61, %v624_v49  ;;  %v3618_v12 = vunpack.c.l.s8.bf16 %v3462_v38 }
 0x1bb   :  { %3234 = vmatpush1.bf16.msra.mxu1 %v4823_v21  ;;  %v3401_v21 = vadd.f32 %v3364_v14, %v3351_v0  ;;  %v3474_v0 = vld [vmem:[#allocation5 + $0x148] sm:$0xff] }
 0x1bc   :  { %3836 = vmatpush1.bf16.msra.mxu0 %v3597_v56  ;;  %3235 = vmatprep.subr.bf16.mxu1 %v4832_v41  ;;  %v4863_v56 = vcombine.low %v620_v61, %v624_v49  ;;  %v3617_v41 = vunpack.c.l.s8.bf16 %v3461_v43  ;;  %v672_v61 = vunpack.c.h.s8.bf16 %v6265_v20  ;;  %v3638_v49 = vunpack.c.h.s8.bf16 %v3470_v39 }
 0x1bd   :  { %3837 = vmatprep.subr.bf16.mxu0 %v3602_v52  ;;  %v640_v52 = vunpack.c.h.s8.bf16 %v6232_v2  ;;  %v3409_v36 = vmul.f32 0.2, %v3401_v21  ;;  %v3646_v16 = vunpack.c.h.s8.bf16 %v3474_v0 }
 0x1bf   :  { %3236 = vmatpush1.bf16.msra.mxu1 %v4831_v30  ;;  %v3622_v30 = vunpack.c.h.s8.bf16 %v3462_v38  ;;  %v3417_v34 = vmax.f32 %v3401_v21, %v3409_v36  ;;  %v4879_v2 = vcombine.low %v636_v46, %v640_v52  ;;  %v680_v38 = vunpack.c.h.s8.bf16 %v6274_v1  ;;  %v3478_v21 = vld [vmem:[#allocation5 + $0x168] sm:$0xff]  ;;  %v3435_v1 = vld [vmem:[#allocation5 + $0x10] sm:$0xff] }
 0x1c0   :  { %3838 = vmatpush1.bf16.msra.mxu0 %v3601_v51  ;;  %3237 = vmatprep.subr.bf16.mxu1 %v4840_v35  ;;  %v3621_v51 = vunpack.c.h.s8.bf16 %v3461_v43  ;;  %v4880_v35 = vcombine.high %v636_v46, %v640_v52  ;;  %v3568_v52 = vunpack.c.h.s8.bf16 %v3436_v7  ;;  %v3654_v36 = vunpack.c.h.s8.bf16 %v3478_v21 }
 0x1c1   :  { %3839 = vmatprep.subr.bf16.mxu0 %v3606_v17  ;;  %v3625_v17 = vunpack.c.l.s8.bf16 %v3465_v40 }
 0x1c3   :  { %3238 = vmatpush1.bf16.msra.mxu1 %v4839_v25  ;;  %v652_v25 = vunpack.c.h.s8.bf16 %v6246_v24  ;;  %v3634_v24 = vunpack.c.l.s8.bf16 %v3470_v39 }
 0x1c4   :  { %3840 = vmatpush1.bf16.msra.mxu0 %v3605_v37  ;;  %3239 = vmatprep.subr.bf16.mxu1 %v4848_v63  ;;  %v656_v37 = vunpack.c.h.s8.bf16 %v6248_v45  ;;  %v6375_v63 = vpack.c.bf16 %v3417_v34, %v3417_v34  ;;  %v3469_v45 = vld [vmem:[#allocation5 + $0x120] sm:$0xff] }
 0x1c5   :  { %3841 = vmatprep.subr.bf16.mxu0 %v3610_v26  ;;  %v664_v26 = vunpack.c.h.s8.bf16 %v6256_v57  ;;  %v3637_v57 = vunpack.c.h.s8.bf16 %v3469_v45  ;;  %v3481_v34 = vld [vmem:[#allocation5 + $0x180] sm:$0xff] }
 0x1c6   :  { %v4896_v22 = vcombine.high %v652_v25, %v656_v37  ;;  %v4895_v33 = vcombine.low %v652_v25, %v656_v37  ;;  %v3657_v40 = vunpack.c.l.s8.bf16 %v3481_v34  ;;  %v3661_v25 = vunpack.c.h.s8.bf16 %v3481_v34 }
 0x1c7   :  { %3240 = vmatpush1.bf16.msra.mxu1 %v4847_v6  ;;  %v3633_v6 = vunpack.c.l.s8.bf16 %v3469_v45  ;;  %v4903_v4 = vcombine.low %v660_v44, %v664_v26  ;;  %v6390_v45 = vsub.s32 3, %v6290_v27 }
 0x1c8   :  { %3842 = vmatpush1.bf16.msra.mxu0 %v3609_v19  ;;  %3241 = vmatprep.subr.bf16.mxu1 %v4856_v3  ;;  %v4904_v19 = vcombine.high %v660_v44, %v664_v26  ;;  %v668_v3 = vunpack.c.h.s8.bf16 %v6263_v62 }
 0x1c9   :  { %3843 = vmatprep.subr.bf16.mxu0 %v3614_v60  ;;  %v676_v60 = vunpack.c.h.s8.bf16 %v6272_v55  ;;  %v3564_v55 = vunpack.c.l.s8.bf16 %v3436_v7 }
 0x1ca   :  { %v4912_v14 = vcombine.high %v668_v3, %v672_v61  ;;  %v4911_v62 = vcombine.low %v668_v3, %v672_v61 }
 0x1cb   :  { %3242 = vmatpush1.bf16.msra.mxu1 %v4855_v58  ;;  %v3642_v58 = vunpack.c.l.s8.bf16 %v3474_v0 }
 0x1cc   :  { %3844 = vmatpush1.bf16.msra.mxu0 %v3613_v28  ;;  %3243 = vmatprep.subr.bf16.mxu1 %v4864_v31  ;;  %v3473_v28 = vld [vmem:[#allocation5 + $0x140] sm:$0xff]  ;;  %v4920_v31 = vcombine.high %v676_v60, %v680_v38 }
 0x1cd   :  { %3845 = vmatprep.subr.bf16.mxu0 %v3618_v12  ;;  %v3641_v20 = vunpack.c.l.s8.bf16 %v3473_v28  ;;  %v4919_v12 = vcombine.low %v676_v60, %v680_v38  ;;  %v3645_v43 = vunpack.c.h.s8.bf16 %v3473_v28  ;;  %v3489_v60 = vld [vmem:[#allocation5 + $0x1c0] sm:$0xff] }
 0x1ce   :  { %v3673_v7 = vunpack.c.l.s8.bf16 %v3489_v60 }
 0x1cf   :  { %3244 = vmatpush1.bf16.msra.mxu1 %v4863_v56  ;;  %v3650_v56 = vunpack.c.l.s8.bf16 %v3478_v21 }
 0x1d0   :  { %3846 = vmatpush1.bf16.msra.mxu0 %v3617_v41  ;;  %3245 = vmatprep.subr.bf16.mxu1 %v4872_v18  ;;  %v3477_v41 = vld [vmem:[#allocation5 + $0x160] sm:$0xff]  ;;  %v3563_v18 = vunpack.c.l.s8.bf16 %v3435_v1 }
 0x1d1   :  { %3847 = vmatprep.subr.bf16.mxu0 %v3622_v30  ;;  %v3649_v46 = vunpack.c.l.s8.bf16 %v3477_v41  ;;  %v3440_v30 = vld [vmem:[#allocation5 + $0x38] sm:$0xff] }
 0x1d3   :  { %3246 = vmatpush1.bf16.msra.mxu1 %v4871_v29  ;;  %v3567_v29 = vunpack.c.h.s8.bf16 %v3435_v1 }
 0x1d4   :  { %3848 = vmatpush1.bf16.msra.mxu0 %v3621_v51  ;;  %3247 = vmatprep.subr.bf16.mxu1 %v4880_v35  ;;  %v3653_v51 = vunpack.c.h.s8.bf16 %v3477_v41  ;;  %v3572_v35 = vunpack.c.l.s8.bf16 %v3440_v30  ;;  %v3677_v41 = vunpack.c.h.s8.bf16 %v3489_v60 }
 0x1d5   :  { %3858 = vmatprep.subr.bf16.mxu0 %v3626_v54  ;;  %v3571_v54 = vunpack.c.l.s8.bf16 %v3439_v48 }
 0x1d7   :  { %3850 = vmatmul.mubr.bf16.vlgmr.msra.gmra.mrb[16].mxu0 %v6375_v63  ;;  %3248 = vmatpush1.bf16.msra.mxu1 %v4879_v2  ;;  %v3576_v2 = vunpack.c.h.s8.bf16 %v3440_v30  ;;  %v3493_v30 = vld [vmem:[#allocation5 + $0x1e0] sm:$0xff] }
 0x1d8   :  { %3859 = vmatpush1.bf16.msra.mxu0 %v3625_v17  ;;  %3249 = vmatprep.subr.bf16.mxu1 %v4888_v15  ;;  %v3444_v17 = vld [vmem:[#allocation5 + $0x58] sm:$0xff]  ;;  %v3486_v15 = vld [vmem:[#allocation5 + $0x1a8] sm:$0xff] }
 0x1d9   :  { %3860 = vmatprep.subr.bf16.mxu0 %v3630_v42  ;;  %v3580_v37 = vunpack.c.l.s8.bf16 %v3444_v17  ;;  %v3443_v42 = vld [vmem:[#allocation5 + $0x50] sm:$0xff]  ;;  %v3666_v39 = vunpack.c.l.s8.bf16 %v3486_v15  ;;  %v3584_v44 = vunpack.c.h.s8.bf16 %v3444_v17  ;;  %v3670_v26 = vunpack.c.h.s8.bf16 %v3486_v15 }
 0x1da   :  { %v3455_v15 = vld [vmem:[#allocation5 + $0xb0] sm:$0xff] }
 0x1db   :  { %3250 = vmatpush1.bf16.msra.mxu1 %v4887_v59  ;;  %v3485_v59 = vld [vmem:[#allocation5 + $0x1a0] sm:$0xff] }
 0x1dc   :  { %3861 = vmatpush1.bf16.msra.mxu0 %v3629_v23  ;;  %3251 = vmatprep.subr.bf16.mxu1 %v4896_v22  ;;  %v3579_v23 = vunpack.c.l.s8.bf16 %v3443_v42  ;;  %v3665_v22 = vunpack.c.l.s8.bf16 %v3485_v59  ;;  %v3669_v3 = vunpack.c.h.s8.bf16 %v3485_v59 }
 0x1dd   :  { %3862 = vmatprep.subr.bf16.mxu0 %v3634_v24  ;;  %v6387_v24 = vsub.s32 2, %v6290_v27 }
 0x1df   :  { %3252 = vmatpush1.bf16.msra.mxu1 %v4895_v33  ;;  %v3448_v33 = vld [vmem:[#allocation5 + $0x78] sm:$0xff] }
 0x1e0   :  { %3863 = vmatpush1.bf16.msra.mxu0 %v3633_v6  ;;  %3253 = vmatprep.subr.bf16.mxu1 %v4904_v19  ;;  %v3490_v6 = vld [vmem:[#allocation5 + $0x1c8] sm:$0xff]  ;;  %v3583_v19 = vunpack.c.h.s8.bf16 %v3443_v42  ;;  %v3588_v61 = vunpack.c.l.s8.bf16 %v3448_v33  ;;  %v3592_v21 = vunpack.c.h.s8.bf16 %v3448_v33  ;;  %v3603_v42 = vunpack.c.l.s8.bf16 %v3455_v15 }
 0x1e1   :  { %3864 = vmatprep.subr.bf16.mxu0 %v3638_v49  ;;  %v3447_v49 = vld [vmem:[#allocation5 + $0x70] sm:$0xff]  ;;  %v3607_v33 = vunpack.c.h.s8.bf16 %v3455_v15  ;;  %v3518_v15 = vld [vmem:[#allocation5 + $0x2a8] sm:$0xff] }
 0x1e3   :  { %3254 = vmatpush1.bf16.msra.mxu1 %v4903_v4  ;;  %v3322_v4 = vrot.slane %v6300_v32, %v6387_v24 }
 0x1e4   :  { %3865 = vmatpush1.bf16.msra.mxu0 %v3637_v57  ;;  %3255 = vmatprep.subr.bf16.mxu1 %v4912_v14  ;;  %v3326_v57 = vrot.slane %v6300_v32, %v6390_v45  ;;  %v3674_v14 = vunpack.c.l.s8.bf16 %v3490_v6  ;;  %v3372_v32 = vrot.slane %v6305_v50, %v6387_v24 }
 0x1e5   :  { %3866 = vmatprep.subr.bf16.mxu0 %v3642_v58 }
 0x1e7   :  { %3256 = vmatpush1.bf16.msra.mxu1 %v4911_v62  ;;  %v3376_v62 = vrot.slane %v6305_v50, %v6390_v45 }
 0x1e8   :  { %3867 = vmatpush1.bf16.msra.mxu0 %v3641_v20  ;;  %3257 = vmatprep.subr.bf16.mxu1 %v4920_v31  ;;  %v3587_v31 = vunpack.c.l.s8.bf16 %v3447_v49 }
 0x1e9   :  { %3868 = vmatprep.subr.bf16.mxu0 %v3646_v16 }
 0x1eb   :  { %3258 = vmatpush1.bf16.msra.mxu1 %v4919_v12 }
 0x1ec   :  { %3869 = vmatpush1.bf16.msra.mxu0 %v3645_v43  ;;  %3981 = vmatprep.subr.bf16.mxu1 %v3564_v55  ;;  %v3452_v55 = vld [vmem:[#allocation5 + $0x98] sm:$0xff] }
 0x1ed   :  { %3870 = vmatprep.subr.bf16.mxu0 %v3650_v56  ;;  %v3591_v56 = vunpack.c.h.s8.bf16 %v3447_v49  ;;  %v3501_v49 = vld [vmem:[#allocation5 + $0x220] sm:$0xff] }
 0x1ee   :  { %3260 = vmatmul.mubr.bf16.vlgmr.msra.gmra.mrb[8].mxu1 %v5861_v5  ;;  %v3662_v5 = vunpack.c.h.s8.bf16 %v3482_v13 }
 0x1ef   :  { %3982 = vmatpush1.bf16.msra.mxu1 %v3563_v18  ;;  %4013 = vmatprep.mubr.bf16.mxu1 %v6332_v47  ;;  %v3575_v47 = vunpack.c.h.s8.bf16 %v3439_v48  ;;  %v3596_v18 = vunpack.c.l.s8.bf16 %v3452_v55 }
 0x1f0   :  { %3871 = vmatpush1.bf16.msra.mxu0 %v3649_v46  ;;  %3983 = vmatprep.subr.bf16.mxu1 %v3568_v52  ;;  %v3451_v46 = vld [vmem:[#allocation5 + $0x90] sm:$0xff] }
 0x1f1   :  { %3872 = vmatprep.subr.bf16.mxu0 %v3654_v36 }
 0x1f3   :  { %3984 = vmatpush1.bf16.msra.mxu1 %v3567_v29  ;;  %v3595_v29 = vunpack.c.l.s8.bf16 %v3451_v46 }
 0x1f4   :  { %3873 = vmatpush1.bf16.msra.mxu0 %v3653_v51  ;;  %3985 = vmatprep.subr.bf16.mxu1 %v3572_v35  ;;  %v3681_v51 = vunpack.c.l.s8.bf16 %v3493_v30  ;;  %v3600_v35 = vunpack.c.h.s8.bf16 %v3452_v55 }
 0x1f5   :  { %3874 = vmatprep.subr.bf16.mxu0 %v3658_v9 }
 0x1f7   :  { %3986 = vmatpush1.bf16.msra.mxu1 %v3571_v54  ;;  %v3456_v54 = vld [vmem:[#allocation5 + $0xb8] sm:$0xff] }
 0x1f8   :  { %3875 = vmatpush1.bf16.msra.mxu0 %v3657_v40  ;;  %3987 = vmatprep.subr.bf16.mxu1 %v3576_v2  ;;  %v3498_v40 = vld [vmem:[#allocation5 + $0x208] sm:$0xff]  ;;  %v3599_v2 = vunpack.c.h.s8.bf16 %v3451_v46  ;;  %v3604_v17 = vunpack.c.l.s8.bf16 %v3456_v54 }
 0x1f9   :  { %3876 = vmatprep.subr.bf16.mxu0 %v3662_v5  ;;  %v3685_v5 = vunpack.c.h.s8.bf16 %v3493_v30  ;;  %v3472_v30 = vld [vmem:[#allocation5 + $0x138] sm:$0xff] }
 0x1fb   :  { %3988 = vmatpush1.bf16.msra.mxu1 %v3575_v47 }
 0x1fc   :  { %3877 = vmatpush1.bf16.msra.mxu0 %v3661_v25  ;;  %3989 = vmatprep.subr.bf16.mxu1 %v3580_v37  ;;  %v3690_v25 = vunpack.c.l.s8.bf16 %v3498_v40  ;;  %v3497_v37 = vld [vmem:[#allocation5 + $0x200] sm:$0xff] }
 0x1fd   :  { %3878 = vmatprep.subr.bf16.mxu0 %v3666_v39  ;;  %v3608_v39 = vunpack.c.h.s8.bf16 %v3456_v54  ;;  %v3689_v59 = vunpack.c.l.s8.bf16 %v3497_v37  ;;  %v3513_v54 = vld [vmem:[#allocation5 + $0x280] sm:$0xff] }
 0x1ff   :  { %3990 = vmatpush1.bf16.msra.mxu1 %v3579_v23 }
 0x200   :  { %3879 = vmatpush1.bf16.msra.mxu0 %v3665_v22  ;;  %3991 = vmatprep.subr.bf16.mxu1 %v3584_v44  ;;  %v3460_v22 = vld [vmem:[#allocation5 + $0xd8] sm:$0xff]  ;;  %v3694_v44 = vunpack.c.h.s8.bf16 %v3498_v40 }
 0x201   :  { %3880 = vmatprep.subr.bf16.mxu0 %v3670_v26  ;;  %v2933_v0 = vpop.f32.mrb[4].mxu1  ;;  %v3502_v26 = vld [vmem:[#allocation5 + $0x228] sm:$0xff] }
 0x202   :  { %v4961_v38 = vadd.f32 %v6324_v8, %v2933_v0  ;;  %v2935_v58 = vpop.f32.mrb[5].mxu1  ;;  %v3678_v8 = vunpack.c.h.s8.bf16 %v3490_v6  ;;  %v3612_v6 = vunpack.c.l.s8.bf16 %v3460_v22  ;;  %v3702_v60 = vunpack.c.h.s8.bf16 %v3502_v26 }
 0x203   :  { %v4962_v28 = vadd.f32 %v6328_v11, %v2935_v58  ;;  %v2937_v20 = vpop.f32.mrb[6].mxu1  ;;  %3992 = vmatpush1.bf16.msra.mxu1 %v3583_v19  ;;  %v3494_v11 = vld [vmem:[#allocation5 + $0x1e8] sm:$0xff]  ;;  %v3459_v19 = vld [vmem:[#allocation5 + $0xd0] sm:$0xff] }
 0x204   :  { %3881 = vmatpush1.bf16.msra.mxu0 %v3669_v3  ;;  %v2938_v16 = vpop.f32.mrb[7].mxu1  ;;  %3993 = vmatprep.subr.bf16.mxu1 %v3588_v61  ;;  %v3353_v12 = vmul.f32 %v4961_v38, %v3322_v4  ;;  %v3682_v36 = vunpack.c.l.s8.bf16 %v3494_v11  ;;  %v3686_v34 = vunpack.c.h.s8.bf16 %v3494_v11  ;;  %v3693_v3 = vunpack.c.h.s8.bf16 %v3497_v37  ;;  %v3506_v38 = vld [vmem:[#allocation5 + $0x248] sm:$0xff] }
 0x205   :  { %v3354_v43 = vmul.f32 %v4962_v28, %v3326_v57  ;;  %3882 = vmatprep.subr.bf16.mxu0 %v3674_v14  ;;  %v3698_v61 = vunpack.c.l.s8.bf16 %v3502_v26  ;;  %v3611_v0 = vunpack.c.l.s8.bf16 %v3459_v19  ;;  %v3616_v4 = vunpack.c.h.s8.bf16 %v3460_v22  ;;  %v3464_v14 = vld [vmem:[#allocation5 + $0xf8] sm:$0xff]  ;;  %v3505_v16 = vld [vmem:[#allocation5 + $0x240] sm:$0xff] }
 0x206   :  { %v3403_v52 = vadd.f32 %v3372_v32, %v3353_v12  ;;  %v3697_v57 = vunpack.c.l.s8.bf16 %v3501_v49  ;;  %v3615_v58 = vunpack.c.h.s8.bf16 %v3459_v19  ;;  %v3620_v28 = vunpack.c.l.s8.bf16 %v3464_v14  ;;  %v3468_v32 = vld [vmem:[#allocation5 + $0x118] sm:$0xff] }
 0x207   :  { %v3404_v1 = vadd.f32 %v3376_v62, %v3354_v43  ;;  %3994 = vmatpush1.bf16.msra.mxu1 %v3587_v31  ;;  %v3463_v62 = vld [vmem:[#allocation5 + $0xf0] sm:$0xff]  ;;  %v3701_v20 = vunpack.c.h.s8.bf16 %v3501_v49  ;;  %v3706_v31 = vunpack.c.l.s8.bf16 %v3506_v38  ;;  %v3705_v12 = vunpack.c.l.s8.bf16 %v3505_v16  ;;  %v3480_v26 = vld [vmem:[#allocation5 + $0x178] sm:$0xff] }
 0x208   :  { %3883 = vmatpush1.bf16.msra.mxu0 %v3673_v7  ;;  %3995 = vmatprep.subr.bf16.mxu1 %v3592_v21  ;;  %v3411_v48 = vmul.f32 0.2, %v3403_v52  ;;  %v3619_v7 = vunpack.c.l.s8.bf16 %v3463_v62  ;;  %v3624_v21 = vunpack.c.h.s8.bf16 %v3464_v14  ;;  %v3710_v43 = vunpack.c.h.s8.bf16 %v3506_v38  ;;  %v3484_v38 = vld [vmem:[#allocation5 + $0x198] sm:$0xff] }
 0x209   :  { %3884 = vmatprep.subr.bf16.mxu0 %v3678_v8  ;;  %v3412_v13 = vmul.f32 0.2, %v3404_v1  ;;  %v3510_v8 = vld [vmem:[#allocation5 + $0x268] sm:$0xff]  ;;  %v3623_v55 = vunpack.c.h.s8.bf16 %v3463_v62  ;;  %v3628_v11 = vunpack.c.l.s8.bf16 %v3468_v32  ;;  %v3725_v37 = vunpack.c.h.s8.bf16 %v3513_v54 }
 0x20a   :  { %v3419_v47 = vmax.f32 %v3403_v52, %v3411_v48  ;;  %v3632_v52 = vunpack.c.h.s8.bf16 %v3468_v32  ;;  %v3656_v14 = vunpack.c.h.s8.bf16 %v3480_v26  ;;  %v3664_v32 = vunpack.c.h.s8.bf16 %v3484_v38 }
 0x20b   :  { %3996 = vmatpush1.bf16.msra.mxu1 %v3591_v56  ;;  %v3420_v50 = vmax.f32 %v3404_v1, %v3412_v13  ;;  %v3467_v1 = vld [vmem:[#allocation5 + $0x110] sm:$0xff]  ;;  %v3709_v56 = vunpack.c.h.s8.bf16 %v3505_v16  ;;  %v3718_v13 = vunpack.c.h.s8.bf16 %v3510_v8 }
 0x20c   :  { %3885 = vmatpush1.bf16.msra.mxu0 %v3677_v41  ;;  %3997 = vmatprep.subr.bf16.mxu1 %v3596_v18  ;;  %v6405_v23 = vpack.c.bf16 %v3419_v47, %v3419_v47  ;;  %v3714_v41 = vunpack.c.l.s8.bf16 %v3510_v8  ;;  %v3509_v18 = vld [vmem:[#allocation5 + $0x260] sm:$0xff]  ;;  %v3627_v46 = vunpack.c.l.s8.bf16 %v3467_v1  ;;  %v3488_v8 = vld [vmem:[#allocation5 + $0x1b8] sm:$0xff] }
 0x20d   :  { %3886 = vmatprep.subr.bf16.mxu0 %v3682_v36  ;;  %v6402_v9 = vpack.c.bf16 %v3420_v50, %v3420_v50  ;;  %v3713_v36 = vunpack.c.l.s8.bf16 %v3509_v18  ;;  %v3514_v50 = vld [vmem:[#allocation5 + $0x288] sm:$0xff]  ;;  %v3717_v48 = vunpack.c.h.s8.bf16 %v3509_v18 }
 0x20f   :  { %3890 = vmatprep.mubr.bf16.mxu0 %v6402_v9  ;;  %3998 = vmatpush1.bf16.msra.mxu1 %v3595_v29  ;;  %v3631_v29 = vunpack.c.h.s8.bf16 %v3467_v1 }
 0x210   :  { %3887 = vmatpush1.bf16.msra.mxu0 %v3681_v51  ;;  %3999 = vmatprep.subr.bf16.mxu1 %v3600_v35  ;;  %v3636_v51 = vunpack.c.l.s8.bf16 %v3472_v30  ;;  %v3471_v35 = vld [vmem:[#allocation5 + $0x130] sm:$0xff] }
 0x211   :  { %3888 = vmatprep.subr.bf16.mxu0 %v3686_v34  ;;  %v3722_v34 = vunpack.c.l.s8.bf16 %v3514_v50  ;;  %v3635_v40 = vunpack.c.l.s8.bf16 %v3471_v35 }
 0x213   :  { %4000 = vmatpush1.bf16.msra.mxu1 %v3599_v2  ;;  %v3640_v2 = vunpack.c.h.s8.bf16 %v3472_v30  ;;  %v3492_v30 = vld [vmem:[#allocation5 + $0x1d8] sm:$0xff] }
 0x214   :  { %3889 = vmatpush1.bf16.msra.mxu0 %v3685_v5  ;;  %4001 = vmatprep.subr.bf16.mxu1 %v3604_v17  ;;  %v3721_v5 = vunpack.c.l.s8.bf16 %v3513_v54  ;;  %v3726_v17 = vunpack.c.h.s8.bf16 %v3514_v50  ;;  %v3676_v50 = vunpack.c.l.s8.bf16 %v3492_v30  ;;  %v3496_v54 = vld [vmem:[#allocation5 + $0x1f8] sm:$0xff] }
 0x215   :  { %3899 = vmatprep.subr.bf16.mxu0 %v3690_v25  ;;  %v3475_v25 = vld [vmem:[#allocation5 + $0x150] sm:$0xff] }
 0x216   :  { %v3647_v19 = vunpack.c.h.s8.bf16 %v3475_v25 }
 0x217   :  { %3891 = vmatmul.mubr.bf16.vlgmr.msra.gmra.mrb[16].mxu0 %v6405_v23  ;;  %4002 = vmatpush1.bf16.msra.mxu1 %v3603_v42  ;;  %v3730_v42 = vunpack.c.l.s8.bf16 %v3518_v15 }
 0x218   :  { %4003 = vmatprep.subr.bf16.mxu1 %v3608_v39  ;;  %3900 = vmatpush1.bf16.msra.mxu0 %v3689_v59  ;;  %v3517_v39 = vld [vmem:[#allocation5 + $0x2a0] sm:$0xff]  ;;  %v3643_v59 = vunpack.c.l.s8.bf16 %v3475_v25 }
 0x219   :  { %3901 = vmatprep.subr.bf16.mxu0 %v3694_v44  ;;  %v3729_v44 = vunpack.c.l.s8.bf16 %v3517_v39  ;;  %v3733_v49 = vunpack.c.h.s8.bf16 %v3517_v39 }
 0x21b   :  { %4004 = vmatpush1.bf16.msra.mxu1 %v3607_v33  ;;  %v3734_v33 = vunpack.c.h.s8.bf16 %v3518_v15  ;;  %v3495_v15 = vld [vmem:[#allocation5 + $0x1f0] sm:$0xff] }
 0x21c   :  { %4005 = vmatprep.subr.bf16.mxu1 %v3612_v6  ;;  %3902 = vmatpush1.bf16.msra.mxu0 %v3693_v3  ;;  %v3522_v6 = vld [vmem:[#allocation5 + $0x2c8] sm:$0xff]  ;;  %v3652_v3 = vunpack.c.l.s8.bf16 %v3480_v26  ;;  %v3688_v26 = vunpack.c.h.s8.bf16 %v3496_v54 }
 0x21d   :  { %3903 = vmatprep.subr.bf16.mxu0 %v3698_v61  ;;  %v3479_v61 = vld [vmem:[#allocation5 + $0x170] sm:$0xff] }
 0x21e   :  { %v3655_v62 = vunpack.c.h.s8.bf16 %v3479_v61 }
 0x21f   :  { %4006 = vmatpush1.bf16.msra.mxu1 %v3611_v0  ;;  %v3738_v0 = vunpack.c.l.s8.bf16 %v3522_v6 }
 0x220   :  { %4007 = vmatprep.subr.bf16.mxu1 %v3616_v4  ;;  %3904 = vmatpush1.bf16.msra.mxu0 %v3697_v57  ;;  %v3521_v4 = vld [vmem:[#allocation5 + $0x2c0] sm:$0xff]  ;;  %v3651_v57 = vunpack.c.l.s8.bf16 %v3479_v61 }
 0x221   :  { %3905 = vmatprep.subr.bf16.mxu0 %v3702_v60  ;;  %v3737_v60 = vunpack.c.l.s8.bf16 %v3521_v4  ;;  %v3741_v16 = vunpack.c.h.s8.bf16 %v3521_v4 }
 0x223   :  { %4008 = vmatpush1.bf16.msra.mxu1 %v3615_v58  ;;  %v3742_v58 = vunpack.c.h.s8.bf16 %v3522_v6 }
 0x224   :  { %4009 = vmatprep.subr.bf16.mxu1 %v3620_v28  ;;  %3906 = vmatpush1.bf16.msra.mxu0 %v3701_v20  ;;  %v3526_v28 = vld [vmem:[#allocation5 + $0x2e8] sm:$0xff]  ;;  %v3660_v20 = vunpack.c.l.s8.bf16 %v3484_v38  ;;  %v3529_v38 = vld [vmem:[#allocation5 + $0x300] sm:$0xff] }
 0x225   :  { %3907 = vmatprep.subr.bf16.mxu0 %v3706_v31  ;;  %v3483_v31 = vld [vmem:[#allocation5 + $0x190] sm:$0xff] }
 0x226   :  { %v3663_v1 = vunpack.c.h.s8.bf16 %v3483_v31 }
 0x227   :  { %4010 = vmatpush1.bf16.msra.mxu1 %v3619_v7  ;;  %v3746_v7 = vunpack.c.l.s8.bf16 %v3526_v28 }
 0x228   :  { %4011 = vmatprep.subr.bf16.mxu1 %v3624_v21  ;;  %3908 = vmatpush1.bf16.msra.mxu0 %v3705_v12  ;;  %v3525_v21 = vld [vmem:[#allocation5 + $0x2e0] sm:$0xff]  ;;  %v3659_v12 = vunpack.c.l.s8.bf16 %v3483_v31 }
 0x229   :  { %3909 = vmatprep.subr.bf16.mxu0 %v3710_v43  ;;  %v3745_v43 = vunpack.c.l.s8.bf16 %v3525_v21  ;;  %v3749_v18 = vunpack.c.h.s8.bf16 %v3525_v21  ;;  %v3504_v21 = vld [vmem:[#allocation5 + $0x238] sm:$0xff] }
 0x22b   :  { %4012 = vmatpush1.bf16.msra.mxu1 %v3623_v55  ;;  %v3750_v55 = vunpack.c.h.s8.bf16 %v3526_v28 }
 0x22c   :  { %4022 = vmatprep.subr.bf16.mxu1 %v3628_v11  ;;  %3910 = vmatpush1.bf16.msra.mxu0 %v3709_v56  ;;  %v6410_v11 = vld [vmem:[#allocation5 + $0x308] sm:$0xff]  ;;  %v3668_v56 = vunpack.c.l.s8.bf16 %v3488_v8 }
 0x22d   :  { %3911 = vmatprep.subr.bf16.mxu0 %v3714_v41  ;;  %v3487_v41 = vld [vmem:[#allocation5 + $0x1b0] sm:$0xff] }
 0x22e   :  { %4014 = vmatmul.mubr.bf16.vlgmr.msra.gmra.mrb[12].mxu1 %v6375_v63  ;;  %v3476_v63 = vld [vmem:[#allocation5 + $0x158] sm:$0xff] }
 0x22f   :  { %4023 = vmatpush1.bf16.msra.mxu1 %v3627_v46  ;;  %4054 = vmatprep.mubr.bf16.mxu1 %v6402_v9  ;;  %v3639_v9 = vunpack.c.h.s8.bf16 %v3471_v35  ;;  %v3644_v47 = vunpack.c.l.s8.bf16 %v3476_v63  ;;  %v3648_v22 = vunpack.c.h.s8.bf16 %v3476_v63  ;;  %v3754_v46 = vunpack.c.l.s8.bf16 %v6410_v11 }
 0x230   :  { %4024 = vmatprep.subr.bf16.mxu1 %v3632_v52  ;;  %3912 = vmatpush1.bf16.msra.mxu0 %v3713_v36  ;;  %v3667_v52 = vunpack.c.l.s8.bf16 %v3487_v41  ;;  %v3672_v36 = vunpack.c.h.s8.bf16 %v3488_v8  ;;  %v3329_v35 = vsub.s32 4, %v6290_v27 }
 0x231   :  { %3913 = vmatprep.subr.bf16.mxu0 %v3718_v13  ;;  %v3671_v13 = vunpack.c.h.s8.bf16 %v3487_v41  ;;  %v3757_v41 = vunpack.c.h.s8.bf16 %v3529_v38 }
 0x233   :  { %4025 = vmatpush1.bf16.msra.mxu1 %v3631_v29  ;;  %v3491_v29 = vld [vmem:[#allocation5 + $0x1d0] sm:$0xff] }
 0x234   :  { %4026 = vmatprep.subr.bf16.mxu1 %v3636_v51  ;;  %3914 = vmatpush1.bf16.msra.mxu0 %v3717_v48  ;;  %v3675_v51 = vunpack.c.l.s8.bf16 %v3491_v29  ;;  %v3333_v48 = vsub.s32 5, %v6290_v27 }
 0x235   :  { %3915 = vmatprep.subr.bf16.mxu0 %v3722_v34  ;;  %v3680_v34 = vunpack.c.h.s8.bf16 %v3492_v30 }
 0x237   :  { %4027 = vmatpush1.bf16.msra.mxu1 %v3635_v40  ;;  %v6418_v40 = vld [vmem:[%s6621_s2] sm:$0xff] }
 0x238   :  { %4028 = vmatprep.subr.bf16.mxu1 %v3640_v2  ;;  %3916 = vmatpush1.bf16.msra.mxu0 %v3721_v5  ;;  %v3330_v2 = vrot.slane %v6418_v40, %v3329_v35  ;;  %v3679_v5 = vunpack.c.h.s8.bf16 %v3491_v29  ;;  %v3334_v63 = vrot.slane %v6418_v40, %v3333_v48 }
 0x239   :  { %3917 = vmatprep.subr.bf16.mxu0 %v3726_v17  ;;  %v3684_v17 = vunpack.c.l.s8.bf16 %v3496_v54 }
 0x23b   :  { %4029 = vmatpush1.bf16.msra.mxu1 %v3639_v9  ;;  %v6425_v9 = vld [vmem:[%s6622_s3] sm:$0xff] }
 0x23c   :  { %4030 = vmatprep.subr.bf16.mxu1 %v3644_v47  ;;  %3918 = vmatpush1.bf16.msra.mxu0 %v3725_v37  ;;  %v3380_v47 = vrot.slane %v6425_v9, %v3329_v35  ;;  %v3384_v37 = vrot.slane %v6425_v9, %v3333_v48 }
 0x23d   :  { %3919 = vmatprep.subr.bf16.mxu0 %v3730_v42 }
 0x23f   :  { %4031 = vmatpush1.bf16.msra.mxu1 %v3643_v59  ;;  %v3683_v59 = vunpack.c.l.s8.bf16 %v3495_v15 }
 0x240   :  { %4032 = vmatprep.subr.bf16.mxu1 %v3648_v22  ;;  %3920 = vmatpush1.bf16.msra.mxu0 %v3729_v44 }
 0x241   :  { %3921 = vmatprep.subr.bf16.mxu0 %v3734_v33 }
 0x243   :  { %4033 = vmatpush1.bf16.msra.mxu1 %v3647_v19  ;;  %v3500_v19 = vld [vmem:[#allocation5 + $0x218] sm:$0xff] }
 0x244   :  { %4034 = vmatprep.subr.bf16.mxu1 %v3652_v3  ;;  %3922 = vmatpush1.bf16.msra.mxu0 %v3733_v49  ;;  %v3687_v49 = vunpack.c.h.s8.bf16 %v3495_v15  ;;  %v3692_v4 = vunpack.c.l.s8.bf16 %v3500_v19  ;;  %v3696_v31 = vunpack.c.h.s8.bf16 %v3500_v19 }
 0x245   :  { %3923 = vmatprep.subr.bf16.mxu0 %v3738_v0 }
 0x247   :  { %4035 = vmatpush1.bf16.msra.mxu1 %v3651_v57  ;;  %v3499_v57 = vld [vmem:[#allocation5 + $0x210] sm:$0xff] }
 0x248   :  { %4036 = vmatprep.subr.bf16.mxu1 %v3656_v14  ;;  %3924 = vmatpush1.bf16.msra.mxu0 %v3737_v60  ;;  %v3691_v28 = vunpack.c.l.s8.bf16 %v3499_v57  ;;  %v3695_v8 = vunpack.c.h.s8.bf16 %v3499_v57  ;;  %v3545_v57 = vld [vmem:[#allocation5 + $0x380] sm:$0xff] }
 0x249   :  { %3925 = vmatprep.subr.bf16.mxu0 %v3742_v58 }
 0x24b   :  { %4037 = vmatpush1.bf16.msra.mxu1 %v3655_v62 }
 0x24c   :  { %4038 = vmatprep.subr.bf16.mxu1 %v3660_v20  ;;  %3926 = vmatpush1.bf16.msra.mxu0 %v3741_v16 }
 0x24d   :  { %3927 = vmatprep.subr.bf16.mxu0 %v3746_v7 }
 0x24f   :  { %4039 = vmatpush1.bf16.msra.mxu1 %v3659_v12  ;;  %v3753_v12 = vunpack.c.l.s8.bf16 %v3529_v38  ;;  %v3520_v38 = vld [vmem:[#allocation5 + $0x2b8] sm:$0xff] }
 0x250   :  { %4040 = vmatprep.subr.bf16.mxu1 %v3664_v32  ;;  %3928 = vmatpush1.bf16.msra.mxu0 %v3745_v43  ;;  %v3758_v43 = vunpack.c.h.s8.bf16 %v6410_v11 }
 0x251   :  { %3929 = vmatprep.subr.bf16.mxu0 %v3750_v55  ;;  %v3534_v55 = vld [vmem:[#allocation5 + $0x328] sm:$0xff] }
 0x252   :  { %v3766_v30 = vunpack.c.h.s8.bf16 %v3534_v55 }
 0x253   :  { %4041 = vmatpush1.bf16.msra.mxu1 %v3663_v1  ;;  %v3700_v1 = vunpack.c.l.s8.bf16 %v3504_v21 }
 0x254   :  { %4042 = vmatprep.subr.bf16.mxu1 %v3668_v56  ;;  %3930 = vmatpush1.bf16.msra.mxu0 %v3749_v18  ;;  %v3503_v56 = vld [vmem:[#allocation5 + $0x230] sm:$0xff]  ;;  %v3762_v18 = vunpack.c.l.s8.bf16 %v3534_v55 }
 0x255   :  { %3940 = vmatprep.subr.bf16.mxu0 %v3754_v46  ;;  %v3533_v46 = vld [vmem:[#allocation5 + $0x320] sm:$0xff] }
 0x256   :  { %v3761_v11 = vunpack.c.l.s8.bf16 %v3533_v46  ;;  %v3765_v35 = vunpack.c.h.s8.bf16 %v3533_v46 }
 0x257   :  { %4043 = vmatpush1.bf16.msra.mxu1 %v3667_v52  ;;  %v3699_v52 = vunpack.c.l.s8.bf16 %v3503_v56 }
 0x258   :  { %4044 = vmatprep.subr.bf16.mxu1 %v3672_v36  ;;  %v3508_v36 = vld [vmem:[#allocation5 + $0x258] sm:$0xff] }
 0x259   :  { %v3708_v29 = vunpack.c.l.s8.bf16 %v3508_v36 }
 0x25b   :  { %4045 = vmatpush1.bf16.msra.mxu1 %v3671_v13  ;;  %v3703_v13 = vunpack.c.h.s8.bf16 %v3503_v56  ;;  %v3524_v56 = vld [vmem:[#allocation5 + $0x2d8] sm:$0xff] }
 0x25c   :  { %4046 = vmatprep.subr.bf16.mxu1 %v3676_v50  ;;  %v3538_v50 = vld [vmem:[#allocation5 + $0x348] sm:$0xff] }
 0x25d   :  { %v3770_v48 = vunpack.c.l.s8.bf16 %v3538_v50 }
 0x25f   :  { %4047 = vmatpush1.bf16.msra.mxu1 %v3675_v51  ;;  %v3507_v51 = vld [vmem:[#allocation5 + $0x250] sm:$0xff] }
 0x260   :  { %4048 = vmatprep.subr.bf16.mxu1 %v3680_v34  ;;  %v3537_v34 = vld [vmem:[#allocation5 + $0x340] sm:$0xff]  ;;  %v3707_v54 = vunpack.c.l.s8.bf16 %v3507_v51  ;;  %v3711_v15 = vunpack.c.h.s8.bf16 %v3507_v51  ;;  %v3528_v51 = vld [vmem:[#allocation5 + $0x2f8] sm:$0xff] }
 0x262   :  { %v3138_v25 = vpop.f32.mrb[8].mxu0 }
 0x263   :  { %v3355_v42 = vmul.f32 %v3330_v2, %v3138_v25  ;;  %v3140_v39 = vpop.f32.mrb[9].mxu0  ;;  %4049 = vmatpush1.bf16.msra.mxu1 %v3679_v5  ;;  %v3712_v2 = vunpack.c.h.s8.bf16 %v3508_v36  ;;  %v3512_v5 = vld [vmem:[#allocation5 + $0x278] sm:$0xff]  ;;  %v3523_v36 = vld [vmem:[#allocation5 + $0x2d0] sm:$0xff] }
 0x264   :  { %v3356_v22 = vmul.f32 %v3334_v63, %v3140_v39  ;;  %v3142_v44 = vpop.f32.mrb[10].mxu0  ;;  %4050 = vmatprep.subr.bf16.mxu1 %v3684_v17  ;;  %v3769_v63 = vunpack.c.l.s8.bf16 %v3537_v34  ;;  %v3774_v17 = vunpack.c.h.s8.bf16 %v3538_v50  ;;  %v3716_v25 = vunpack.c.l.s8.bf16 %v3512_v5 }
 0x265   :  { %v3405_v33 = vadd.f32 %v3380_v47, %v3355_v42  ;;  %v3143_v6 = vpop.f32.mrb[11].mxu0  ;;  %v3542_v47 = vld [vmem:[#allocation5 + $0x368] sm:$0xff]  ;;  %v3773_v42 = vunpack.c.h.s8.bf16 %v3537_v34  ;;  %v3720_v44 = vunpack.c.h.s8.bf16 %v3512_v5  ;;  %v3739_v50 = vunpack.c.l.s8.bf16 %v3523_v36  ;;  %v3527_v5 = vld [vmem:[#allocation5 + $0x2f0] sm:$0xff] }
 0x266   :  { %v3406_v3 = vadd.f32 %v3384_v37, %v3356_v22  ;;  %v3511_v37 = vld [vmem:[#allocation5 + $0x270] sm:$0xff]  ;;  %v3778_v39 = vunpack.c.l.s8.bf16 %v3542_v47  ;;  %v3782_v6 = vunpack.c.h.s8.bf16 %v3542_v47  ;;  %v3743_v34 = vunpack.c.h.s8.bf16 %v3523_v36 }
 0x267   :  { %v3413_v61 = vmul.f32 0.2, %v3405_v33  ;;  %4051 = vmatpush1.bf16.msra.mxu1 %v3683_v59  ;;  %v3541_v59 = vld [vmem:[#allocation5 + $0x360] sm:$0xff]  ;;  %v3715_v22 = vunpack.c.l.s8.bf16 %v3511_v37  ;;  %v3719_v19 = vunpack.c.h.s8.bf16 %v3511_v37  ;;  %v3747_v47 = vunpack.c.l.s8.bf16 %v3527_v5  ;;  %v3532_v37 = vld [vmem:[#allocation5 + $0x318] sm:$0xff] }
 0x268   :  { %v3414_v0 = vmul.f32 0.2, %v3406_v3  ;;  %4052 = vmatprep.subr.bf16.mxu1 %v3688_v26  ;;  %v3516_v26 = vld [vmem:[#allocation5 + $0x298] sm:$0xff] }
 0x269   :  { %v3421_v14 = vmax.f32 %v3405_v33, %v3413_v61  ;;  %v3777_v33 = vunpack.c.l.s8.bf16 %v3541_v59  ;;  %v3724_v61 = vunpack.c.l.s8.bf16 %v3516_v26 }
 0x26a   :  { %v3422_v60 = vmax.f32 %v3406_v3, %v3414_v0  ;;  %v6429_v58 = vpop.f32.mrb[12].mxu0  ;;  %v3546_v3 = vld [vmem:[#allocation5 + $0x388] sm:$0xff]  ;;  %v3781_v0 = vunpack.c.h.s8.bf16 %v3541_v59  ;;  %v3751_v59 = vunpack.c.h.s8.bf16 %v3527_v5 }
 0x26b   :  { %4053 = vmatpush1.bf16.msra.mxu1 %v3687_v49  ;;  %v6431_v62 = vpop.f32.mrb[13].mxu0  ;;  %v6433_v7 = vpack.c.bf16 %v3421_v14, %v3421_v14  ;;  %v3515_v49 = vld [vmem:[#allocation5 + $0x290] sm:$0xff] }
 0x26c   :  { %v3430_v20 = vpack.c.bf16 %v3422_v60, %v3422_v60  ;;  %4063 = vmatprep.subr.bf16.mxu1 %v3692_v4  ;;  %v3306_v16 = vpop.f32.mrb[14].mxu0  ;;  %v3786_v4 = vunpack.c.l.s8.bf16 %v3546_v3  ;;  %v3723_v14 = vunpack.c.l.s8.bf16 %v3515_v49  ;;  %v3728_v60 = vunpack.c.h.s8.bf16 %v3516_v26  ;;  %v3531_v26 = vld [vmem:[#allocation5 + $0x310] sm:$0xff] }
 0x26d   :  { %v3307_v32 = vpop.f32.mrb[15].mxu0  ;;  %v3550_v16 = vld [vmem:[#allocation5 + $0x3a8] sm:$0xff] }
 0x26e   :  { %3931 = vmatprep.mubr.bf16.mxu0 %v3430_v20  ;;  %4055 = vmatmul.mubr.bf16.vlgmr.msra.gmra.mrb[12].mxu1 %v6405_v23  ;;  %v3704_v23 = vunpack.c.h.s8.bf16 %v3504_v21  ;;  %v3732_v21 = vunpack.c.l.s8.bf16 %v3520_v38  ;;  %v3789_v32 = vunpack.c.h.s8.bf16 %v3545_v57 }
 0x26f   :  { %3932 = vmatmul.mubr.bf16.vlgmr.msra.gmra.mrb[16].mxu0 %v6433_v7  ;;  %4064 = vmatpush1.bf16.msra.mxu1 %v3691_v28  ;;  %v3785_v28 = vunpack.c.l.s8.bf16 %v3545_v57 }
 0x270   :  { %4095 = vmatprep.mubr.bf16.mxu1 %v3430_v20  ;;  %4065 = vmatprep.subr.bf16.mxu1 %v3696_v31  ;;  %v3790_v20 = vunpack.c.h.s8.bf16 %v3546_v3  ;;  %v3727_v31 = vunpack.c.h.s8.bf16 %v3515_v49  ;;  %v3760_v3 = vunpack.c.h.s8.bf16 %v3532_v37  ;;  %v3759_v49 = vunpack.c.h.s8.bf16 %v3531_v26 }
 0x271   :  { %3941 = vmatpush1.bf16.msra.mxu0 %v3753_v12  ;;  %v3519_v12 = vld [vmem:[#allocation5 + $0x2b0] sm:$0xff] }
 0x272   :  { %3942 = vmatprep.subr.bf16.mxu0 %v3758_v43  ;;  %v3794_v43 = vunpack.c.l.s8.bf16 %v3550_v16  ;;  %v3731_v55 = vunpack.c.l.s8.bf16 %v3519_v12  ;;  %v3735_v46 = vunpack.c.h.s8.bf16 %v3519_v12  ;;  %v3544_v12 = vld [vmem:[#allocation5 + $0x378] sm:$0xff] }
 0x273   :  { %4066 = vmatpush1.bf16.msra.mxu1 %v3695_v8  ;;  %v3549_v8 = vld [vmem:[#allocation5 + $0x3a0] sm:$0xff] }
 0x274   :  { %4067 = vmatprep.subr.bf16.mxu1 %v3700_v1  ;;  %v3736_v1 = vunpack.c.h.s8.bf16 %v3520_v38 }
 0x275   :  { %3943 = vmatpush1.bf16.msra.mxu0 %v3757_v41  ;;  %v3793_v41 = vunpack.c.l.s8.bf16 %v3549_v8 }
 0x276   :  { %3944 = vmatprep.subr.bf16.mxu0 %v3762_v18  ;;  %v3798_v18 = vunpack.c.h.s8.bf16 %v3550_v16 }
 0x277   :  { %4068 = vmatpush1.bf16.msra.mxu1 %v3699_v52  ;;  %v3554_v52 = vld [vmem:[#allocation5 + $0x3c8] sm:$0xff] }
 0x278   :  { %4069 = vmatprep.subr.bf16.mxu1 %v3704_v23  ;;  %v3740_v23 = vunpack.c.l.s8.bf16 %v3524_v56 }
 0x279   :  { %3945 = vmatpush1.bf16.msra.mxu0 %v3761_v11  ;;  %v3797_v11 = vunpack.c.h.s8.bf16 %v3549_v8  ;;  %v3780_v8 = vunpack.c.l.s8.bf16 %v3544_v12 }
 0x27a   :  { %3946 = vmatprep.subr.bf16.mxu0 %v3766_v30  ;;  %v3802_v30 = vunpack.c.l.s8.bf16 %v3554_v52 }
 0x27b   :  { %4070 = vmatpush1.bf16.msra.mxu1 %v3703_v13  ;;  %v3553_v13 = vld [vmem:[#allocation5 + $0x3c0] sm:$0xff] }
 0x27c   :  { %4071 = vmatprep.subr.bf16.mxu1 %v3708_v29  ;;  %v3744_v29 = vunpack.c.h.s8.bf16 %v3524_v56 }
 0x27d   :  { %3947 = vmatpush1.bf16.msra.mxu0 %v3765_v35  ;;  %v3801_v35 = vunpack.c.l.s8.bf16 %v3553_v13 }
 0x27e   :  { %3948 = vmatprep.subr.bf16.mxu0 %v3770_v48  ;;  %v3806_v48 = vunpack.c.h.s8.bf16 %v3554_v52 }
 0x27f   :  { %4072 = vmatpush1.bf16.msra.mxu1 %v3707_v54  ;;  %v3558_v54 = vld [vmem:[#allocation5 + $0x3e8] sm:$0xff] }
 0x280   :  { %4073 = vmatprep.subr.bf16.mxu1 %v3712_v2  ;;  %v3748_v2 = vunpack.c.l.s8.bf16 %v3528_v51 }
 0x281   :  { %3949 = vmatpush1.bf16.msra.mxu0 %v3769_v63  ;;  %v3805_v63 = vunpack.c.h.s8.bf16 %v3553_v13  ;;  %v3784_v13 = vunpack.c.h.s8.bf16 %v3544_v12 }
 0x282   :  { %3950 = vmatprep.subr.bf16.mxu0 %v3774_v17  ;;  %v3810_v17 = vunpack.c.l.s8.bf16 %v3558_v54 }
 0x283   :  { %4074 = vmatpush1.bf16.msra.mxu1 %v3711_v15  ;;  %v3557_v15 = vld [vmem:[#allocation5 + $0x3e0] sm:$0xff] }
 0x284   :  { %4075 = vmatprep.subr.bf16.mxu1 %v3716_v25  ;;  %v3752_v25 = vunpack.c.h.s8.bf16 %v3528_v51 }
 0x285   :  { %3951 = vmatpush1.bf16.msra.mxu0 %v3773_v42  ;;  %v3809_v42 = vunpack.c.l.s8.bf16 %v3557_v15 }
 0x286   :  { %3952 = vmatprep.subr.bf16.mxu0 %v3778_v39  ;;  %v3814_v39 = vunpack.c.h.s8.bf16 %v3558_v54 }
 0x287   :  { %4076 = vmatpush1.bf16.msra.mxu1 %v3715_v22  ;;  %v6441_v22 = vld [vmem:[%s6626_s7 + $0x8] sm:$0xff] }
 0x288   :  { %4077 = vmatprep.subr.bf16.mxu1 %v3720_v44  ;;  %v3756_v44 = vunpack.c.l.s8.bf16 %v3532_v37  ;;  %v4244_v37 = vunpack.c.h.s8.bf16 %v6441_v22 }
 0x289   :  { %3953 = vmatpush1.bf16.msra.mxu0 %v3777_v33  ;;  %v3813_v33 = vunpack.c.h.s8.bf16 %v3557_v15  ;;  %v3552_v15 = vld [vmem:[#allocation5 + $0x3b8] sm:$0xff] }
 0x28a   :  { %3954 = vmatprep.subr.bf16.mxu0 %v3782_v6  ;;  %v4242_v6 = vunpack.c.l.s8.bf16 %v6441_v22  ;;  %v4211_v22 = vld [vmem:[%s6626_s7 + $0x10] sm:$0xff] }
 0x28b   :  { %4078 = vmatpush1.bf16.msra.mxu1 %v3719_v19  ;;  %v3755_v19 = vunpack.c.l.s8.bf16 %v3531_v26 }
 0x28c   :  { %4079 = vmatprep.subr.bf16.mxu1 %v3724_v61  ;;  %v3536_v61 = vld [vmem:[#allocation5 + $0x338] sm:$0xff] }
 0x28d   :  { %3955 = vmatpush1.bf16.msra.mxu0 %v3781_v0  ;;  %v3764_v0 = vunpack.c.l.s8.bf16 %v3536_v61 }
 0x28e   :  { %3956 = vmatprep.subr.bf16.mxu0 %v3786_v4  ;;  %v3535_v4 = vld [vmem:[#allocation5 + $0x330] sm:$0xff] }
 0x28f   :  { %4080 = vmatpush1.bf16.msra.mxu1 %v3723_v14  ;;  %v3763_v57 = vunpack.c.l.s8.bf16 %v3535_v4  ;;  %v3768_v14 = vunpack.c.h.s8.bf16 %v3536_v61  ;;  %v3767_v38 = vunpack.c.h.s8.bf16 %v3535_v4  ;;  %v4245_v61 = vunpack.c.l.s8.bf16 %v4211_v22  ;;  %v4214_v4 = vld [vmem:[%s6626_s7 + $0x28] sm:$0xff] }
 0x290   :  { %4081 = vmatprep.subr.bf16.mxu1 %v3728_v60  ;;  %v3540_v60 = vld [vmem:[#allocation5 + $0x358] sm:$0xff] }
 0x291   :  { %3957 = vmatpush1.bf16.msra.mxu0 %v3785_v28  ;;  %v3772_v28 = vunpack.c.l.s8.bf16 %v3540_v60  ;;  %v3776_v16 = vunpack.c.h.s8.bf16 %v3540_v60  ;;  %v4247_v60 = vunpack.c.h.s8.bf16 %v4211_v22 }
 0x292   :  { %3958 = vmatprep.subr.bf16.mxu0 %v3790_v20  ;;  %v3539_v20 = vld [vmem:[#allocation5 + $0x350] sm:$0xff] }
 0x293   :  { %4082 = vmatpush1.bf16.msra.mxu1 %v3727_v31  ;;  %v3771_v31 = vunpack.c.l.s8.bf16 %v3539_v20 }
 0x294   :  { %4083 = vmatprep.subr.bf16.mxu1 %v3732_v21  ;;  %v3341_v21 = vsub.s32 7, %v6290_v27 }
 0x295   :  { %3959 = vmatpush1.bf16.msra.mxu0 %v3789_v32  ;;  %v3775_v32 = vunpack.c.h.s8.bf16 %v3539_v20 }
 0x296   :  { %3960 = vmatprep.subr.bf16.mxu0 %v3794_v43  ;;  %v3342_v56 = vrot.slane %v6418_v40, %v3341_v21 }
 0x297   :  { %4084 = vmatpush1.bf16.msra.mxu1 %v3731_v55  ;;  %v3543_v55 = vld [vmem:[#allocation5 + $0x370] sm:$0xff] }
 0x298   :  { %4085 = vmatprep.subr.bf16.mxu1 %v3736_v1  ;;  %v3779_v36 = vunpack.c.l.s8.bf16 %v3543_v55 }
 0x299   :  { %3961 = vmatpush1.bf16.msra.mxu0 %v3793_v41 }
 0x29a   :  { %3962 = vmatprep.subr.bf16.mxu0 %v3798_v18 }
 0x29b   :  { %4086 = vmatpush1.bf16.msra.mxu1 %v3735_v46 }
 0x29c   :  { %4087 = vmatprep.subr.bf16.mxu1 %v3740_v23 }
 0x29d   :  { %3963 = vmatpush1.bf16.msra.mxu0 %v3797_v11 }
 0x29e   :  { %3964 = vmatprep.subr.bf16.mxu0 %v3802_v30 }
 0x29f   :  { %4088 = vmatpush1.bf16.msra.mxu1 %v3739_v50 }
 0x2a0   :  { %4089 = vmatprep.subr.bf16.mxu1 %v3744_v29  ;;  %v3548_v29 = vld [vmem:[#allocation5 + $0x398] sm:$0xff] }
 0x2a1   :  { %3965 = vmatpush1.bf16.msra.mxu0 %v3801_v35 }
 0x2a2   :  { %3966 = vmatprep.subr.bf16.mxu0 %v3806_v48  ;;  %v3788_v48 = vunpack.c.l.s8.bf16 %v3548_v29 }
 0x2a3   :  { %4090 = vmatpush1.bf16.msra.mxu1 %v3743_v34  ;;  %v3547_v34 = vld [vmem:[#allocation5 + $0x390] sm:$0xff] }
 0x2a4   :  { %4091 = vmatprep.subr.bf16.mxu1 %v3748_v2  ;;  %v3787_v5 = vunpack.c.l.s8.bf16 %v3547_v34 }
 0x2a5   :  { %3967 = vmatpush1.bf16.msra.mxu0 %v3805_v63 }
 0x2a6   :  { %3968 = vmatprep.subr.bf16.mxu0 %v3810_v17  ;;  %v3792_v17 = vunpack.c.h.s8.bf16 %v3548_v29  ;;  %v4220_v29 = vld [vmem:[%s6626_s7 + $0x58] sm:$0xff] }
 0x2a7   :  { %4092 = vmatpush1.bf16.msra.mxu1 %v3747_v47 }
 0x2a8   :  { %4093 = vmatprep.subr.bf16.mxu1 %v3752_v25 }
 0x2a9   :  { %3969 = vmatpush1.bf16.msra.mxu0 %v3809_v42  ;;  %v3791_v42 = vunpack.c.h.s8.bf16 %v3547_v34  ;;  %v4222_v34 = vld [vmem:[%s6626_s7 + $0x68] sm:$0xff] }
 0x2aa   :  { %3970 = vmatprep.subr.bf16.mxu0 %v3814_v39  ;;  %v4212_v39 = vld [vmem:[%s6626_s7 + $0x18] sm:$0xff] }
 0x2ab   :  { %4094 = vmatpush1.bf16.msra.mxu1 %v3751_v59  ;;  %v3796_v59 = vunpack.c.l.s8.bf16 %v3552_v15 }
 0x2ac   :  { %4104 = vmatprep.subr.bf16.mxu1 %v3756_v44  ;;  %v3551_v44 = vld [vmem:[#allocation5 + $0x3b0] sm:$0xff] }
 0x2ad   :  { %3971 = vmatpush1.bf16.msra.mxu0 %v3813_v33  ;;  %v4246_v33 = vunpack.c.l.s8.bf16 %v4212_v39 }
 0x2ae   :  { %4096 = vmatmul.mubr.bf16.vlgmr.msra.gmra.mrb[12].mxu1 %v6433_v7  ;;  %4305 = vmatprep.subr.bf16.mxu0 %v4242_v6  ;;  %v3337_v7 = vsub.s32 6, %v6290_v27  ;;  %v3392_v27 = vrot.slane %v6425_v9, %v3341_v21  ;;  %v3795_v6 = vunpack.c.l.s8.bf16 %v3551_v44  ;;  %v4252_v21 = vunpack.c.h.s8.bf16 %v4214_v4 }
 0x2af   :  { %4105 = vmatpush1.bf16.msra.mxu1 %v3755_v19  ;;  %v3800_v19 = vunpack.c.h.s8.bf16 %v3552_v15 }
 0x2b0   :  { %4106 = vmatprep.subr.bf16.mxu1 %v3760_v3  ;;  %v3338_v43 = vrot.slane %v6418_v40, %v3337_v7  ;;  %v3388_v18 = vrot.slane %v6425_v9, %v3337_v7  ;;  %v4209_v9 = vld [vmem:[%s6626_s7] sm:$0xff] }
 0x2b1   :  { %v4241_v47 = vunpack.c.l.s8.bf16 %v4209_v9  ;;  %v4243_v26 = vunpack.c.h.s8.bf16 %v4209_v9  ;;  %v3556_v3 = vld [vmem:[#allocation5 + $0x3d8] sm:$0xff] }
 0x2b2   :  { %v3560_v7 = vld [vmem:[#allocation5 + $0x3f8] sm:$0xff] }
 0x2b3   :  { %4107 = vmatpush1.bf16.msra.mxu1 %v3759_v49  ;;  %v4248_v49 = vunpack.c.h.s8.bf16 %v4212_v39  ;;  %v4221_v9 = vld [vmem:[%s6626_s7 + $0x60] sm:$0xff]  ;;  %v4226_v39 = vld [vmem:[%s6626_s7 + $0x88] sm:$0xff] }
 0x2b4   :  { %4108 = vmatprep.subr.bf16.mxu1 %v3764_v0  ;;  %v3799_v0 = vunpack.c.h.s8.bf16 %v3551_v44  ;;  %v4425_v44 = vld [vmem:[%s6629_s10 + $0x20] sm:$0xff] }
 0x2b7   :  { %4109 = vmatpush1.bf16.msra.mxu1 %v3763_v57  ;;  %v3804_v57 = vunpack.c.l.s8.bf16 %v3556_v3 }
 0x2b8   :  { %4110 = vmatprep.subr.bf16.mxu1 %v3768_v14  ;;  %v3555_v14 = vld [vmem:[#allocation5 + $0x3d0] sm:$0xff] }
 0x2b9   :  { %v3803_v20 = vunpack.c.l.s8.bf16 %v3555_v14  ;;  %v3807_v12 = vunpack.c.h.s8.bf16 %v3555_v14 }
 0x2bb   :  { %4111 = vmatpush1.bf16.msra.mxu1 %v3767_v38  ;;  %v4250_v38 = vunpack.c.l.s8.bf16 %v4214_v4 }
 0x2bc   :  { %4112 = vmatprep.subr.bf16.mxu1 %v3772_v28  ;;  %v4213_v28 = vld [vmem:[%s6626_s7 + $0x20] sm:$0xff] }
 0x2bf   :  { %4113 = vmatpush1.bf16.msra.mxu1 %v3771_v31  ;;  %v3808_v31 = vunpack.c.h.s8.bf16 %v3556_v3 }
 0x2c0   :  { %4114 = vmatprep.subr.bf16.mxu1 %v3776_v16  ;;  %v4249_v16 = vunpack.c.l.s8.bf16 %v4213_v28 }
 0x2c1   :  { %v3261_v1 = vpop.f32.mrb[8].mxu1 }
 0x2c2   :  { %v4963_v41 = vadd.f32 %v6429_v58, %v3261_v1  ;;  %v3263_v46 = vpop.f32.mrb[9].mxu1  ;;  %v3783_v58 = vunpack.c.h.s8.bf16 %v3543_v55  ;;  %v4251_v55 = vunpack.c.h.s8.bf16 %v4213_v28 }
 0x2c3   :  { %v4964_v52 = vadd.f32 %v6431_v62, %v3263_v46  ;;  %v3265_v23 = vpop.f32.mrb[10].mxu1  ;;  %4115 = vmatpush1.bf16.msra.mxu1 %v3775_v32  ;;  %v4216_v32 = vld [vmem:[%s6626_s7 + $0x38] sm:$0xff] }
 0x2c4   :  { %v3357_v11 = vmul.f32 %v4963_v41, %v3338_v43  ;;  %v3266_v30 = vpop.f32.mrb[11].mxu1  ;;  %4116 = vmatprep.subr.bf16.mxu1 %v3780_v8  ;;  %v3812_v43 = vunpack.c.l.s8.bf16 %v3560_v7  ;;  %v3559_v8 = vld [vmem:[#allocation5 + $0x3f0] sm:$0xff]  ;;  %v4254_v1 = vunpack.c.l.s8.bf16 %v4216_v32  ;;  %v4218_v23 = vld [vmem:[%s6626_s7 + $0x48] sm:$0xff] }
 0x2c5   :  { %v3358_v50 = vmul.f32 %v4964_v52, %v3342_v56  ;;  %v4215_v56 = vld [vmem:[%s6626_s7 + $0x30] sm:$0xff]  ;;  %v3811_v41 = vunpack.c.l.s8.bf16 %v3559_v8  ;;  %v4256_v52 = vunpack.c.h.s8.bf16 %v4216_v32  ;;  %v4217_v30 = vld [vmem:[%s6626_s7 + $0x40] sm:$0xff] }
 0x2c6   :  { %v3407_v51 = vadd.f32 %v3388_v18, %v3357_v11  ;;  %v3816_v18 = vunpack.c.h.s8.bf16 %v3560_v7  ;;  %v4253_v46 = vunpack.c.l.s8.bf16 %v4215_v56  ;;  %v4258_v11 = vunpack.c.l.s8.bf16 %v4218_v23 }
 0x2c7   :  { %v3408_v40 = vadd.f32 %v3392_v27, %v3358_v50  ;;  %4117 = vmatpush1.bf16.msra.mxu1 %v3779_v36  ;;  %v3815_v27 = vunpack.c.h.s8.bf16 %v3559_v8  ;;  %v4255_v36 = vunpack.c.h.s8.bf16 %v4215_v56  ;;  %v4260_v50 = vunpack.c.h.s8.bf16 %v4218_v23  ;;  %v4225_v23 = vld [vmem:[%s6626_s7 + $0x80] sm:$0xff] }
 0x2c8   :  { %v3415_v35 = vmul.f32 0.2, %v3407_v51  ;;  %4118 = vmatprep.subr.bf16.mxu1 %v3784_v13  ;;  %v4257_v13 = vunpack.c.l.s8.bf16 %v4217_v30 }
 0x2c9   :  { %v3416_v62 = vmul.f32 0.2, %v3408_v40 }
 0x2ca   :  { %v3423_v54 = vmax.f32 %v3407_v51, %v3415_v35  ;;  %v4259_v51 = vunpack.c.h.s8.bf16 %v4217_v30  ;;  %v4273_v30 = vunpack.c.l.s8.bf16 %v4225_v23 }
 0x2cb   :  { %4119 = vmatpush1.bf16.msra.mxu1 %v3783_v58  ;;  %v3424_v2 = vmax.f32 %v3408_v40, %v3416_v62  ;;  %v4262_v40 = vunpack.c.l.s8.bf16 %v4220_v29  ;;  %v4219_v58 = vld [vmem:[%s6626_s7 + $0x50] sm:$0xff] }
 0x2cc   :  { %4120 = vmatprep.subr.bf16.mxu1 %v3788_v48  ;;  %v6456_v25 = vpack.c.bf16 %v3423_v54, %v3423_v54  ;;  %v4261_v35 = vunpack.c.l.s8.bf16 %v4219_v58  ;;  %v4264_v48 = vunpack.c.h.s8.bf16 %v4220_v29  ;;  %v4263_v62 = vunpack.c.h.s8.bf16 %v4219_v58  ;;  %v4228_v29 = vld [vmem:[%s6626_s7 + $0x98] sm:$0xff]  ;;  %v4227_v58 = vld [vmem:[%s6626_s7 + $0x90] sm:$0xff] }
 0x2cd   :  { %v3432_v63 = vpack.c.bf16 %v3424_v2, %v3424_v2  ;;  %v4266_v54 = vunpack.c.l.s8.bf16 %v4222_v34  ;;  %v4265_v2 = vunpack.c.l.s8.bf16 %v4221_v9 }
 0x2cf   :  { %3972 = vmatprep.mubr.bf16.mxu0 %v3432_v63  ;;  %4121 = vmatpush1.bf16.msra.mxu1 %v3787_v5  ;;  %v4268_v5 = vunpack.c.h.s8.bf16 %v4222_v34  ;;  %v4230_v34 = vld [vmem:[%s6626_s7 + $0xa8] sm:$0xff] }
 0x2d0   :  { %4136 = vmatprep.mubr.bf16.mxu1 %v3432_v63  ;;  %3973 = vmatmul.mubr.bf16.vlgmr.msra.gmra.mrb[16].mxu0 %v6456_v25  ;;  %v4267_v63 = vunpack.c.h.s8.bf16 %v4221_v9  ;;  %v4229_v9 = vld [vmem:[%s6626_s7 + $0xa0] sm:$0xff] }
 0x2d1   :  { %4122 = vmatprep.subr.bf16.mxu1 %v3792_v17  ;;  %4306 = vmatpush1.bf16.msra.mxu0 %v4241_v47  ;;  %v4224_v17 = vld [vmem:[%s6626_s7 + $0x78] sm:$0xff]  ;;  %v4223_v47 = vld [vmem:[%s6626_s7 + $0x70] sm:$0xff] }
 0x2d2   :  { %4307 = vmatprep.subr.bf16.mxu0 %v4244_v37  ;;  %v4270_v15 = vunpack.c.l.s8.bf16 %v4224_v17  ;;  %v4272_v37 = vunpack.c.h.s8.bf16 %v4224_v17 }
 0x2d3   :  { %4123 = vmatpush1.bf16.msra.mxu1 %v3791_v42  ;;  %v4271_v42 = vunpack.c.h.s8.bf16 %v4223_v47 }
 0x2d4   :  { %4124 = vmatprep.subr.bf16.mxu1 %v3796_v59  ;;  %v4274_v59 = vunpack.c.l.s8.bf16 %v4226_v39 }
 0x2d5   :  { %4308 = vmatpush1.bf16.msra.mxu0 %v4243_v26  ;;  %v4421_v26 = vld [vmem:[%s6629_s10] sm:$0xff] }
 0x2d6   :  { %4309 = vmatprep.subr.bf16.mxu0 %v4246_v33  ;;  %v4437_v33 = vunpack.c.l.s8.bf16 %v4425_v44  ;;  %v4429_v22 = vunpack.c.l.s8.bf16 %v4421_v26  ;;  %v4430_v3 = vunpack.c.h.s8.bf16 %v4421_v26  ;;  %v4231_v26 = vld [vmem:[%s6626_s7 + $0xb0] sm:$0xff] }
 0x2d7   :  { %4125 = vmatpush1.bf16.msra.mxu1 %v3795_v6  ;;  %v4438_v6 = vunpack.c.h.s8.bf16 %v4425_v44 }
 0x2d8   :  { %4126 = vmatprep.subr.bf16.mxu1 %v3800_v19  ;;  %v4426_v19 = vld [vmem:[%s6629_s10 + $0x28] sm:$0xff] }
 0x2d9   :  { %4310 = vmatpush1.bf16.msra.mxu0 %v4245_v61  ;;  %v4439_v61 = vunpack.c.l.s8.bf16 %v4426_v19  ;;  %v4440_v4 = vunpack.c.h.s8.bf16 %v4426_v19 }
 0x2da   :  { %4311 = vmatprep.subr.bf16.mxu0 %v4248_v49  ;;  %v4422_v49 = vld [vmem:[%s6629_s10 + $0x8] sm:$0xff] }
 0x2db   :  { %4127 = vmatpush1.bf16.msra.mxu1 %v3799_v0  ;;  %v4431_v0 = vunpack.c.l.s8.bf16 %v4422_v49  ;;  %v4432_v14 = vunpack.c.h.s8.bf16 %v4422_v49 }
 0x2dc   :  { %4128 = vmatprep.subr.bf16.mxu1 %v3804_v57  ;;  %v6521_v57 = vld [vmem:[%s6629_s10 + $0x30] sm:$0xff] }
 0x2dd   :  { %4312 = vmatpush1.bf16.msra.mxu0 %v4247_v60  ;;  %v4441_v60 = vunpack.c.l.s8.bf16 %v6521_v57 }
 0x2de   :  { %4313 = vmatprep.subr.bf16.mxu0 %v4250_v38  ;;  %v6527_v38 = vld [vmem:[%s6629_s10 + $0x10] sm:$0xff] }
 0x2df   :  { %4129 = vmatpush1.bf16.msra.mxu1 %v3803_v20  ;;  %v4433_v28 = vunpack.c.l.s8.bf16 %v6527_v38  ;;  %v4145_v20 = vld [vmem:[%s6624_s5] sm:$0xf] }
 0x2e0   :  { %4130 = vmatprep.subr.bf16.mxu1 %v3808_v31  ;;  %v4171_v31 = vld [vmem:[%s6625_s6] sm:$0xf]  ;;  %v4150_v7 = vrot.slane %v4145_v20, %v6356_v53  ;;  %v4162_v17 = vrot.slane %v4145_v20, %v6390_v45 }
 0x2e1   :  { %4314 = vmatpush1.bf16.msra.mxu0 %v4249_v16  ;;  %v4154_v16 = vrot.slane %v4145_v20, %v6295_v10  ;;  %v4180_v32 = vrot.slane %v4171_v31, %v6295_v10 }
 0x2e2   :  { %4315 = vmatprep.subr.bf16.mxu0 %v4252_v21  ;;  %v4176_v21 = vrot.slane %v4171_v31, %v6356_v53 }
 0x2e3   :  { %4131 = vmatpush1.bf16.msra.mxu1 %v3807_v12 }
 0x2e4   :  { %4132 = vmatprep.subr.bf16.mxu1 %v3812_v43 }
 0x2e5   :  { %4316 = vmatpush1.bf16.msra.mxu0 %v4251_v55 }
 0x2e6   :  { %4317 = vmatprep.subr.bf16.mxu0 %v4254_v1 }
 0x2e7   :  { %4133 = vmatpush1.bf16.msra.mxu1 %v3811_v41 }
 0x2e8   :  { %4134 = vmatprep.subr.bf16.mxu1 %v3816_v18 }
 0x2e9   :  { %4318 = vmatpush1.bf16.msra.mxu0 %v4253_v46 }
 0x2ea   :  { %4319 = vmatprep.subr.bf16.mxu0 %v4256_v52 }
 0x2eb   :  { %4135 = vmatpush1.bf16.msra.mxu1 %v3815_v27 }
 0x2ec   :  { %4937 = vmatprep.subr.bf16.mxu1 %v4437_v33 }
 0x2ed   :  { %4320 = vmatpush1.bf16.msra.mxu0 %v4255_v36 }
 0x2ee   :  { %4137 = vmatmul.mubr.bf16.vlgmr.msra.gmra.mrb[12].mxu1 %v6456_v25  ;;  %4321 = vmatprep.subr.bf16.mxu0 %v4258_v11  ;;  %v4269_v25 = vunpack.c.l.s8.bf16 %v4223_v47  ;;  %v4184_v47 = vrot.slane %v4171_v31, %v6387_v24 }
 0x2ef   :  { %4938 = vmatpush3.bf16.msra.mxu1 %v4429_v22 }
 0x2f0   :  { %4939 = vmatprep.subr.bf16.mxu1 %v4438_v6 }
 0x2f1   :  { %4322 = vmatpush1.bf16.msra.mxu0 %v4257_v13 }
 0x2f2   :  { %4323 = vmatprep.subr.bf16.mxu0 %v4260_v50  ;;  %v4276_v50 = vunpack.c.h.s8.bf16 %v4226_v39 }
 0x2f3   :  { %4940 = vmatpush3.bf16.msra.mxu1 %v4430_v3 }
 0x2f4   :  { %4941 = vmatprep.subr.bf16.mxu1 %v4439_v61 }
 0x2f5   :  { %4324 = vmatpush1.bf16.msra.mxu0 %v4259_v51  ;;  %v4275_v51 = vunpack.c.h.s8.bf16 %v4225_v23  ;;  %v4239_v23 = vld [vmem:[%s6626_s7 + $0xf0] sm:$0xff] }
 0x2f6   :  { %4325 = vmatprep.subr.bf16.mxu0 %v4262_v40  ;;  %v4278_v40 = vunpack.c.l.s8.bf16 %v4228_v29 }
 0x2f7   :  { %4942 = vmatpush3.bf16.msra.mxu1 %v4431_v0  ;;  %v4287_v0 = vunpack.c.h.s8.bf16 %v4231_v26 }
 0x2f8   :  { %4943 = vmatprep.subr.bf16.mxu1 %v4440_v4 }
 0x2f9   :  { %4326 = vmatpush1.bf16.msra.mxu0 %v4261_v35  ;;  %v4277_v35 = vunpack.c.l.s8.bf16 %v4227_v58 }
 0x2fa   :  { %4327 = vmatprep.subr.bf16.mxu0 %v4264_v48  ;;  %v4280_v48 = vunpack.c.h.s8.bf16 %v4228_v29 }
 0x2fb   :  { %4944 = vmatpush3.bf16.msra.mxu1 %v4432_v14 }
 0x2fc   :  { %4945 = vmatprep.subr.bf16.mxu1 %v4441_v60  ;;  %v4233_v60 = vld [vmem:[%s6626_s7 + $0xc0] sm:$0xff] }
 0x2fd   :  { %4328 = vmatpush1.bf16.msra.mxu0 %v4263_v62  ;;  %v4279_v62 = vunpack.c.h.s8.bf16 %v4227_v58  ;;  %v4428_v58 = vld [vmem:[%s6629_s10 + $0x38] sm:$0xff] }
 0x2fe   :  { %4329 = vmatprep.subr.bf16.mxu0 %v4266_v54  ;;  %v4282_v54 = vunpack.c.l.s8.bf16 %v4230_v34 }
 0x2ff   :  { %4946 = vmatpush3.bf16.msra.mxu1 %v4433_v28 }
 0x301   :  { %4330 = vmatpush1.bf16.msra.mxu0 %v4265_v2  ;;  %v4281_v2 = vunpack.c.l.s8.bf16 %v4229_v9 }
 0x302   :  { %4331 = vmatprep.subr.bf16.mxu0 %v4268_v5  ;;  %v4158_v5 = vrot.slane %v4145_v20, %v6387_v24  ;;  %v4285_v24 = vunpack.c.l.s8.bf16 %v4231_v26  ;;  %v4289_v20 = vunpack.c.l.s8.bf16 %v4233_v60 }
 0x305   :  { %4332 = vmatpush1.bf16.msra.mxu0 %v4267_v63  ;;  %v4284_v63 = vunpack.c.h.s8.bf16 %v4230_v34 }
 0x306   :  { %4333 = vmatprep.subr.bf16.mxu0 %v4270_v15  ;;  %v4232_v15 = vld [vmem:[%s6626_s7 + $0xb8] sm:$0xff] }
 0x307   :  { %v4286_v44 = vunpack.c.l.s8.bf16 %v4232_v15  ;;  %v4288_v61 = vunpack.c.h.s8.bf16 %v4232_v15 }
 0x309   :  { %4334 = vmatpush1.bf16.msra.mxu0 %v4269_v25 }
 0x30a   :  { %4335 = vmatprep.subr.bf16.mxu0 %v4272_v37  ;;  %v4188_v37 = vrot.slane %v4171_v31, %v6390_v45  ;;  %v4234_v45 = vld [vmem:[%s6626_s7 + $0xc8] sm:$0xff] }
 0x30b   :  { %v4290_v14 = vunpack.c.l.s8.bf16 %v4234_v45  ;;  %v4292_v31 = vunpack.c.h.s8.bf16 %v4234_v45 }
 0x30d   :  { %4336 = vmatpush1.bf16.msra.mxu0 %v4271_v42  ;;  %v4283_v42 = vunpack.c.h.s8.bf16 %v4229_v9 }
 0x30e   :  { %4346 = vmatprep.subr.bf16.mxu0 %v4274_v59 }
 0x3a3   :  { %v3974_v12 = vpop.f32.mrb[16].mxu0 }
 0x3a4   :  { %v4167_v43 = vmul.f32 %v4150_v7, %v3974_v12  ;;  %v3976_v8 = vpop.f32.mrb[17].mxu0  ;;  %v4236_v7 = vld [vmem:[%s6626_s7 + $0xd8] sm:$0xff]  ;;  %v4235_v12 = vld [vmem:[%s6626_s7 + $0xd0] sm:$0xff] }
 0x3a5   :  { %v4168_v55 = vmul.f32 %v4154_v16, %v3976_v8  ;;  %v3978_v1 = vpop.f32.mrb[18].mxu0  ;;  %v4291_v16 = vunpack.c.h.s8.bf16 %v4233_v60  ;;  %v4238_v8 = vld [vmem:[%s6626_s7 + $0xe8] sm:$0xff] }
 0x3a6   :  { %v4193_v56 = vadd.f32 %v4176_v21, %v4167_v43  ;;  %v3979_v41 = vpop.f32.mrb[19].mxu0  ;;  %v4294_v21 = vunpack.c.l.s8.bf16 %v4236_v7  ;;  %v4296_v43 = vunpack.c.h.s8.bf16 %v4236_v7  ;;  %v4298_v1 = vunpack.c.l.s8.bf16 %v4238_v8 }
 0x3a7   :  { %v4194_v18 = vadd.f32 %v4180_v32, %v4168_v55  ;;  %v4293_v32 = vunpack.c.l.s8.bf16 %v4235_v12  ;;  %v4295_v55 = vunpack.c.h.s8.bf16 %v4235_v12 }
 0x3a8   :  { %v4197_v46 = vmul.f32 0.2, %v4193_v56 }
 0x3a9   :  { %v4198_v52 = vmul.f32 0.2, %v4194_v18 }
 0x3aa   :  { %v4201_v27 = vmax.f32 %v4193_v56, %v4197_v46  ;;  %v4237_v56 = vld [vmem:[%s6626_s7 + $0xe0] sm:$0xff]  ;;  %v4240_v46 = vld [vmem:[%s6626_s7 + $0xf8] sm:$0xff] }
 0x3ab   :  { %v4202_v36 = vmax.f32 %v4194_v18, %v4198_v52  ;;  %v4297_v41 = vunpack.c.l.s8.bf16 %v4237_v56  ;;  %v4300_v18 = vunpack.c.h.s8.bf16 %v4238_v8  ;;  %v4299_v52 = vunpack.c.h.s8.bf16 %v4237_v56 }
 0x3ac   :  { %v4205_v13 = vpack.c.bf16 %v4201_v27, %v4201_v27  ;;  %v4302_v27 = vunpack.c.l.s8.bf16 %v4240_v46 }
 0x3ad   :  { %v4206_v11 = vpack.c.bf16 %v4202_v36, %v4202_v36  ;;  %v4301_v36 = vunpack.c.l.s8.bf16 %v4239_v23 }
 0x3af   :  { %4337 = vmatprep.mubr.bf16.mxu0 %v4206_v11 }
 0x3b0   :  { %4338 = vmatmul.mubr.bf16.vlgmr.msra.gmra.mrb[20].mxu0 %v4205_v13  ;;  %v4303_v13 = vunpack.c.h.s8.bf16 %v4239_v23 }
 0x3b1   :  { %4347 = vmatpush1.bf16.msra.mxu0 %v4273_v30  ;;  %v4304_v30 = vunpack.c.h.s8.bf16 %v4240_v46 }
 0x3b2   :  { %4348 = vmatprep.subr.bf16.mxu0 %v4276_v50 }
 0x3b5   :  { %4349 = vmatpush1.bf16.msra.mxu0 %v4275_v51  ;;  %v4442_v51 = vunpack.c.h.s8.bf16 %v6521_v57  ;;  %v4387_v57 = vld [vmem:[%s6627_s8] sm:$0x3] }
 0x3b6   :  { %4350 = vmatprep.subr.bf16.mxu0 %v4278_v40  ;;  %v4434_v40 = vunpack.c.h.s8.bf16 %v6527_v38  ;;  %v4401_v38 = vld [vmem:[%s6628_s9] sm:$0x3]  ;;  %v4392_v9 = vrot.slane %v4387_v57, %v6356_v53 }
 0x3b7   :  { %4947 = vmatprep.subr.bf16.mxu1 %v4442_v51 }
 0x3b8   :  { %4948 = vmatpush3.bf16.msra.mxu1 %v4434_v40 }
 0x3b9   :  { %4351 = vmatpush1.bf16.msra.mxu0 %v4277_v35  ;;  %v4443_v35 = vunpack.c.l.s8.bf16 %v4428_v58 }
 0x3ba   :  { %4352 = vmatprep.subr.bf16.mxu0 %v4280_v48  ;;  %v4424_v48 = vld [vmem:[%s6629_s10 + $0x18] sm:$0xff] }
 0x3bb   :  { %v4435_v34 = vunpack.c.l.s8.bf16 %v4424_v48  ;;  %4949 = vmatprep.subr.bf16.mxu1 %v4443_v35 }
 0x3bd   :  { %4353 = vmatpush1.bf16.msra.mxu0 %v4279_v62  ;;  %4950 = vmatpush3.bf16.msra.mxu1 %v4435_v34  ;;  %v4444_v62 = vunpack.c.h.s8.bf16 %v4428_v58 }
 0x3be   :  { %4354 = vmatprep.subr.bf16.mxu0 %v4282_v54  ;;  %v4436_v54 = vunpack.c.h.s8.bf16 %v4424_v48 }
 0x3bf   :  { %4951 = vmatprep.subr.bf16.mxu1 %v4444_v62 }
 0x3c1   :  { %4355 = vmatpush1.bf16.msra.mxu0 %v4281_v2  ;;  %v4138_v25 = vpop.f32.mrb[12].mxu1  ;;  %4952 = vmatpush3.bf16.msra.mxu1 %v4436_v54  ;;  %v4396_v2 = vrot.slane %v4387_v57, %v6295_v10 }
 0x3c2   :  { %v4169_v39 = vmul.f32 %v4158_v5, %v4138_v25  ;;  %v4140_v59 = vpop.f32.mrb[13].mxu1  ;;  %4356 = vmatprep.subr.bf16.mxu0 %v4284_v63  ;;  %v4406_v5 = vrot.slane %v4401_v38, %v6356_v53 }
 0x3c3   :  { %v4170_v33 = vmul.f32 %v4162_v17, %v4140_v59  ;;  %v4142_v22 = vpop.f32.mrb[14].mxu1  ;;  %v4410_v17 = vrot.slane %v4401_v38, %v6295_v10  ;;  %v4933_v10 = vld [vmem:[%s6630_s11] ss:$0 sm:$0xff] }
 0x3c4   :  { %v4195_v6 = vadd.f32 %v4184_v47, %v4169_v39  ;;  %v4143_v19 = vpop.f32.mrb[15].mxu1 }
 0x3c5   :  { %v4196_v3 = vadd.f32 %v4188_v37, %v4170_v33  ;;  %4357 = vmatpush1.bf16.msra.mxu0 %v4283_v42 }
 0x3c6   :  { %4358 = vmatprep.subr.bf16.mxu0 %v4286_v44  ;;  %v4199_v11 = vmul.f32 0.2, %v4195_v6 }
 0x3c7   :  { %v4200_v49 = vmul.f32 0.2, %v4196_v3 }
 0x3c8   :  { %v4203_v50 = vmax.f32 %v4195_v6, %v4199_v11 }
 0x3c9   :  { %4359 = vmatpush1.bf16.msra.mxu0 %v4285_v24  ;;  %v4204_v4 = vmax.f32 %v4196_v3, %v4200_v49  ;;  %v4934_v49 = vld [vmem:[%s6631_s12] ss:$0 sm:$0xff] }
 0x3ca   :  { %4360 = vmatprep.subr.bf16.mxu0 %v4288_v61  ;;  %v4207_v29 = vpack.c.bf16 %v4203_v50, %v4203_v50 }
 0x3cb   :  { %v4208_v28 = vpack.c.bf16 %v4204_v4, %v4204_v4 }
 0x3cd   :  { %4361 = vmatpush1.bf16.msra.mxu0 %v4287_v0  ;;  %4378 = vmatprep.mubr.bf16.mxu0 %v4208_v28 }
 0x3ce   :  { %4362 = vmatprep.subr.bf16.mxu0 %v4290_v14 }
 0x3d1   :  { %4363 = vmatpush1.bf16.msra.mxu0 %v4289_v20  ;;  %v4935_v20 = vld [vmem:[%s6632_s13] ss:$0 sm:$0xff] }
 0x3d2   :  { %4364 = vmatprep.subr.bf16.mxu0 %v4292_v31 }
 0x3d5   :  { %4365 = vmatpush1.bf16.msra.mxu0 %v4291_v16 }
 0x3d6   :  { %4366 = vmatprep.subr.bf16.mxu0 %v4294_v21  ;;  %v4936_v21 = vld [vmem:[#allocation2] ss:$0 sm:$0xff] }
 0x3d9   :  { %4367 = vmatpush1.bf16.msra.mxu0 %v4293_v32 }
 0x3da   :  { %4368 = vmatprep.subr.bf16.mxu0 %v4296_v43 }
 0x3dd   :  { %4369 = vmatpush1.bf16.msra.mxu0 %v4295_v55 }
 0x3de   :  { %4370 = vmatprep.subr.bf16.mxu0 %v4298_v1 }
 0x3e1   :  { %4371 = vmatpush1.bf16.msra.mxu0 %v4297_v41 }
 0x3e2   :  { %4372 = vmatprep.subr.bf16.mxu0 %v4300_v18 }
 0x3e5   :  { %4373 = vmatpush1.bf16.msra.mxu0 %v4299_v52 }
 0x3e6   :  { %4374 = vmatprep.subr.bf16.mxu0 %v4302_v27 }
 0x3e9   :  { %4375 = vmatpush1.bf16.msra.mxu0 %v4301_v36 }
 0x3ea   :  { %4376 = vmatprep.subr.bf16.mxu0 %v4304_v30 }
 0x3ed   :  { %4377 = vmatpush1.bf16.msra.mxu0 %v4303_v13 }
 0x3f0   :  { %4379 = vmatmul.mubr.bf16.vlgmr.msra.gmra.mrb[20].mxu0 %v4207_v29 }
 0x4c3   :  { %v4380_v63 = vpop.f32.mrb[20].mxu0 }
 0x4c4   :  { %v4399_v15 = vmul.f32 %v4392_v9, %v4380_v63  ;;  %v4382_v47 = vpop.f32.mrb[21].mxu0 }
 0x4c5   :  { %v4400_v25 = vmul.f32 %v4396_v2, %v4382_v47  ;;  %v4384_v37 = vpop.f32.mrb[22].mxu0 }
 0x4c6   :  { %v4413_v42 = vadd.f32 %v4406_v5, %v4399_v15  ;;  %v4385_v39 = vpop.f32.mrb[23].mxu0 }
 0x4c7   :  { %v4414_v59 = vadd.f32 %v4410_v17, %v4400_v25 }
 0x4c8   :  { %v4415_v44 = vmul.f32 0.2, %v4413_v42 }
 0x4c9   :  { %v4416_v26 = vmul.f32 0.2, %v4414_v59 }
 0x4ca   :  { %v4417_v33 = vmax.f32 %v4413_v42, %v4415_v44 }
 0x4cb   :  { %v4418_v22 = vmax.f32 %v4414_v59, %v4416_v26 }
 0x4cc   :  { %v4419_v19 = vpack.c.bf16 %v4417_v33, %v4417_v33 }
 0x4cd   :  { %v4420_v6 = vpack.c.bf16 %v4418_v22, %v4418_v22 }
 0x4cf   :  { %4477 = vmatprep.mubr.bf16.mxu1 %v4420_v6 }
 0x4d0   :  { %4478 = vmatmul.mubr.bf16.vlgmr.msra.gmra.mrb[16].mxu1 %v4419_v19 }
 0x5a3   :  { %v4953_v3 = vpop.f32.mrb[16].mxu1 }
 0x5a4   :  { %v4954_v53 = vpop.f32.mrb[17].mxu1 }
 0x5a5   :  { %v4955_v24 = vadd.f32 %v4954_v53, %v4953_v3  ;;  %v4956_v61 = vpop.f32.mrb[18].mxu1 }
 0x5a6   :  { %v4957_v45 = vpop.f32.mrb[19].mxu1 }
 0x5a7   :  { %v4492_v0 = vmul.f32 %v4955_v24, %v4933_v10 }
 0x5a9   :  { %v4500_v4 = vadd.f32 %v4934_v49, %v4492_v0 }
 0x5ab   :  { %v4501_v14 = vmul.f32 0.2, %v4500_v4 }
 0x5ad   :  { %v4502_v60 = vmax.f32 %v4500_v4, %v4501_v14 }
 0x5af   :  { %v4503_v28 = vpack.c.bf16 %v4502_v60, %v4502_v60 }
 0x5b1   :  { %v4504_v31 = vunpack.c.l.bf16 %v4503_v28 }
 0x5b3   :  { %v4512_v7 = vmul.f32 %v4935_v20, %v4504_v31 }
 0x5b5   :  { %v4514_v16 = vsel %vm4513_vm1, %v4512_v7, 0.0 }
 0x5b6   :  { %4515 = vadd.xlane.f32.xlu0 %v4514_v16 }
 0x643   :  { %v4516_v12 = vpop.xlane.xlu0 %4515 }
 0x644   :  { %v4524_v32 = vadd.f32 %v4936_v21, %v4516_v12 }
 0x646   :  { %v4525_v43 = vmul.f32 0.5, %v4524_v32 }
 0x648   :  { %5039 = vtanh.f32 %v4525_v43 }
 0x652   :  { %v5040_v8 = vpop.eup %5039 }
 0x653   :  { %v4527_v55 = vadd.f32 1.0, %v5040_v8 }
 0x655   :  { %v4528_v1 = vmul.f32 0.5, %v4527_v55 }
 0x657   :  { %4530 = vst.msk [vmem:[%s6634_s15] sm:$0xf] %vm4529_vm2, %v4528_v1 }
 0x658   :  { %4535 = vsyncpa [#allocation4], 1 }
 0x659   :  { %4536 = vsyncpa [#allocation6], 1 }

</bundles_post_ra>
